<compile_context>
chip_gen: v5e
topology: v5e:2x2
jax: 0.10.0
libtpu: 0.0.40
codegen_flags: <defaults>
</compile_context>

<pallas_src>
import math
import numpy as np
import jax
import jax.numpy as jnp
from jax.experimental import pallas as pl
from jax.experimental.pallas import tpu as pltpu

# Haar wavelet reconstruction filters (pywt.Wavelet('haar').rec_lo / rec_hi),
# hard-coded so no pywt dependency / file IO is needed.
_S = 1.0 / math.sqrt(2.0)
HAAR_REC_LO = [_S, _S]
HAAR_REC_HI = [_S, -_S]

_HP = jax.lax.Precision.HIGHEST


# --------------------------------------------------------------------------- #
# Reference-path helpers (pure JAX / numpy, used only for validation).
# --------------------------------------------------------------------------- #
def build_dwt_matrices(depth, height, width,
                       band_low=HAAR_REC_LO, band_high=HAAR_REC_HI):
    """Deterministic transcription of DWT_3D.get_matrix (numpy). Reference only."""
    band_length = len(band_low)
    assert band_length % 2 == 0
    band_length_half = band_length // 2

    L1 = max(height, width)
    L = L1 // 2
    matrix_h = np.zeros((L, L1 + band_length - 2), dtype=np.float64)
    matrix_g = np.zeros((L1 - L, L1 + band_length - 2), dtype=np.float64)
    end = None if band_length_half == 1 else (-band_length_half + 1)

    index = 0
    for i in range(L):
        for j in range(band_length):
            matrix_h[i, index + j] = band_low[j]
        index += 2
    matrix_h_0 = matrix_h[0:height // 2, 0:height + band_length - 2]
    matrix_h_1 = matrix_h[0:width // 2, 0:width + band_length - 2]
    matrix_h_2 = matrix_h[0:depth // 2, 0:depth + band_length - 2]

    index = 0
    for i in range(L1 - L):
        for j in range(band_length):
            matrix_g[i, index + j] = band_high[j]
        index += 2
    matrix_g_0 = matrix_g[0:height - height // 2, 0:height + band_length - 2]
    matrix_g_1 = matrix_g[0:width - width // 2, 0:width + band_length - 2]
    matrix_g_2 = matrix_g[0:depth - depth // 2, 0:depth + band_length - 2]

    matrix_h_0 = matrix_h_0[:, band_length_half - 1:end]
    matrix_h_1 = matrix_h_1[:, band_length_half - 1:end]
    matrix_h_1 = np.transpose(matrix_h_1)
    matrix_h_2 = matrix_h_2[:, band_length_half - 1:end]
    matrix_g_0 = matrix_g_0[:, band_length_half - 1:end]
    matrix_g_1 = matrix_g_1[:, band_length_half - 1:end]
    matrix_g_1 = np.transpose(matrix_g_1)
    matrix_g_2 = matrix_g_2[:, band_length_half - 1:end]

    f32 = lambda a: jnp.asarray(a, dtype=jnp.float32)
    return (f32(matrix_h_0), f32(matrix_h_1), f32(matrix_h_2),
            f32(matrix_g_0), f32(matrix_g_1), f32(matrix_g_2))


def dwt_3d_ref(x, ml0, ml1, ml2, mh0, mh1, mh2):
    """Direct transcription of DWTFunction_3D.forward (pure JAX, reference)."""
    mm = lambda a, b: jnp.matmul(a, b, precision=_HP)
    t23 = lambda a: jnp.swapaxes(a, 2, 3)
    L = mm(ml0, x)
    Hh = mm(mh0, x)
    LL = t23(mm(L, ml1))
    LH = t23(mm(L, mh1))
    HL = t23(mm(Hh, ml1))
    HH = t23(mm(Hh, mh1))
    LLL = t23(mm(ml2, LL))
    LLH = t23(mm(ml2, LH))
    LHL = t23(mm(ml2, HL))
    LHH = t23(mm(ml2, HH))
    HLL = t23(mm(mh2, LL))
    HLH = t23(mm(mh2, LH))
    HHL = t23(mm(mh2, HL))
    HHH = t23(mm(mh2, HH))
    return (LLL, LLH, LHL, LHH, HLL, HLH, HHL, HHH)


# --------------------------------------------------------------------------- #
# Pallas kernel.
# --------------------------------------------------------------------------- #
def _build_w_matrix(W):
    """(W, W) Haar W-axis analysis matrix, columns = [W-low | W-high] bands.
    Entries are {0, +1, -1} (exact in bf16); the 1/sqrt(2) scale is folded into
    the VPU butterfly stages inside the kernel."""
    W2 = W // 2
    mw = np.zeros((W, W), dtype=np.float32)
    for w2 in range(W2):
        mw[2 * w2, w2] = 1.0
        mw[2 * w2 + 1, w2] = 1.0
        mw[2 * w2, W2 + w2] = 1.0
        mw[2 * w2 + 1, W2 + w2] = -1.0
    return jnp.asarray(mw, dtype=jnp.bfloat16)


def _vmem_budget_bytes():
    """Generation-aware VMEM budget: ~75% of physical VMEM, capped at 96 MiB.
    v5e/v6e (128 MiB physical) -> 96 MiB, v7x (64 MiB physical) -> 48 MiB."""
    phys = None
    try:
        info = pltpu.get_tpu_info()
        for name in ("vmem_capacity_bytes", "vmem_size_bytes", "vmem_bytes"):
            v = getattr(info, name, None)
            if isinstance(v, (int, np.integer)) and int(v) > 0:
                phys = int(v)
                break
    except Exception:
        phys = None
    if not phys:
        phys = 64 << 20            # conservative fallback (v7x per-core VMEM)
    return min((phys * 3) // 4, 96 << 20)


def _block_vmem_bytes(TB, TD2, H2, W):
    """Conservative per-step VMEM estimate: double-buffered input/output blocks
    plus ~3 input-block volumes of live temps (D band + H bands + bf16 split +
    matmul result, processed one D band at a time)."""
    W2 = W // 2
    pad_lane = lambda n: -(-n // 128) * 128
    pad_sub = lambda n: -(-n // 8) * 8
    in_blk = TB * TD2 * pad_sub(2 * H2) * pad_lane(2 * W) * 4
    out_blk = 8 * TB * TD2 * pad_sub(H2) * pad_lane(W2) * 4
    mw_blk = pad_sub(W) * pad_lane(W) * 2
    temps = 3 * in_blk
    return 2 * in_blk + 2 * out_blk + 2 * mw_blk + temps


def _pick_tiles(B, D2, H2, W, budget_bytes):
    """Pick (TB volumes, TD2 depth-rows) per grid step: amortize the ~0.35us/step
    pipeline overhead, stay inside the VMEM budget, and prefer an even number of
    grid steps so both TensorCores of a v7x chip get balanced work."""
    fits = lambda tb, td2: _block_vmem_bytes(tb, td2, H2, W) <= budget_bytes
    # Largest divisor of D2 that fits at TB=1 (whole D2 whenever possible).
    # Tiling D2 needs no halo: each Haar D pair lives inside one d2 index.
    td2 = 1
    for d in range(1, D2 + 1):
        if D2 % d == 0 and fits(1, d):
            td2 = d
    # TODO(synk): if even (TB=1, TD2=1) does not fit (huge H*W slabs), tile H too.
    cands = [t for t in range(1, B + 1) if B % t == 0 and t <= 16 and fits(t, td2)]
    if not cands:
        return 1, td2
    best = max(cands)
    steps = lambda tb: (B // tb) * (D2 // td2)
    even = [t for t in cands if steps(t) % 2 == 0 and 2 * t >= best]
    return (max(even) if even else best), td2


def _make_dwt3d_kernel(TB, TD2, H2, W):
    W2 = W // 2
    M = TB * TD2 * H2
    SD = 0.5                      # D-stage scale (exact in f32)
    SH = float(_S)                # H-stage scale; SD*SH*(+-1 W-matrix) == (1/sqrt2)^3

    def kernel(mw_ref, x_ref,
               lll_ref, llh_ref, lhl_ref, lhh_ref,
               hll_ref, hlh_ref, hhl_ref, hhh_ref):
        # x_ref : (TB, TD2, 2*H2, 2*W)  sublane k = (D parity)*H2 + h2,
        #                               lane    l = (H parity)*W  + w
        # mw_ref: (W, W) bf16, entries {0,+1,-1}; constant index_map -> fetched
        #         once and kept resident in VMEM (no per-step rebuild / re-DMA).
        mw = mw_ref[...]

        def w_stage(t):
            # W-axis Haar analysis (deinterleave + butterfly) on the MXU.
            # t: (TB, TD2, H2, W) f32 -> (TB, TD2, H2, W), lanes [W-lo | W-hi].
            # The +-1 weights are exact in bf16, so a 2-term bf16 split of the
            # activations with DEFAULT-precision matmuls gives ~f32 accuracy at
            # 1/3 of the MXU passes of precision=HIGHEST.
            # NOTE: the M-fold reshape is a free relayout when H2 % 8 == 0;
            # otherwise Mosaic inserts a relayout copy (correct, slower).
            t2 = t.reshape(M, W)
            t_hi = t2.astype(jnp.bfloat16)
            t_lo = (t2 - t_hi.astype(jnp.float32)).astype(jnp.bfloat16)
            dims = (((1,), (0,)), ((), ()))
            r = jax.lax.dot_general(t_hi, mw, dims,
                                    preferred_element_type=jnp.float32)
            r = r + jax.lax.dot_general(t_lo, mw, dims,
                                        preferred_element_type=jnp.float32)
            return r.reshape(TB, TD2, H2, W)

        def emit(dband, o_ll, o_lh, o_hl, o_hh):
            # dband: (TB, TD2, H2, 2*W); contiguous lane halves = H-even | H-odd.
            he = dband[..., 0:W]
            ho = dband[..., W:2 * W]
            r = w_stage((he + ho) * SH)                       # H-low
            o_ll[...] = r[..., 0:W2].astype(o_ll.dtype)
            o_lh[...] = r[..., W2:W].astype(o_lh.dtype)
            r = w_stage((he - ho) * SH)                       # H-high
            o_hl[...] = r[..., 0:W2].astype(o_hl.dtype)
            o_hh[...] = r[..., W2:W].astype(o_hh.dtype)

        # D-axis Haar butterfly on the VPU (exact f32, contiguous sublane halves).
        de = x_ref[:, :, 0:H2, :]
        do = x_ref[:, :, H2:2 * H2, :]
        # Finish (and store) the D-low path before materializing the D-high one,
        # keeping the live VMEM temp set to ~3 input blocks.
        emit((de + do) * SD, lll_ref, llh_ref, lhl_ref, lhh_ref)
        emit((de - do) * SD, hll_ref, hlh_ref, hhl_ref, hhh_ref)

    return kernel


def dwt_3d_pallas(x, wavename="haar"):
    """Pallas TPU implementation of DWT_3D(wavename).forward(x) (NCDHW, f32)."""
    assert wavename == "haar"  # TODO(synk): longer pywt filters need the generic boundary-wrapped matrix path.
    assert x.ndim == 5
    N, C, D, H, W = x.shape
    assert D % 2 == 0 and H % 2 == 0 and W % 2 == 0
    D2, H2, W2 = D // 2, H // 2, W // 2
    B = N * C

    # Free row-major repack: x[b, 2*d2+i, 2*h2+j, w] -> xv[b, d2, i*H2+h2, j*W+w].
    # D-parity -> sublane halves, H-parity -> lane halves: all even/odd extraction
    # in the kernel is contiguous slicing.  Lane-dense for W >= 64.
    xv = x.reshape(B, D2, 2 * H2, 2 * W)
    mw = _build_w_matrix(W)                         # (W, W) bf16, entries {0,+-1}

    budget = _vmem_budget_bytes()
    TB, TD2 = _pick_tiles(B, D2, H2, W, budget)
    grid = (B // TB, D2 // TD2)

    band_shape = jax.ShapeDtypeStruct((B, D2, H2, W2), x.dtype)
    out_spec = pl.BlockSpec((TB, TD2, H2, W2), lambda b, d: (b, d, 0, 0))

    outs = pl.pallas_call(
        _make_dwt3d_kernel(TB, TD2, H2, W),
        out_shape=tuple(band_shape for _ in range(8)),
        grid=grid,
        in_specs=[
            pl.BlockSpec((W, W), lambda b, d: (0, 0)),        # resident filter
            pl.BlockSpec((TB, TD2, 2 * H2, 2 * W), lambda b, d: (b, d, 0, 0)),
        ],
        out_specs=tuple(out_spec for _ in range(8)),
        compiler_params=pltpu.CompilerParams(
            dimension_semantics=("parallel", "parallel"),
            vmem_limit_bytes=budget,
        ),
    )(mw, xv)

    # (B, D2, H2, W2) -> (N, C, D2, H2, W2): leading-dim split, metadata-only.
    # Sub-band order matches the reference: (LLL, LLH, LHL, LHH, HLL, HLH, HHL, HHH).
    return tuple(o.reshape(N, C, D2, H2, W2) for o in outs)


# --------------------------------------------------------------------------- #
# Self-test.
# --------------------------------------------------------------------------- #
if __name__ == "__main__":
    key = jax.random.PRNGKey(0)
    N, C, D, H, W = 2, 4, 16, 16, 16
    x = jax.random.normal(key, (N, C, D, H, W), dtype=jnp.float32)

    outs = dwt_3d_pallas(x)
    outs = jax.block_until_ready(outs)

    ml0, ml1, ml2, mh0, mh1, mh2 = build_dwt_matrices(D, H, W)
    refs = dwt_3d_ref(x, ml0, ml1, ml2, mh0, mh1, mh2)

    for o, r in zip(outs, refs):
        assert o.shape == r.shape == (N, C, D // 2, H // 2, W // 2)
        np.testing.assert_allclose(np.asarray(o), np.asarray(r),
                                   rtol=1e-3, atol=1e-3)
    print("KERNEL_OK")
</pallas_src>

<mosaic_0001>
module attributes {stable_mosaic.version = 11 : i64} {
  func.func @kernel(%arg0: i32, %arg1: i32, %arg2: memref<16x16xbf16, #tpu.memory_space<vmem>>, %arg3: memref<4x8x16x32xf32, #tpu.memory_space<vmem>>, %arg4: memref<4x8x8x8xf32, #tpu.memory_space<vmem>>, %arg5: memref<4x8x8x8xf32, #tpu.memory_space<vmem>>, %arg6: memref<4x8x8x8xf32, #tpu.memory_space<vmem>>, %arg7: memref<4x8x8x8xf32, #tpu.memory_space<vmem>>, %arg8: memref<4x8x8x8xf32, #tpu.memory_space<vmem>>, %arg9: memref<4x8x8x8xf32, #tpu.memory_space<vmem>>, %arg10: memref<4x8x8x8xf32, #tpu.memory_space<vmem>>, %arg11: memref<4x8x8x8xf32, #tpu.memory_space<vmem>>) attributes {dimension_semantics = [#tpu.dimension_semantics<parallel>, #tpu.dimension_semantics<parallel>], iteration_bounds = array<i64: 2, 1>, scalar_prefetch = 0 : i64, scratch_operands = 0 : i64, tpu.core_type = #tpu.core_type<tc>, window_params = [{pipeline_mode = #tpu.pipeline_mode<synchronous>, transform_indices = @transform_0, window_bounds = array<i64: 16, 16>}, {transform_indices = @transform_1, window_bounds = array<i64: 4, 8, 16, 32>}, {transform_indices = @transform_2, window_bounds = array<i64: 4, 8, 8, 8>}, {transform_indices = @transform_3, window_bounds = array<i64: 4, 8, 8, 8>}, {transform_indices = @transform_4, window_bounds = array<i64: 4, 8, 8, 8>}, {transform_indices = @transform_5, window_bounds = array<i64: 4, 8, 8, 8>}, {transform_indices = @transform_6, window_bounds = array<i64: 4, 8, 8, 8>}, {transform_indices = @transform_7, window_bounds = array<i64: 4, 8, 8, 8>}, {transform_indices = @transform_8, window_bounds = array<i64: 4, 8, 8, 8>}, {transform_indices = @transform_9, window_bounds = array<i64: 4, 8, 8, 8>}]} {
    %c0 = arith.constant 0 : index
    %c0_0 = arith.constant 0 : index
    %0 = vector.load %arg2[%c0, %c0_0] : memref<16x16xbf16, #tpu.memory_space<vmem>>, vector<16x16xbf16>
    %c0_1 = arith.constant 0 : index
    %c0_2 = arith.constant 0 : index
    %c0_3 = arith.constant 0 : index
    %c0_4 = arith.constant 0 : index
    %1 = vector.load %arg3[%c0_1, %c0_2, %c0_3, %c0_4] : memref<4x8x16x32xf32, #tpu.memory_space<vmem>>, vector<4x8x8x32xf32>
    %c0_5 = arith.constant 0 : index
    %c0_6 = arith.constant 0 : index
    %c8 = arith.constant 8 : index
    %c0_7 = arith.constant 0 : index
    %2 = vector.load %arg3[%c0_5, %c0_6, %c8, %c0_7] : memref<4x8x16x32xf32, #tpu.memory_space<vmem>>, vector<4x8x8x32xf32>
    %3 = arith.addf %1, %2 : vector<4x8x8x32xf32>
    %cst = arith.constant 5.000000e-01 : f32
    %4 = vector.broadcast %cst : f32 to vector<4x8x8x32xf32>
    %5 = arith.mulf %3, %4 : vector<4x8x8x32xf32>
    %6 = vector.extract_strided_slice %5 {offsets = [0, 0, 0, 0], sizes = [4, 8, 8, 16], strides = [1, 1, 1, 1]} : vector<4x8x8x32xf32> to vector<4x8x8x16xf32>
    %7 = vector.extract_strided_slice %5 {offsets = [0, 0, 0, 16], sizes = [4, 8, 8, 16], strides = [1, 1, 1, 1]} : vector<4x8x8x32xf32> to vector<4x8x8x16xf32>
    %8 = arith.addf %6, %7 : vector<4x8x8x16xf32>
    %cst_8 = arith.constant 0.707106769 : f32
    %9 = vector.broadcast %cst_8 : f32 to vector<4x8x8x16xf32>
    %10 = arith.mulf %8, %9 : vector<4x8x8x16xf32>
    %11 = vector.shape_cast %10 : vector<4x8x8x16xf32> to vector<256x16xf32>
    %12 = arith.truncf %11 : vector<256x16xf32> to vector<256x16xbf16>
    %13 = arith.extf %12 : vector<256x16xbf16> to vector<256x16xf32>
    %14 = arith.subf %11, %13 : vector<256x16xf32>
    %15 = arith.truncf %14 : vector<256x16xf32> to vector<256x16xbf16>
    %cst_9 = arith.constant dense<0.000000e+00> : vector<256x16xf32>
    %16 = tpu.matmul %12, %0, %cst_9 {dimension_numbers = #tpu.dot_dimension_numbers<[1], [0], [0], [1], [0, 0, 1, 1], [], []>} : vector<256x16xbf16>, vector<16x16xbf16>, vector<256x16xf32> -> vector<256x16xf32>
    %cst_10 = arith.constant dense<0.000000e+00> : vector<256x16xf32>
    %17 = tpu.matmul %15, %0, %cst_10 {dimension_numbers = #tpu.dot_dimension_numbers<[1], [0], [0], [1], [0, 0, 1, 1], [], []>} : vector<256x16xbf16>, vector<16x16xbf16>, vector<256x16xf32> -> vector<256x16xf32>
    %18 = arith.addf %16, %17 : vector<256x16xf32>
    %19 = vector.shape_cast %18 : vector<256x16xf32> to vector<4x8x8x16xf32>
    %20 = vector.extract_strided_slice %19 {offsets = [0, 0, 0, 0], sizes = [4, 8, 8, 8], strides = [1, 1, 1, 1]} : vector<4x8x8x16xf32> to vector<4x8x8x8xf32>
    %c0_11 = arith.constant 0 : index
    %c0_12 = arith.constant 0 : index
    %c0_13 = arith.constant 0 : index
    %c0_14 = arith.constant 0 : index
    %21 = vector.load %arg4[%c0_11, %c0_12, %c0_13, %c0_14] : memref<4x8x8x8xf32, #tpu.memory_space<vmem>>, vector<4x8x8x8xf32>
    tpu.vector_store %arg4[%c0_11, %c0_12, %c0_13, %c0_14], %20 {strides = array<i32>} : memref<4x8x8x8xf32, #tpu.memory_space<vmem>>, vector<4x8x8x8xf32>,
    %22 = vector.extract_strided_slice %19 {offsets = [0, 0, 0, 8], sizes = [4, 8, 8, 8], strides = [1, 1, 1, 1]} : vector<4x8x8x16xf32> to vector<4x8x8x8xf32>
    %c0_15 = arith.constant 0 : index
    %c0_16 = arith.constant 0 : index
    %c0_17 = arith.constant 0 : index
    %c0_18 = arith.constant 0 : index
    %23 = vector.load %arg5[%c0_15, %c0_16, %c0_17, %c0_18] : memref<4x8x8x8xf32, #tpu.memory_space<vmem>>, vector<4x8x8x8xf32>
    tpu.vector_store %arg5[%c0_15, %c0_16, %c0_17, %c0_18], %22 {strides = array<i32>} : memref<4x8x8x8xf32, #tpu.memory_space<vmem>>, vector<4x8x8x8xf32>,
    %24 = arith.subf %6, %7 : vector<4x8x8x16xf32>
    %cst_19 = arith.constant 0.707106769 : f32
    %25 = vector.broadcast %cst_19 : f32 to vector<4x8x8x16xf32>
    %26 = arith.mulf %24, %25 : vector<4x8x8x16xf32>
    %27 = vector.shape_cast %26 : vector<4x8x8x16xf32> to vector<256x16xf32>
    %28 = arith.truncf %27 : vector<256x16xf32> to vector<256x16xbf16>
    %29 = arith.extf %28 : vector<256x16xbf16> to vector<256x16xf32>
    %30 = arith.subf %27, %29 : vector<256x16xf32>
    %31 = arith.truncf %30 : vector<256x16xf32> to vector<256x16xbf16>
    %cst_20 = arith.constant dense<0.000000e+00> : vector<256x16xf32>
    %32 = tpu.matmul %28, %0, %cst_20 {dimension_numbers = #tpu.dot_dimension_numbers<[1], [0], [0], [1], [0, 0, 1, 1], [], []>} : vector<256x16xbf16>, vector<16x16xbf16>, vector<256x16xf32> -> vector<256x16xf32>
    %cst_21 = arith.constant dense<0.000000e+00> : vector<256x16xf32>
    %33 = tpu.matmul %31, %0, %cst_21 {dimension_numbers = #tpu.dot_dimension_numbers<[1], [0], [0], [1], [0, 0, 1, 1], [], []>} : vector<256x16xbf16>, vector<16x16xbf16>, vector<256x16xf32> -> vector<256x16xf32>
    %34 = arith.addf %32, %33 : vector<256x16xf32>
    %35 = vector.shape_cast %34 : vector<256x16xf32> to vector<4x8x8x16xf32>
    %36 = vector.extract_strided_slice %35 {offsets = [0, 0, 0, 0], sizes = [4, 8, 8, 8], strides = [1, 1, 1, 1]} : vector<4x8x8x16xf32> to vector<4x8x8x8xf32>
    %c0_22 = arith.constant 0 : index
    %c0_23 = arith.constant 0 : index
    %c0_24 = arith.constant 0 : index
    %c0_25 = arith.constant 0 : index
    %37 = vector.load %arg6[%c0_22, %c0_23, %c0_24, %c0_25] : memref<4x8x8x8xf32, #tpu.memory_space<vmem>>, vector<4x8x8x8xf32>
    tpu.vector_store %arg6[%c0_22, %c0_23, %c0_24, %c0_25], %36 {strides = array<i32>} : memref<4x8x8x8xf32, #tpu.memory_space<vmem>>, vector<4x8x8x8xf32>,
    %38 = vector.extract_strided_slice %35 {offsets = [0, 0, 0, 8], sizes = [4, 8, 8, 8], strides = [1, 1, 1, 1]} : vector<4x8x8x16xf32> to vector<4x8x8x8xf32>
    %c0_26 = arith.constant 0 : index
    %c0_27 = arith.constant 0 : index
    %c0_28 = arith.constant 0 : index
    %c0_29 = arith.constant 0 : index
    %39 = vector.load %arg7[%c0_26, %c0_27, %c0_28, %c0_29] : memref<4x8x8x8xf32, #tpu.memory_space<vmem>>, vector<4x8x8x8xf32>
    tpu.vector_store %arg7[%c0_26, %c0_27, %c0_28, %c0_29], %38 {strides = array<i32>} : memref<4x8x8x8xf32, #tpu.memory_space<vmem>>, vector<4x8x8x8xf32>,
    %40 = arith.subf %1, %2 : vector<4x8x8x32xf32>
    %cst_30 = arith.constant 5.000000e-01 : f32
    %41 = vector.broadcast %cst_30 : f32 to vector<4x8x8x32xf32>
    %42 = arith.mulf %40, %41 : vector<4x8x8x32xf32>
    %43 = vector.extract_strided_slice %42 {offsets = [0, 0, 0, 0], sizes = [4, 8, 8, 16], strides = [1, 1, 1, 1]} : vector<4x8x8x32xf32> to vector<4x8x8x16xf32>
    %44 = vector.extract_strided_slice %42 {offsets = [0, 0, 0, 16], sizes = [4, 8, 8, 16], strides = [1, 1, 1, 1]} : vector<4x8x8x32xf32> to vector<4x8x8x16xf32>
    %45 = arith.addf %43, %44 : vector<4x8x8x16xf32>
    %cst_31 = arith.constant 0.707106769 : f32
    %46 = vector.broadcast %cst_31 : f32 to vector<4x8x8x16xf32>
    %47 = arith.mulf %45, %46 : vector<4x8x8x16xf32>
    %48 = vector.shape_cast %47 : vector<4x8x8x16xf32> to vector<256x16xf32>
    %49 = arith.truncf %48 : vector<256x16xf32> to vector<256x16xbf16>
    %50 = arith.extf %49 : vector<256x16xbf16> to vector<256x16xf32>
    %51 = arith.subf %48, %50 : vector<256x16xf32>
    %52 = arith.truncf %51 : vector<256x16xf32> to vector<256x16xbf16>
    %cst_32 = arith.constant dense<0.000000e+00> : vector<256x16xf32>
    %53 = tpu.matmul %49, %0, %cst_32 {dimension_numbers = #tpu.dot_dimension_numbers<[1], [0], [0], [1], [0, 0, 1, 1], [], []>} : vector<256x16xbf16>, vector<16x16xbf16>, vector<256x16xf32> -> vector<256x16xf32>
    %cst_33 = arith.constant dense<0.000000e+00> : vector<256x16xf32>
    %54 = tpu.matmul %52, %0, %cst_33 {dimension_numbers = #tpu.dot_dimension_numbers<[1], [0], [0], [1], [0, 0, 1, 1], [], []>} : vector<256x16xbf16>, vector<16x16xbf16>, vector<256x16xf32> -> vector<256x16xf32>
    %55 = arith.addf %53, %54 : vector<256x16xf32>
    %56 = vector.shape_cast %55 : vector<256x16xf32> to vector<4x8x8x16xf32>
    %57 = vector.extract_strided_slice %56 {offsets = [0, 0, 0, 0], sizes = [4, 8, 8, 8], strides = [1, 1, 1, 1]} : vector<4x8x8x16xf32> to vector<4x8x8x8xf32>
    %c0_34 = arith.constant 0 : index
    %c0_35 = arith.constant 0 : index
    %c0_36 = arith.constant 0 : index
    %c0_37 = arith.constant 0 : index
    %58 = vector.load %arg8[%c0_34, %c0_35, %c0_36, %c0_37] : memref<4x8x8x8xf32, #tpu.memory_space<vmem>>, vector<4x8x8x8xf32>
    tpu.vector_store %arg8[%c0_34, %c0_35, %c0_36, %c0_37], %57 {strides = array<i32>} : memref<4x8x8x8xf32, #tpu.memory_space<vmem>>, vector<4x8x8x8xf32>,
    %59 = vector.extract_strided_slice %56 {offsets = [0, 0, 0, 8], sizes = [4, 8, 8, 8], strides = [1, 1, 1, 1]} : vector<4x8x8x16xf32> to vector<4x8x8x8xf32>
    %c0_38 = arith.constant 0 : index
    %c0_39 = arith.constant 0 : index
    %c0_40 = arith.constant 0 : index
    %c0_41 = arith.constant 0 : index
    %60 = vector.load %arg9[%c0_38, %c0_39, %c0_40, %c0_41] : memref<4x8x8x8xf32, #tpu.memory_space<vmem>>, vector<4x8x8x8xf32>
    tpu.vector_store %arg9[%c0_38, %c0_39, %c0_40, %c0_41], %59 {strides = array<i32>} : memref<4x8x8x8xf32, #tpu.memory_space<vmem>>, vector<4x8x8x8xf32>,
    %61 = arith.subf %43, %44 : vector<4x8x8x16xf32>
    %cst_42 = arith.constant 0.707106769 : f32
    %62 = vector.broadcast %cst_42 : f32 to vector<4x8x8x16xf32>
    %63 = arith.mulf %61, %62 : vector<4x8x8x16xf32>
    %64 = vector.shape_cast %63 : vector<4x8x8x16xf32> to vector<256x16xf32>
    %65 = arith.truncf %64 : vector<256x16xf32> to vector<256x16xbf16>
    %66 = arith.extf %65 : vector<256x16xbf16> to vector<256x16xf32>
    %67 = arith.subf %64, %66 : vector<256x16xf32>
    %68 = arith.truncf %67 : vector<256x16xf32> to vector<256x16xbf16>
    %cst_43 = arith.constant dense<0.000000e+00> : vector<256x16xf32>
    %69 = tpu.matmul %65, %0, %cst_43 {dimension_numbers = #tpu.dot_dimension_numbers<[1], [0], [0], [1], [0, 0, 1, 1], [], []>} : vector<256x16xbf16>, vector<16x16xbf16>, vector<256x16xf32> -> vector<256x16xf32>
    %cst_44 = arith.constant dense<0.000000e+00> : vector<256x16xf32>
    %70 = tpu.matmul %68, %0, %cst_44 {dimension_numbers = #tpu.dot_dimension_numbers<[1], [0], [0], [1], [0, 0, 1, 1], [], []>} : vector<256x16xbf16>, vector<16x16xbf16>, vector<256x16xf32> -> vector<256x16xf32>
    %71 = arith.addf %69, %70 : vector<256x16xf32>
    %72 = vector.shape_cast %71 : vector<256x16xf32> to vector<4x8x8x16xf32>
    %73 = vector.extract_strided_slice %72 {offsets = [0, 0, 0, 0], sizes = [4, 8, 8, 8], strides = [1, 1, 1, 1]} : vector<4x8x8x16xf32> to vector<4x8x8x8xf32>
    %c0_45 = arith.constant 0 : index
    %c0_46 = arith.constant 0 : index
    %c0_47 = arith.constant 0 : index
    %c0_48 = arith.constant 0 : index
    %74 = vector.load %arg10[%c0_45, %c0_46, %c0_47, %c0_48] : memref<4x8x8x8xf32, #tpu.memory_space<vmem>>, vector<4x8x8x8xf32>
    tpu.vector_store %arg10[%c0_45, %c0_46, %c0_47, %c0_48], %73 {strides = array<i32>} : memref<4x8x8x8xf32, #tpu.memory_space<vmem>>, vector<4x8x8x8xf32>,
    %75 = vector.extract_strided_slice %72 {offsets = [0, 0, 0, 8], sizes = [4, 8, 8, 8], strides = [1, 1, 1, 1]} : vector<4x8x8x16xf32> to vector<4x8x8x8xf32>
    %c0_49 = arith.constant 0 : index
    %c0_50 = arith.constant 0 : index
    %c0_51 = arith.constant 0 : index
    %c0_52 = arith.constant 0 : index
    %76 = vector.load %arg11[%c0_49, %c0_50, %c0_51, %c0_52] : memref<4x8x8x8xf32, #tpu.memory_space<vmem>>, vector<4x8x8x8xf32>
    tpu.vector_store %arg11[%c0_49, %c0_50, %c0_51, %c0_52], %75 {strides = array<i32>} : memref<4x8x8x8xf32, #tpu.memory_space<vmem>>, vector<4x8x8x8xf32>,
    return
  }
  func.func @transform_0(%arg0: i32, %arg1: i32) -> (i32, i32) {
    %c0_i32 = arith.constant 0 : i32
    %c0_i32_0 = arith.constant 0 : i32
    %c0_i32_1 = arith.constant 0 : i32
    return %c0_i32, %c0_i32_0 : i32, i32
  }
  func.func @transform_1(%arg0: i32, %arg1: i32) -> (i32, i32, i32, i32) {
    %c0_i32 = arith.constant 0 : i32
    %c0_i32_0 = arith.constant 0 : i32
    %c0_i32_1 = arith.constant 0 : i32
    return %arg0, %arg1, %c0_i32, %c0_i32_0 : i32, i32, i32, i32
  }
  func.func @transform_2(%arg0: i32, %arg1: i32) -> (i32, i32, i32, i32) {
    %c0_i32 = arith.constant 0 : i32
    %c0_i32_0 = arith.constant 0 : i32
    %c0_i32_1 = arith.constant 0 : i32
    return %arg0, %arg1, %c0_i32, %c0_i32_0 : i32, i32, i32, i32
  }
  func.func @transform_3(%arg0: i32, %arg1: i32) -> (i32, i32, i32, i32) {
    %c0_i32 = arith.constant 0 : i32
    %c0_i32_0 = arith.constant 0 : i32
    %c0_i32_1 = arith.constant 0 : i32
    return %arg0, %arg1, %c0_i32, %c0_i32_0 : i32, i32, i32, i32
  }
  func.func @transform_4(%arg0: i32, %arg1: i32) -> (i32, i32, i32, i32) {
    %c0_i32 = arith.constant 0 : i32
    %c0_i32_0 = arith.constant 0 : i32
    %c0_i32_1 = arith.constant 0 : i32
    return %arg0, %arg1, %c0_i32, %c0_i32_0 : i32, i32, i32, i32
  }
  func.func @transform_5(%arg0: i32, %arg1: i32) -> (i32, i32, i32, i32) {
    %c0_i32 = arith.constant 0 : i32
    %c0_i32_0 = arith.constant 0 : i32
    %c0_i32_1 = arith.constant 0 : i32
    return %arg0, %arg1, %c0_i32, %c0_i32_0 : i32, i32, i32, i32
  }
  func.func @transform_6(%arg0: i32, %arg1: i32) -> (i32, i32, i32, i32) {
    %c0_i32 = arith.constant 0 : i32
    %c0_i32_0 = arith.constant 0 : i32
    %c0_i32_1 = arith.constant 0 : i32
    return %arg0, %arg1, %c0_i32, %c0_i32_0 : i32, i32, i32, i32
  }
  func.func @transform_7(%arg0: i32, %arg1: i32) -> (i32, i32, i32, i32) {
    %c0_i32 = arith.constant 0 : i32
    %c0_i32_0 = arith.constant 0 : i32
    %c0_i32_1 = arith.constant 0 : i32
    return %arg0, %arg1, %c0_i32, %c0_i32_0 : i32, i32, i32, i32
  }
  func.func @transform_8(%arg0: i32, %arg1: i32) -> (i32, i32, i32, i32) {
    %c0_i32 = arith.constant 0 : i32
    %c0_i32_0 = arith.constant 0 : i32
    %c0_i32_1 = arith.constant 0 : i32
    return %arg0, %arg1, %c0_i32, %c0_i32_0 : i32, i32, i32, i32
  }
  func.func @transform_9(%arg0: i32, %arg1: i32) -> (i32, i32, i32, i32) {
    %c0_i32 = arith.constant 0 : i32
    %c0_i32_0 = arith.constant 0 : i32
    %c0_i32_1 = arith.constant 0 : i32
    return %arg0, %arg1, %c0_i32, %c0_i32_0 : i32, i32, i32, i32
  }
}

</mosaic_0001>

<bundles_post_ra>
// kernel: tpu_custom_call.1
= control target key start
LH: loop header
LB: loop body
LE: loop exit
PB: predicated region body
PF: predicated region fallthrough
CT: control target
= control target key end

     0   :  { %s7805_s0 = inlined_call_operand.hbm [shape: bf16[16,16], index: 0, kind: input, shape index: {}]   ;;  %s7806_s1 = inlined_call_operand.hbm [shape: f32[8,8,16,32], index: 1, kind: input, shape index: {}]   ;;  %s7807_s2 = inlined_call_operand.hbm [shape: f32[8,8,8,8], index: 2, kind: output, shape index: {0}]   ;;  %s7808_s3 = inlined_call_operand.hbm [shape: f32[8,8,8,8], index: 3, kind: output, shape index: {1}]   ;;  %s7809_s4 = inlined_call_operand.hbm [shape: f32[8,8,8,8], index: 4, kind: output, shape index: {2}]   ;;  %s7810_s5 = inlined_call_operand.hbm [shape: f32[8,8,8,8], index: 5, kind: output, shape index: {3}]   ;;  %s7811_s6 = inlined_call_operand.hbm [shape: f32[8,8,8,8], index: 6, kind: output, shape index: {4}]   ;;  %s7812_s7 = inlined_call_operand.hbm [shape: f32[8,8,8,8], index: 7, kind: output, shape index: {5}]   ;;  %s7813_s8 = inlined_call_operand.hbm [shape: f32[8,8,8,8], index: 8, kind: output, shape index: {6}]   ;;  %s7814_s9 = inlined_call_operand.hbm [shape: f32[8,8,8,8], index: 9, kind: output, shape index: {7}]  }
   0x1   :  { %7997 = sst [smem:[#allocation102_spill]] %s7805_s0 }
   0x2   :  { %7998 = sst [smem:[#allocation103_spill]] %s7806_s1 }
   0x3   :  { %7999 = sst [smem:[#allocation104_spill]] %s7807_s2 }
   0x4   :  { %8000 = sst [smem:[#allocation105_spill]] %s7813_s8 }
   0x5   :  { %8001 = sst [smem:[#allocation106_spill]] %s7814_s9 }
   0x6   :  { %15 = vsyncpa [#allocation3], 0 }
   0x7   :  { %16 = vsyncpa [#allocation6], 0 }
   0x8   :  { %18 = vsyncpa [#allocation6 + $0x1], 0 }
   0x9   :  { %19 = vsyncpa [#allocation4], 0 }
   0xa   :  { %21 = vsyncpa [#allocation4 + $0x1], 0 }
   0xb   :  { %22 = vsyncpa [#allocation9], 0 }
   0xc   :  { %24 = vsyncpa [#allocation9 + $0x1], 0 }
   0xd   :  { %25 = vsyncpa [#allocation12], 0 }
   0xe   :  { %27 = vsyncpa [#allocation12 + $0x1], 0 }
   0xf   :  { %28 = vsyncpa [#allocation15], 0 }
  0x10   :  { %30 = vsyncpa [#allocation15 + $0x1], 0 }
  0x11   :  { %31 = vsyncpa [#allocation18], 0 }
  0x12   :  { %33 = vsyncpa [#allocation18 + $0x1], 0  ;;  %s5107_s30 = smov 0   ;;  %s5109_s10 = smov 0  }
  0x13   :  { %s5111_s11 = smov 0   ;;  %s5113_s12 = smov 0  }
  0x14   :  { %s5115_s13 = smov 0   ;;  %s5117_s14 = smov 0  }
  0x15 LB: > { %8002 = sst [smem:[#allocation26_spill]] %s5026_s30  ;;  %s5138_s15 = sadd.s32 4294967295, %s5046_s14   ;;  %s5046_s14 = sphi %s5117_s14, %s39_s14   ;;  %s5042_s13 = sphi %s5115_s13, %s8332_s13   ;;  %s5038_s12 = sphi %s5113_s12, %s8331_s12   ;;  %s5034_s11 = sphi %s5111_s11, %s8330_s11   ;;  %s5030_s10 = sphi %s5109_s10, %s8334_s10   ;;  %s5026_s30 = sphi %s5107_s30, %s8333_s30  }
  0x16   : > { %8003 = sst [smem:[#allocation27_spill]] %s5034_s11  ;;  %s7815_s16 = sadd.s32 4294967294, %s5046_s14  }
  0x17   : > { %8004 = sst [smem:[#allocation28_spill]] %s5042_s13  ;;  %p94_p0 = scmp.ne.s32.totalorder %s5030_s10, %s5026_s30 }
  0x18   : > { %8005 = sst [smem:[#allocation29_spill]] %s5046_s14  ;;  %p95_p1 = scmp.eq.s32.totalorder %s5138_s15, 0 }
  0x19   : > { %p120_p2 = scmp.eq.s32.totalorder %s5138_s15, 1  ;;  %p126_p3 = scmp.eq.s32.totalorder %s7815_s16, 1 }
  0x1a   : > { %p5149_p4 = por %p95_p1, %p94_p0  ;;  %p4369_p5 = scmp.ge.s32.totalorder %s5046_s14, 1 }
  0x1b   : > { %p5154_p6 = por %p126_p3, %p94_p0  ;;  %p329_p7 = scmp.lt.s32.totalorder %s5046_s14, 3 }
  0x1c   : > { %s8009_s0 = sld [smem:[#allocation102_spill]]  ;;  %s5048_s23 = smov [#allocation2]  }
  0x1d   : > { %s8007_s18 = scalar_select %p5154_p6, 1, 0 }
  0x1e   : > { %p5162_p8 = pnand %p4369_p5, %p329_p7  ;;  %s342_s24 = sshll.u32 %s5048_s23, 4  ;;  %s343_s24 = int_to_ptr.vmem [resolvable:$true] %s342_s24 }
  0x1f   : > { %8008 = sst [smem:[#allocation30_spill]] %s8007_s18  ;;  %p4371_p11 = scmp.ge.s32.totalorder %s5046_s14, 2 }
  0x20   : > { %p4594_p9 = pneg %p5162_p8  ;;  %s5049_s25 = smov 64  }
  0x21   : > { %s5050_s26 = smov 4   ;;  %s51_s27 = sadd.s32 1, %s5042_s13 }
  0x22   : > { %s340_s21 = sshll.u32 %s8009_s0, 4  ;;  %p4595_p10 = pnand %p4594_p9, %p95_p1  ;;  %s341_s21 = int_to_ptr.hbm [resolvable:$true] %s340_s21 }
  0x23   : > { %p53_p12 = scmp.ge.s32.totalorder %s51_s27, 2  ;;  %s81_s28 = sadd.s32 1, %s5034_s11 }
  0x24   : > { %4597 = dma.hbm_to_vmem [thread:$0]  (!%p4595_p10), %s341_s21, 128, %s343_s24, [#allocation3], %s5049_s25, %s5049_s25, %s5050_s26  }
  0x25   : > { %p88_p13 = scmp.ne.s32.totalorder %s5034_s11, %s5030_s10  ;;  %p89_p0 = scmp.eq.s32.totalorder %s5046_s14, 0 }
  0x26   : > { %s8336_s27 = smov (%p53_p12, %s51_s27), 0  ;;  %p4628_p7 = scmp.lt.s32.totalorder %s5046_s14, 2 }
  0x27   : > { %8011 = sst [smem:[#allocation31_spill]] %s8336_s27  ;;  %p5178_p3 = por %p89_p0, %p88_p13 }
  0x28   : > { %p5184_p5 = por %p120_p2, %p88_p13  ;;  %s76_s20 = ssub.s32 %s5042_s13, %s8336_s27 }
  0x29   : > { %p79_p9 = scmp.eq.s32.totalorder %s76_s20, 0  ;;  %s356_s21 = sand.u32 1, %s5034_s11  }
  0x2a   : > { %s4372_s23 = sshll.u32 %s356_s21, 9  ;;  %s4554_s25 = sshll.u32 %s5042_s13, 9 }
  0x2b   : > { %s5193_s24 = scalar_select %p79_p9, %s5034_s11, %s81_s28  }
  0x2c   : > { %s8015_s1 = sld [smem:[#allocation103_spill]]  ;;  %s360_s18 = scalar_lea.vmem [#allocation5], %s4372_s23 }
  0x2d   : > { %8014 = sst [smem:[#allocation32_spill]] %s5193_s24  ;;  %s372_s30 = sshll.u32 %s360_s18, 4  ;;  %s373_s30 = int_to_ptr.vmem [resolvable:$true] %s372_s30 }
  0x2e   : > { %p4599_p2 = pnand %p4628_p7, %p5178_p3  ;;  %s357_s8 = scalar_lea.sflag [#allocation6], %s356_s21 }
  0x2f   : > { %s5051_s27 = smov 128   ;;  %s5052_s14 = smov 8  }
  0x30   : > { %384 = sbr.rel (%p5162_p8) target bundleno = 992 (0x3e0), region = 28 }
  0x32   : > { %s369_s0 = scalar_lea.hbm %s8015_s1, %s4554_s25 }
  0x33   : > { %s370_s9 = sshll.u32 %s369_s0, 4  ;;  %s371_s9 = int_to_ptr.hbm [resolvable:$true] %s370_s9 }
  0x34   : > { %4601 = dma.hbm_to_vmem [thread:$0]  (!%p4599_p2), %s371_s9, 8192, %s373_s30, %s357_s8, %s5051_s27, %s5051_s27, %s5052_s14  }
  0x35   : > { %4997 = dma.done.wait (%p95_p1), [#allocation3], 128  }
  0x36   : > { %4999 = vsyncadd (%p95_p1), [#allocation3], 4294967168  ;;  %s5208_s0 = sand.u32 1, %s5030_s10  }
  0x37   : > { %s4378_s16 = sshll.u32 %s5208_s0, 9  ;;  %s392_s18 = scalar_lea.sflag [#allocation6], %s5208_s0 }
  0x38   : > { %s5212_s28 = scalar_lea.vmem [#allocation5], %s4378_s16 }
  0x39   : > { %5001 = dma.done.wait (%p5149_p4), %s392_s18, 8192  }
  0x3a   : > { %5003 = vsyncadd (%p5149_p4), %s392_s18, 4294959104  ;;  %v5219_v0 = vld [vmem:[%s5212_s28] sm:$0xff]  ;;  %v5222_v1 = vld [vmem:[%s5212_s28 + $0x8] sm:$0xff]  ;;  %s5053_s8 = smov 112   ;;  %vm925_vm0 = vcmask 130048   ;;  %s5913_s9 = sshll.u32 %s5208_s0, 8 }
  0x3b   : > { %v5225_v2 = vld [vmem:[%s5212_s28 + $0x20] sm:$0xff]  ;;  %v551_v3 = vadd.f32 %v5222_v1, %v5219_v0  ;;  %v5230_v4 = vld [vmem:[%s5212_s28 + $0x28] sm:$0xff]  ;;  %v5235_v6 = vld [vmem:[%s5212_s28 + $0x10] sm:$0xff]  ;;  %vm1280_vm1 = vcmask 64512   ;;  %s5918_s30 = scalar_lea.vmem [#allocation7], %s5913_s9  ;;  %s7988_s14 = smov 120  }
  0x3c   : > { %v553_v5 = vadd.f32 %v5230_v4, %v5225_v2  ;;  %v5238_v7 = vld [vmem:[%s5212_s28 + $0x18] sm:$0xff]  ;;  %v5241_v8 = vld [vmem:[%s5212_s28 + $0x40] sm:$0xff]  ;;  %v5246_v10 = vld [vmem:[%s5212_s28 + $0x30] sm:$0xff]  ;;  %s5932_s17 = scalar_lea.vmem [#allocation10], %s5913_s9  ;;  %s6495_s22 = scalar_lea.vmem [#allocation8], %s5913_s9 }
  0x3d   : > { %v5243_v9 = vmul.f32 0.5, %v551_v3  ;;  %v5249_v11 = vld [vmem:[%s5212_s28 + $0x38] sm:$0xff]  ;;  %v5252_v12 = vld [vmem:[%s5212_s28 + $0x48] sm:$0xff]  ;;  %v552_v15 = vadd.f32 %v5238_v7, %v5235_v6  ;;  %v5263_v16 = vld [vmem:[%s5212_s28 + $0x50] sm:$0xff]  ;;  %s6671_s27 = scalar_lea.vmem [#allocation11], %s5913_s9  ;;  %s7073_s29 = scalar_lea.vmem [#allocation13], %s5913_s9 }
  0x3e   : > { %v5254_v13 = vmul.f32 0.5, %v553_v5  ;;  %v555_v14 = vadd.f32 %v5252_v12, %v5241_v8  ;;  %v5266_v17 = vld [vmem:[%s5212_s28 + $0x58] sm:$0xff]  ;;  %v554_v18 = vadd.f32 %v5249_v11, %v5246_v10  ;;  %v5283_v23 = vld [vmem:[%s5212_s28 + $0x60] sm:$0xff]  ;;  %v5286_v24 = vld [vmem:[%s5212_s28 + $0x68] sm:$0xff]  ;;  %s7095_s20 = scalar_lea.vmem [#allocation16], %s5913_s9  ;;  %s7270_s21 = scalar_lea.vmem [#allocation14], %s5913_s9 }
  0x3f   : > { %647 = vrot.lane.b32.xlu0 %v5243_v9, %s5053_s8  ;;  %v556_v20 = vadd.f32 %v5266_v17, %v5263_v16  ;;  %v5278_v21 = vmul.f32 0.5, %v552_v15  ;;  %v5289_v25 = vld [vmem:[%s5212_s28 + $0x70] sm:$0xff]  ;;  %v5292_v26 = vld [vmem:[%s5212_s28 + $0x78] sm:$0xff]  ;;  %v557_v28 = vadd.f32 %v5286_v24, %v5283_v23  ;;  %v5301_v29 = vld [vmem:[%s5212_s28 + $0x80] sm:$0xff]  ;;  %s7303_s23 = scalar_lea.vmem [#allocation17], %s5913_s9  ;;  %s7494_s25 = sand.u32 1, %s5138_s15  }
  0x40   : > { %651 = vrot.lane.b32.xlu1 %v5254_v13, %s5053_s8  ;;  %v5272_v19 = vmul.f32 0.5, %v555_v14  ;;  %v5280_v22 = vmul.f32 0.5, %v554_v18  ;;  %v5304_v30 = vld [vmem:[%s5212_s28 + $0x88] sm:$0xff]  ;;  %v558_v31 = vadd.f32 %v5292_v26, %v5289_v25  ;;  %v5319_v35 = vld [vmem:[%s5212_s28 + $0x90] sm:$0xff]  ;;  %v5322_v36 = vld [vmem:[%s5212_s28 + $0x98] sm:$0xff]  ;;  %s7497_s26 = sshll.u32 %s5038_s12, 8 }
  0x41   : > { %v5294_v27 = vmul.f32 0.5, %v556_v20  ;;  %v559_v32 = vadd.f32 %v5304_v30, %v5301_v29  ;;  %v5314_v33 = vmul.f32 0.5, %v557_v28  ;;  %8016 = vst [vmem:[#allocation33_spill] sm:$0xff] %v5319_v35  ;;  %v5325_v37 = vld [vmem:[%s5212_s28 + $0xa0] sm:$0xff]  ;;  %v5328_v38 = vld [vmem:[%s5212_s28 + $0xa8] sm:$0xff]  ;;  %v560_v40 = vadd.f32 %v5322_v36, %v5319_v35  ;;  %v5337_v41 = vld [vmem:[%s5212_s28 + $0xb0] sm:$0xff]  ;;  %s3941_s16 = scalar_lea.hbm %s7810_s5, %s7497_s26 }
  0x42   : > { %655 = vrot.lane.b32.xlu2 %v5272_v19, %s5053_s8  ;;  %v5316_v34 = vmul.f32 0.5, %v558_v31  ;;  %8017 = vst [vmem:[#allocation34_spill] sm:$0xff] %v5322_v36  ;;  %v5340_v42 = vld [vmem:[%s5212_s28 + $0xb8] sm:$0xff]  ;;  %v561_v43 = vadd.f32 %v5328_v38, %v5325_v37  ;;  %v5355_v47 = vld [vmem:[%s5212_s28 + $0xc0] sm:$0xff]  ;;  %v5358_v48 = vld [vmem:[%s5212_s28 + $0xc8] sm:$0xff]  ;;  %s3902_s15 = sshll.u32 %s6495_s22, 4  ;;  %s7509_s15 = int_to_ptr.vmem [resolvable:$true] %s3902_s15 }
  0x43   : > { %v5330_v39 = vmul.f32 0.5, %v559_v32  ;;  %v562_v44 = vadd.f32 %v5340_v42, %v5337_v41  ;;  %v5350_v45 = vmul.f32 0.5, %v560_v40  ;;  %v5361_v49 = vld [vmem:[%s5212_s28 + $0xd0] sm:$0xff]  ;;  %v5364_v50 = vld [vmem:[%s5212_s28 + $0xd8] sm:$0xff]  ;;  %v563_v52 = vadd.f32 %v5358_v48, %v5355_v47  ;;  %v5399_v60 = vld [vmem:[%s5212_s28 + $0xe0] sm:$0xff]  ;;  %s3942_s18 = sshll.u32 %s6671_s27, 4  ;;  %s3943_s18 = int_to_ptr.vmem [resolvable:$true] %s3942_s18 }
  0x44   : > { %v5352_v46 = vmul.f32 0.5, %v561_v43  ;;  %v564_v53 = vadd.f32 %v5364_v50, %v5361_v49  ;;  %v5387_v56 = vld [vmem:[%s5212_s28 + $0xf0] sm:$0xff]  ;;  %v5390_v57 = vld [vmem:[%s5212_s28 + $0xf8] sm:$0xff]  ;;  %8025 = vst [vmem:[#allocation42_spill] sm:$0xff] %v5399_v60  ;;  %v5402_v61 = vld [vmem:[%s5212_s28 + $0xe8] sm:$0xff]  ;;  %s4768_s11 = scalar_lea.hbm %s7808_s3, 512 }
  0x45   : > { %v5366_v51 = vmul.f32 0.5, %v562_v44  ;;  %v5378_v54 = vmul.f32 0.5, %v563_v52  ;;  %8022 = vst [vmem:[#allocation39_spill] sm:$0xff] %v5387_v56  ;;  %v566_v58 = vadd.f32 %v5390_v57, %v5387_v56  ;;  %v565_v62 = vadd.f32 %v5402_v61, %v5399_v60  ;;  %v5411_v3 = vld [vmem:[%s5212_s28 + $0x100] sm:$0xff]  ;;  %v5414_v5 = vld [vmem:[%s5212_s28 + $0x108] sm:$0xff]  ;;  %v4555_v14 = vld [vmem:[#allocation2] sm:$0xff] }
  0x46   : > { %8018 = vst [vmem:[#allocation35_spill] sm:$0xff] %v5352_v46  ;;  %v5380_v55 = vmul.f32 0.5, %v564_v53  ;;  %v567_v15 = vadd.f32 %v5414_v5, %v5411_v3  ;;  %1198 = vmatpush.bf16.msra.mxu1 %v4555_v14  ;;  %1921 = vmatpush.bf16.msra.mxu3 %v4555_v14  ;;  %v5421_v20 = vld [vmem:[%s5212_s28 + $0x110] sm:$0xff]  ;;  %v5424_v28 = vld [vmem:[%s5212_s28 + $0x118] sm:$0xff]  ;;  %v5441_v44 = vld [vmem:[%s5212_s28 + $0x140] sm:$0xff] }
  0x47   : > { %649 = vrot.lane.b32.xlu0 %v5278_v21, %s5053_s8  ;;  %8019 = vst [vmem:[#allocation36_spill] sm:$0xff] %v5366_v51  ;;  %v5394_v59 = vmul.f32 0.5, %v566_v58  ;;  %v5406_v63 = vmul.f32 0.5, %v565_v62  ;;  %981 = vmatpush.bf16.msra.mxu0 %v4555_v14  ;;  %v568_v31 = vadd.f32 %v5424_v28, %v5421_v20  ;;  %v5435_v40 = vld [vmem:[%s5212_s28 + $0x130] sm:$0xff]  ;;  %v5438_v43 = vld [vmem:[%s5212_s28 + $0x138] sm:$0xff]  ;;  %v5446_v53 = vld [vmem:[%s5212_s28 + $0x148] sm:$0xff] }
  0x48   : > { %653 = vrot.lane.b32.xlu1 %v5280_v22, %s5053_s8  ;;  %8020 = vst [vmem:[#allocation37_spill] sm:$0xff] %v5378_v54  ;;  %v5418_v18 = vmul.f32 0.5, %v567_v15  ;;  %1704 = vmatpush.bf16.msra.mxu2 %v4555_v14  ;;  %v570_v52 = vadd.f32 %v5438_v43, %v5435_v40  ;;  %v5449_v58 = vld [vmem:[%s5212_s28 + $0x120] sm:$0xff]  ;;  %v571_v62 = vadd.f32 %v5446_v53, %v5441_v44 }
  0x49   : > { %8021 = vst [vmem:[#allocation38_spill] sm:$0xff] %v5380_v55  ;;  %v5430_v32 = vmul.f32 0.5, %v568_v31  ;;  %v5457_v15 = vld [vmem:[%s5212_s28 + $0x160] sm:$0xff]  ;;  %v5460_v31 = vld [vmem:[%s5212_s28 + $0x168] sm:$0xff] }
  0x4a   : > { %657 = vrot.lane.b32.xlu2 %v5294_v27, %s5053_s8  ;;  %8023 = vst [vmem:[#allocation40_spill] sm:$0xff] %v5390_v57  ;;  %2835 = vmatpush.bf16.msrb.mxu1 %v4555_v14 }
  0x4b   : > { %8024 = vst [vmem:[#allocation41_spill] sm:$0xff] %v5394_v59  ;;  %2618 = vmatpush.bf16.msrb.mxu0 %v4555_v14  ;;  %3557 = vmatpush.bf16.msrb.mxu3 %v4555_v14 }
  0x4c   : > { %8026 = vst [vmem:[#allocation43_spill] sm:$0xff] %v5402_v61  ;;  %3340 = vmatpush.bf16.msrb.mxu2 %v4555_v14  ;;  %v5454_v14 = vld [vmem:[%s5212_s28 + $0x128] sm:$0xff] }
  0x4d   : > { %8027 = vst [vmem:[#allocation44_spill] sm:$0xff] %v5406_v63 }
  0x4e   : > { %8028 = vst [vmem:[#allocation45_spill] sm:$0xff] %v5418_v18 }
  0x4f   : > { %659 = vrot.lane.b32.xlu0 %v5314_v33, %s5053_s8  ;;  %8029 = vst [vmem:[#allocation46_spill] sm:$0xff] %v5421_v20  ;;  %v5505_v20 = vld [vmem:[%s5212_s28 + $0x1a0] sm:$0xff] }
  0x50   : > { %661 = vrot.lane.b32.xlu1 %v5316_v34, %s5053_s8  ;;  %8030 = vst [vmem:[#allocation47_spill] sm:$0xff] %v5424_v28  ;;  %v5516_v28 = vld [vmem:[%s5212_s28 + $0x158] sm:$0xff] }
  0x51   : > { %8031 = vst [vmem:[#allocation48_spill] sm:$0xff] %v5430_v32 }
  0x52   : > { %663 = vrot.lane.b32.xlu2 %v5330_v39, %s5053_s8  ;;  %8032 = vst [vmem:[#allocation49_spill] sm:$0xff] %v5435_v40  ;;  %v5484_v40 = vld [vmem:[%s5212_s28 + $0x178] sm:$0xff] }
  0x53   : > { %8033 = vst [vmem:[#allocation50_spill] sm:$0xff] %v5438_v43  ;;  %v5497_v43 = vld [vmem:[%s5212_s28 + $0x190] sm:$0xff] }
  0x54   : > { %8034 = vst [vmem:[#allocation51_spill] sm:$0xff] %v5441_v44 }
  0x55   : > { %8035 = vst [vmem:[#allocation52_spill] sm:$0xff] %v5446_v53 }
  0x56   : > { %8036 = vst [vmem:[#allocation53_spill] sm:$0xff] %v5449_v58 }
  0x57   : > { %665 = vrot.lane.b32.xlu0 %v5350_v45, %s5053_s8  ;;  %8037 = vst [vmem:[#allocation54_spill] sm:$0xff] %v5454_v14 }
  0x58   : > { %667 = vrot.lane.b32.xlu1 %v5352_v46, %s5053_s8  ;;  %8038 = vst [vmem:[#allocation55_spill] sm:$0xff] %v5457_v15 }
  0x59   : > { %8039 = vst [vmem:[#allocation56_spill] sm:$0xff] %v5460_v31 }
  0x5a   : > { %669 = vrot.lane.b32.xlu2 %v5366_v51, %s5053_s8  ;;  %8045 = vst [vmem:[#allocation62_spill] sm:$0xff] %v5484_v40 }
  0x5b   : > { %8047 = vst [vmem:[#allocation64_spill] sm:$0xff] %v5497_v43 }
  0x5c   : > { %8049 = vst [vmem:[#allocation66_spill] sm:$0xff] %v5505_v20 }
  0x5d   : > { %8052 = vst [vmem:[#allocation69_spill] sm:$0xff] %v5516_v28 }
  0x5f   : > { %671 = vrot.lane.b32.xlu0 %v5378_v54, %s5053_s8  ;;  %v573_v54 = vadd.f32 %v5460_v31, %v5457_v15 }
  0x60   : > { %673 = vrot.lane.b32.xlu1 %v5380_v55, %s5053_s8  ;;  %v5481_v55 = vld [vmem:[%s5212_s28 + $0x170] sm:$0xff] }
  0x61   : > { %8044 = vst [vmem:[#allocation61_spill] sm:$0xff] %v5481_v55 }
  0x62   : > { %675 = vrot.lane.b32.xlu2 %v5406_v63, %s5053_s8 }
  0x67   : > { %677 = vrot.lane.b32.xlu0 %v5394_v59, %s5053_s8  ;;  %v5466_v59 = vmul.f32 0.5, %v571_v62 }
  0x68   : > { %679 = vrot.lane.b32.xlu1 %v5418_v18, %s5053_s8  ;;  %v5462_v18 = vmul.f32 0.5, %v570_v52  ;;  %v5478_v52 = vmul.f32 0.5, %v573_v54 }
  0x69   : > { %8041 = vst [vmem:[#allocation58_spill] sm:$0xff] %v5466_v59 }
  0x6a   : > { %681 = vrot.lane.b32.xlu2 %v5430_v32, %s5053_s8  ;;  %8040 = vst [vmem:[#allocation57_spill] sm:$0xff] %v5462_v18  ;;  %v569_v32 = vadd.f32 %v5454_v14, %v5449_v58  ;;  %v5528_v58 = vld [vmem:[%s5212_s28 + $0x1c8] sm:$0xff] }
  0x6b   : > { %8043 = vst [vmem:[#allocation60_spill] sm:$0xff] %v5478_v52 }
  0x6c   : > { %v5470_v63 = vmul.f32 0.5, %v569_v32  ;;  %8055 = vst [vmem:[#allocation72_spill] sm:$0xff] %v5528_v58 }
  0x6e   : > { %8042 = vst [vmem:[#allocation59_spill] sm:$0xff] %v5470_v63 }
  0x6f   : > { %683 = vrot.lane.b32.xlu0 %v5470_v63, %s5053_s8  ;;  %v574_v63 = vadd.f32 %v5484_v40, %v5481_v55 }
  0x70   : > { %685 = vrot.lane.b32.xlu1 %v5462_v18, %s5053_s8 }
  0x71   : > { %v5492_v54 = vmul.f32 0.5, %v574_v63  ;;  %v5508_v63 = vld [vmem:[%s5212_s28 + $0x1a8] sm:$0xff] }
  0x72   : > { %687 = vrot.lane.b32.xlu2 %v5466_v59, %s5053_s8  ;;  %8050 = vst [vmem:[#allocation67_spill] sm:$0xff] %v5508_v63  ;;  %v577_v61 = vadd.f32 %v5508_v63, %v5505_v20 }
  0x73   : > { %8046 = vst [vmem:[#allocation63_spill] sm:$0xff] %v5492_v54 }
  0x78   : > { %691 = vrot.lane.b32.xlu1 %v5478_v52, %s5053_s8 }
  0x7a   : > { %693 = vrot.lane.b32.xlu2 %v5492_v54, %s5053_s8  ;;  %v5513_v54 = vld [vmem:[%s5212_s28 + $0x150] sm:$0xff] }
  0x7b   : > { %8051 = vst [vmem:[#allocation68_spill] sm:$0xff] %v5513_v54  ;;  %v572_v56 = vadd.f32 %v5516_v28, %v5513_v54 }
  0x7d   : > { %v5538_v20 = vmul.f32 0.5, %v572_v56 }
  0x7f   : > { %8057 = vst [vmem:[#allocation74_spill] sm:$0xff] %v5538_v20  ;;  %689 = vrot.lane.b32.xlu0 %v5538_v20, %s5053_s8 }
  0x9c   : > { %v5542_v54 = vpop.permute.xlu2 %655 }
  0xb1   : > { %v648_v62 = vpop.permute.xlu0 %647 }
  0xb2   : > { %v743_v32 = vadd.f32 %v648_v62, %v5243_v9  ;;  %v1473_v18 = vsub.f32 %v5243_v9, %v648_v62  ;;  %v652_v15 = vpop.permute.xlu1 %651  ;;  %v5500_v9 = vld [vmem:[%s5212_s28 + $0x198] sm:$0xff] }
  0xb3   : > { %8048 = vst [vmem:[#allocation65_spill] sm:$0xff] %v5500_v9  ;;  %v576_v62 = vadd.f32 %v5500_v9, %v5497_v43  ;;  %v745_v44 = vadd.f32 %v652_v15, %v5254_v13  ;;  %v1475_v43 = vsub.f32 %v5254_v13, %v652_v15  ;;  %v5521_v9 = vld [vmem:[%s5212_s28 + $0x1c0] sm:$0xff] }
  0xb4   : > { %v775_v59 = vmul.f32 0.70710677, %v743_v32  ;;  %v1505_v31 = vmul.f32 0.70710677, %v1473_v18  ;;  %8053 = vst [vmem:[#allocation70_spill] sm:$0xff] %v5521_v9 }
  0xb5   : > { %v5523_v60 = vmul.f32 0.5, %v576_v62  ;;  %v1507_v36 = vmul.f32 0.70710677, %v1475_v43 }
  0xb6   : > { %v807_v55 = vpack.c.bf16 %v775_v59, %v775_v59  ;;  %v1537_v40 = vpack.c.bf16 %v1505_v31, %v1505_v31 }
  0xb7   : > { %8054 = vst [vmem:[#allocation71_spill] sm:$0xff] %v5523_v60  ;;  %697 = vrot.lane.b32.xlu1 %v5523_v60, %s5053_s8 }
  0xb8   : > { %v1569_v14 = vunpack.c.l.bf16 %v1537_v40  ;;  %v1818_v15 = vunpack.c.l.b16 %v1537_v40 }
  0xb9   : > { %v650_v52 = vpop.permute.xlu0 %649 }
  0xba   : > { %v744_v18 = vadd.f32 %v650_v52, %v5278_v21  ;;  %v1474_v32 = vsub.f32 %v5278_v21, %v650_v52  ;;  %v654_v51 = vpop.permute.xlu1 %653  ;;  %v1095_v21 = vunpack.c.l.b16 %v807_v55  ;;  %v839_v52 = vunpack.c.l.bf16 %v807_v55 }
  0xbb   : > { %v746_v62 = vadd.f32 %v654_v51, %v5280_v22  ;;  %v579_v55 = vadd.f32 %v5528_v58, %v5521_v9 }
  0xbc   : > { %v776_v53 = vmul.f32 0.70710677, %v744_v18  ;;  %v1506_v46 = vmul.f32 0.70710677, %v1474_v32  ;;  %v5534_v18 = vmul.f32 0.5, %v577_v61  ;;  %v1476_v32 = vsub.f32 %v5280_v22, %v654_v51 }
  0xbd   : > { %v777_v61 = vmul.f32 0.70710677, %v745_v44  ;;  %v871_v60 = vsub.f32 %v775_v59, %v839_v52  ;;  %v1601_v22 = vsub.f32 %v1505_v31, %v1569_v14  ;;  %v1539_v31 = vpack.c.bf16 %v1507_v36, %v1507_v36  ;;  %v5579_v52 = vld [vmem:[%s5212_s28 + $0x1b0] sm:$0xff] }
  0xbe   : > { %v808_v57 = vpack.c.bf16 %v776_v53, %v776_v53  ;;  %v1538_v13 = vpack.c.bf16 %v1506_v46, %v1506_v46  ;;  %8056 = vst [vmem:[#allocation73_spill] sm:$0xff] %v5534_v18  ;;  %699 = vrot.lane.b32.xlu2 %v5534_v18, %s5053_s8  ;;  %v5551_v18 = vld [vmem:[%s5212_s28 + $0x1d0] sm:$0xff]  ;;  %v1508_v44 = vmul.f32 0.70710677, %v1476_v32 }
  0xbf   : > { %8063 = vst [vmem:[#allocation80_spill] sm:$0xff] %v5579_v52  ;;  %v1820_v20 = vunpack.c.l.b16 %v1539_v31 }
  0xc0   : > { %v1096_v63 = vunpack.c.l.b16 %v808_v57  ;;  %v1819_v35 = vunpack.c.l.b16 %v1538_v13  ;;  %v840_v40 = vunpack.c.l.bf16 %v808_v57  ;;  %v1570_v28 = vunpack.c.l.bf16 %v1538_v13 }
  0xc1   : > { %v778_v57 = vmul.f32 0.70710677, %v746_v62  ;;  %v5548_v13 = vmul.f32 0.5, %v579_v55  ;;  %v658_v55 = vpop.permute.xlu2 %657 }
  0xc2   : > { %v1127_v51 = vpack.c.b16 %v1096_v63, %v1095_v21  ;;  %v1850_v56 = vpack.c.b16 %v1819_v35, %v1818_v15  ;;  %v872_v9 = vsub.f32 %v776_v53, %v840_v40  ;;  %v1602_v58 = vsub.f32 %v1506_v46, %v1570_v28  ;;  %v5556_v35 = vld [vmem:[%s5212_s28 + $0x1d8] sm:$0xff]  ;;  %v5559_v46 = vld [vmem:[%s5212_s28 + $0x180] sm:$0xff]  ;;  %v5562_v28 = vld [vmem:[%s5212_s28 + $0x188] sm:$0xff] }
  0xc3   : > { %8058 = vst [vmem:[#allocation75_spill] sm:$0xff] %v5548_v13  ;;  %703 = vrot.lane.b32.xlu1 %v5548_v13, %s5053_s8  ;;  %v580_v43 = vadd.f32 %v5556_v35, %v5551_v18  ;;  %v5573_v53 = vld [vmem:[%s5212_s28 + $0x1f0] sm:$0xff]  ;;  %v1540_v63 = vpack.c.bf16 %v1508_v44, %v1508_v44  ;;  %v5576_v21 = vld [vmem:[%s5212_s28 + $0x1f8] sm:$0xff]  ;;  %v1477_v13 = vsub.f32 %v5272_v19, %v5542_v54 }
  0xc4   : > { %4407 = vmatmul.msk.bf16.vlgmr.msra.gmra.mxu1 %vm925_vm0, %v1127_v51  ;;  %4439 = vmatmul.msk.bf16.vlgmr.msra.gmra.mxu3 %vm925_vm0, %v1850_v56  ;;  %v903_v59 = vpack.c.bf16 %v872_v9, %v871_v60  ;;  %v1633_v14 = vpack.c.bf16 %v1602_v58, %v1601_v22  ;;  %8059 = vst [vmem:[#allocation76_spill] sm:$0xff] %v5559_v46  ;;  %v5582_v15 = vld [vmem:[%s5212_s28 + $0x1b8] sm:$0xff] }
  0xc5   : > { %8060 = vst [vmem:[#allocation77_spill] sm:$0xff] %v5562_v28  ;;  %v575_v60 = vadd.f32 %v5562_v28, %v5559_v46  ;;  %v809_v58 = vpack.c.bf16 %v777_v61, %v777_v61  ;;  %v810_v9 = vpack.c.bf16 %v778_v57, %v778_v57  ;;  %v5584_v62 = vmul.f32 0.5, %v580_v43 }
  0xc6   : > { %4391 = vmatmul.msk.bf16.vlgmr.msra.gmra.mxu0 %vm925_vm0, %v903_v59  ;;  %4423 = vmatmul.msk.bf16.vlgmr.msra.gmra.mxu2 %vm925_vm0, %v1633_v14  ;;  %8061 = vst [vmem:[#allocation78_spill] sm:$0xff] %v5573_v53  ;;  %v582_v40 = vadd.f32 %v5576_v21, %v5573_v53  ;;  %v2195_v22 = vsub.f32 %v5219_v0, %v5222_v1  ;;  %v1571_v14 = vunpack.c.l.bf16 %v1539_v31  ;;  %v1572_v43 = vunpack.c.l.bf16 %v1540_v63  ;;  %v5618_v31 = vld [vmem:[%s5212_s28 + $0x1e8] sm:$0xff] }
  0xc7   : > { %8062 = vst [vmem:[#allocation79_spill] sm:$0xff] %v5576_v21  ;;  %v5586_v32 = vmul.f32 0.5, %v575_v60  ;;  %705 = vrot.lane.b32.xlu2 %v5584_v62, %s5053_s8  ;;  %v578_v51 = vadd.f32 %v5582_v15, %v5579_v52  ;;  %v841_v56 = vunpack.c.l.bf16 %v809_v58  ;;  %v842_v59 = vunpack.c.l.bf16 %v810_v9 }
  0xc8   : > { %8064 = vst [vmem:[#allocation81_spill] sm:$0xff] %v5582_v15  ;;  %v747_v60 = vadd.f32 %v5542_v54, %v5272_v19  ;;  %v1097_v0 = vunpack.c.l.b16 %v809_v58  ;;  %v1098_v1 = vunpack.c.l.b16 %v810_v9  ;;  %v1821_v52 = vunpack.c.l.b16 %v1540_v63  ;;  %v5615_v9 = vld [vmem:[%s5212_s28 + $0x1e0] sm:$0xff]  ;;  %s3901_s28 = scalar_lea.hbm %s7808_s3, %s7497_s26 }
  0xc9   : > { %8065 = vst [vmem:[#allocation82_spill] sm:$0xff] %v5584_v62  ;;  %695 = vrot.lane.b32.xlu0 %v5586_v32, %s5053_s8  ;;  %v5603_v62 = vmul.f32 0.5, %v582_v40  ;;  %v1478_v15 = vsub.f32 %v5294_v27, %v658_v55  ;;  %v5608_v46 = vmul.f32 0.5, %v2195_v22  ;;  %v5610_v28 = vmul.f32 0.5, %v578_v51  ;;  %s7507_s12 = sshll.u32 %s3901_s28, 4  ;;  %s7992_s28 = scalar_lea.sflag [#allocation9], %s7494_s25  ;;  %s3905_s12 = int_to_ptr.hbm [resolvable:$true] %s7507_s12 }
  0xca   : > { %8066 = vst [vmem:[#allocation83_spill] sm:$0xff] %v5586_v32  ;;  %v748_v32 = vadd.f32 %v658_v55, %v5294_v27  ;;  %v2197_v19 = vsub.f32 %v5225_v2, %v5230_v4  ;;  %v873_v54 = vsub.f32 %v777_v61, %v841_v56  ;;  %v874_v40 = vsub.f32 %v778_v57, %v842_v59  ;;  %s4762_s1 = sshra.s32 %s3905_s12, 4  ;;  %s4763_s1 = int_to_ptr.hbm [resolvable:$true] %s4762_s1 }
  0xcb   : > { %709 = vrot.lane.b32.xlu1 %v5603_v62, %s5053_s8  ;;  %v1603_v53 = vsub.f32 %v1507_v36, %v1571_v14  ;;  %v1604_v21 = vsub.f32 %v1508_v44, %v1572_v43  ;;  %v779_v58 = vmul.f32 0.70710677, %v747_v60  ;;  %v1128_v27 = vpack.c.b16 %v1098_v1, %v1097_v0  ;;  %s4764_s13 = scalar_lea.hbm %s4763_s1, 256  ;;  %p4769_p10 = scmp.lt.s32.totalorder %s4763_s1, %s7808_s3 }
  0xcc   : > { %v1851_v63 = vpack.c.b16 %v1821_v52, %v1820_v20  ;;  %v1509_v55 = vmul.f32 0.70710677, %v1477_v13  ;;  %v5624_v22 = vmul.f32 0.5, %v2197_v19  ;;  %v2198_v2 = vsub.f32 %v5246_v10, %v5249_v11  ;;  %p4765_p1 = scmp.ne.s32.totalorder %s4763_s1, %s4764_s13  ;;  %p4770_p12 = scmp.lt.s32.totalorder %s4768_s11, %s4764_s13 }
  0xcd   : > { %v581_v4 = vadd.f32 %v5618_v31, %v5615_v9  ;;  %v780_v36 = vmul.f32 0.70710677, %v748_v32  ;;  %v1510_v61 = vmul.f32 0.70710677, %v1478_v15  ;;  %v904_v20 = vpack.c.bf16 %v874_v40, %v873_v54 }
  0xce   : > { %8067 = vst [vmem:[#allocation84_spill] sm:$0xff] %v5624_v22  ;;  %v1634_v57 = vpack.c.bf16 %v1604_v21, %v1603_v53  ;;  %v811_v13 = vpack.c.bf16 %v779_v58, %v779_v58  ;;  %v5636_v10 = vmul.f32 0.5, %v2198_v2  ;;  %v2200_v44 = vsub.f32 %v5263_v16, %v5266_v17  ;;  %v662_v53 = vpop.permute.xlu1 %661  ;;  %v660_v21 = vpop.permute.xlu0 %659  ;;  %p4766_p4 = pnand %p4765_p1, %p5184_p5  ;;  %p4771_p13 = por %p4770_p12, %p4769_p10 }
  0xcf   : > { %2291 = vrot.lane.b32.xlu2 %v5608_v46, %s5053_s8  ;;  %v5638_v11 = vmul.f32 0.5, %v581_v4  ;;  %v1541_v52 = vpack.c.bf16 %v1509_v55, %v1509_v55  ;;  %v812_v15 = vpack.c.bf16 %v780_v36, %v780_v36  ;;  %v1542_v32 = vpack.c.bf16 %v1510_v61, %v1510_v61 }
  0xd0   : > { %8068 = vst [vmem:[#allocation85_spill] sm:$0xff] %v5636_v10  ;;  %v843_v51 = vunpack.c.l.bf16 %v811_v13  ;;  %v5646_v56 = vmul.f32 0.5, %v2200_v44  ;;  %v2203_v59 = vsub.f32 %v5301_v29, %v5304_v30  ;;  %v2196_v16 = vsub.f32 %v5235_v6, %v5238_v7  ;;  %p4767_p8 = pneg %p4766_p4 }
  0xd1   : > { %701 = vrot.lane.b32.xlu0 %v5610_v28, %s5053_s8  ;;  %v844_v17 = vunpack.c.l.bf16 %v812_v15  ;;  %v1573_v14 = vunpack.c.l.bf16 %v1541_v52  ;;  %v1574_v43 = vunpack.c.l.bf16 %v1542_v32  ;;  %v1099_v60 = vunpack.c.l.b16 %v811_v13 }
  0xd2   : > { %8069 = vst [vmem:[#allocation86_spill] sm:$0xff] %v5646_v56  ;;  %v1100_v0 = vunpack.c.l.b16 %v812_v15  ;;  %v875_v1 = vsub.f32 %v779_v58, %v843_v51  ;;  %v1822_v19 = vunpack.c.l.b16 %v1541_v52  ;;  %v1823_v54 = vunpack.c.l.b16 %v1542_v32  ;;  %v664_v51 = vpop.permute.xlu2 %663  ;;  %p4772_p0 = pnand %p4771_p13, %p4767_p8 }
  0xd3   : > { %2295 = vrot.lane.b32.xlu1 %v5624_v22, %s5053_s8  ;;  %v750_v40 = vadd.f32 %v662_v53, %v5316_v34  ;;  %v5657_v29 = vmul.f32 0.5, %v2203_v59  ;;  %v5659_v6 = vmul.f32 0.5, %v2196_v16  ;;  %v2202_v7 = vsub.f32 %v5289_v25, %v5292_v26 }
  0xd4   : > { %4408 = vmatmul.msk.bf16.gmra.mxu1 %vm925_vm0, %v1128_v27  ;;  %4440 = vmatmul.msk.bf16.gmra.mxu3 %vm925_vm0, %v1851_v63  ;;  %v749_v27 = vadd.f32 %v660_v21, %v5314_v33  ;;  %v1480_v63 = vsub.f32 %v5316_v34, %v662_v53  ;;  %v1479_v30 = vsub.f32 %v5314_v33, %v660_v21 }
  0xd5   : > { %8070 = vst [vmem:[#allocation87_spill] sm:$0xff] %v5657_v29  ;;  %v876_v58 = vsub.f32 %v780_v36, %v844_v17  ;;  %v1605_v2 = vsub.f32 %v1509_v55, %v1573_v14  ;;  %v1606_v4 = vsub.f32 %v1510_v61, %v1574_v43  ;;  %v782_v13 = vmul.f32 0.70710677, %v750_v40 }
  0xd6   : > { %4392 = vmatmul.msk.bf16.gmra.mxu0 %vm925_vm0, %v904_v20  ;;  %4424 = vmatmul.msk.bf16.gmra.mxu2 %vm925_vm0, %v1634_v57  ;;  %v1129_v20 = vpack.c.b16 %v1100_v0, %v1099_v60  ;;  %v1852_v57 = vpack.c.b16 %v1823_v54, %v1822_v19  ;;  %v781_v44 = vmul.f32 0.70710677, %v749_v27  ;;  %v5668_v34 = vmul.f32 0.5, %v2202_v7  ;;  %v666_v17 = vpop.permute.xlu0 %665 }
  0xd7   : > { %2297 = vrot.lane.b32.xlu2 %v5636_v10, %s5053_s8  ;;  %v2206_v25 = vsub.f32 %v5337_v41, %v5340_v42  ;;  %v2199_v26 = vsub.f32 %v5241_v8, %v5252_v12  ;;  %v1512_v33 = vmul.f32 0.70710677, %v1480_v63  ;;  %v1511_v55 = vmul.f32 0.70710677, %v1479_v30 }
  0xd8   : > { %8071 = vst [vmem:[#allocation88_spill] sm:$0xff] %v5668_v34  ;;  %v905_v36 = vpack.c.bf16 %v876_v58, %v875_v1  ;;  %v1635_v61 = vpack.c.bf16 %v1606_v4, %v1605_v2  ;;  %v814_v52 = vpack.c.bf16 %v782_v13, %v782_v13  ;;  %v813_v15 = vpack.c.bf16 %v781_v44, %v781_v44 }
  0xd9   : > { %707 = vrot.lane.b32.xlu0 %v5638_v11, %s5053_s8  ;;  %v5680_v41 = vmul.f32 0.5, %v2206_v25  ;;  %v5682_v8 = vmul.f32 0.5, %v2199_v26  ;;  %v2205_v12 = vsub.f32 %v5325_v37, %v5328_v38  ;;  %v1544_v42 = vpack.c.bf16 %v1512_v33, %v1512_v33 }
  0xda   : > { %v1543_v32 = vpack.c.bf16 %v1511_v55, %v1511_v55  ;;  %v1101_v53 = vunpack.c.l.b16 %v813_v15  ;;  %v1102_v21 = vunpack.c.l.b16 %v814_v52  ;;  %v845_v59 = vunpack.c.l.bf16 %v813_v15  ;;  %v5708_v4 = vpop.permute.xlu2 %669  ;;  %v8082_v15 = vld [vmem:[#allocation39_spill] sm:$0xff] }
  0xdb   : > { %2301 = vrot.lane.b32.xlu1 %v5646_v56, %s5053_s8  ;;  %8072 = vst [vmem:[#allocation89_spill] sm:$0xff] %v5680_v41  ;;  %v846_v16 = vunpack.c.l.bf16 %v814_v52  ;;  %v5690_v14 = vmul.f32 0.5, %v2205_v12  ;;  %v2208_v43 = vsub.f32 %v5361_v49, %v5364_v50  ;;  %v2201_v37 = vsub.f32 %v5283_v23, %v5286_v24  ;;  %v8081_v52 = vld [vmem:[#allocation40_spill] sm:$0xff] }
  0xdc   : > { %8073 = vst [vmem:[#allocation90_spill] sm:$0xff] %v5682_v8  ;;  %v1824_v38 = vunpack.c.l.b16 %v1543_v32  ;;  %v1825_v60 = vunpack.c.l.b16 %v1544_v42  ;;  %v1575_v0 = vunpack.c.l.bf16 %v1543_v32  ;;  %v1576_v1 = vunpack.c.l.bf16 %v1544_v42 }
  0xdd   : > { %8074 = vst [vmem:[#allocation91_spill] sm:$0xff] %v5690_v14  ;;  %v1130_v19 = vpack.c.b16 %v1102_v21, %v1101_v53  ;;  %v751_v54 = vadd.f32 %v664_v51, %v5330_v39  ;;  %v752_v40 = vadd.f32 %v666_v17, %v5350_v45  ;;  %v877_v27 = vsub.f32 %v781_v44, %v845_v59 }
  0xde   : > { %v878_v63 = vsub.f32 %v782_v13, %v846_v16  ;;  %v1481_v7 = vsub.f32 %v5330_v39, %v664_v51  ;;  %v5701_v49 = vmul.f32 0.5, %v2208_v43  ;;  %v5703_v50 = vmul.f32 0.5, %v2201_v37  ;;  %v668_v16 = vpop.permute.xlu1 %667  ;;  %v8083_v37 = vld [vmem:[#allocation54_spill] sm:$0xff] }
  0xdf   : > { %2307 = vrot.lane.b32.xlu2 %v5657_v29, %s5053_s8  ;;  %v2207_v23 = vsub.f32 %v5355_v47, %v5358_v48  ;;  %v1853_v24 = vpack.c.b16 %v1825_v60, %v1824_v38  ;;  %v1482_v30 = vsub.f32 %v5350_v45, %v666_v17  ;;  %v1607_v58 = vsub.f32 %v1511_v55, %v1575_v0  ;;  %v8078_v48 = vld [vmem:[#allocation34_spill] sm:$0xff]  ;;  %v8079_v45 = vld [vmem:[#allocation33_spill] sm:$0xff]  ;;  %v8085_v0 = vld [vmem:[#allocation43_spill] sm:$0xff] }
  0xe0   : > { %8075 = vst [vmem:[#allocation92_spill] sm:$0xff] %v5701_v49  ;;  %v1608_v2 = vsub.f32 %v1512_v33, %v1576_v1  ;;  %v1513_v39 = vmul.f32 0.70710677, %v1481_v7  ;;  %v2211_v47 = vsub.f32 %v5411_v3, %v5414_v5  ;;  %v2204_v44 = vsub.f32 %v8079_v45, %v8078_v48  ;;  %v8084_v38 = vld [vmem:[#allocation53_spill] sm:$0xff]  ;;  %v8086_v1 = vld [vmem:[#allocation42_spill] sm:$0xff]  ;;  %v8087_v7 = vld [vmem:[#allocation36_spill] sm:$0xff] }
  0xe1   : > { %2293 = vrot.lane.b32.xlu0 %v5659_v6, %s5053_s8  ;;  %8076 = vst [vmem:[#allocation93_spill] sm:$0xff] %v5703_v50  ;;  %v5714_v13 = vmul.f32 0.5, %v2207_v23  ;;  %v1514_v25 = vmul.f32 0.70710677, %v1482_v30  ;;  %v906_v26 = vpack.c.bf16 %v878_v63, %v877_v27  ;;  %v2210_v12 = vsub.f32 %v8082_v15, %v8081_v52 }
  0xe2   : > { %v1636_v33 = vpack.c.bf16 %v1608_v2, %v1607_v58  ;;  %v5726_v3 = vmul.f32 0.5, %v2211_v47  ;;  %v5728_v5 = vmul.f32 0.5, %v2204_v44  ;;  %v5732_v32 = vpop.permute.xlu2 %675  ;;  %v2213_v60 = vsub.f32 %v8084_v38, %v8083_v37  ;;  %v8089_v44 = vld [vmem:[#allocation52_spill] sm:$0xff] }
  0xe3   : > { %2305 = vrot.lane.b32.xlu1 %v5668_v34, %s5053_s8  ;;  %8077 = vst [vmem:[#allocation94_spill] sm:$0xff] %v5714_v13  ;;  %v1546_v42 = vpack.c.bf16 %v1514_v25, %v1514_v25  ;;  %v5738_v43 = vmul.f32 0.5, %v2210_v12  ;;  %v754_v23 = vadd.f32 %v5708_v4, %v8087_v7  ;;  %v8091_v12 = vld [vmem:[#allocation69_spill] sm:$0xff] }
  0xe4   : > { %4409 = vmatmul.msk.bf16.gmra.mxu1 %vm925_vm0, %v1129_v20  ;;  %4441 = vmatmul.msk.bf16.gmra.mxu3 %vm925_vm0, %v1852_v57  ;;  %v783_v20 = vmul.f32 0.70710677, %v751_v54  ;;  %v784_v57 = vmul.f32 0.70710677, %v752_v40  ;;  %8080 = vst [vmem:[#allocation34_spill] sm:$0xff] %v5728_v5  ;;  %v5749_v48 = vmul.f32 0.5, %v2213_v60 }
  0xe5   : > { %v1827_v40 = vunpack.c.l.b16 %v1546_v42  ;;  %v1578_v27 = vunpack.c.l.bf16 %v1546_v42  ;;  %v8092_v42 = vld [vmem:[#allocation68_spill] sm:$0xff] }
  0xe6   : > { %4393 = vmatmul.msk.bf16.gmra.mxu0 %vm925_vm0, %v905_v36  ;;  %4425 = vmatmul.msk.bf16.gmra.mxu2 %vm925_vm0, %v1635_v61  ;;  %v815_v55 = vpack.c.bf16 %v783_v20, %v783_v20  ;;  %v816_v36 = vpack.c.bf16 %v784_v57, %v784_v57  ;;  %v1545_v61 = vpack.c.bf16 %v1513_v39, %v1513_v39 }
  0xe7   : > { %2313 = vrot.lane.b32.xlu2 %v5680_v41, %s5053_s8  ;;  %v1610_v52 = vsub.f32 %v1514_v25, %v1578_v27 }
  0xe8   : > { %v1103_v51 = vunpack.c.l.b16 %v815_v55  ;;  %v1104_v53 = vunpack.c.l.b16 %v816_v36  ;;  %v847_v21 = vunpack.c.l.bf16 %v815_v55  ;;  %v848_v59 = vunpack.c.l.bf16 %v816_v36 }
  0xe9   : > { %2299 = vrot.lane.b32.xlu0 %v5682_v8, %s5053_s8  ;;  %v1577_v17 = vunpack.c.l.bf16 %v1545_v61  ;;  %v1826_v54 = vunpack.c.l.b16 %v1545_v61  ;;  %v1484_v36 = vsub.f32 %v8087_v7, %v5708_v4  ;;  %v8094_v4 = vld [vmem:[#allocation46_spill] sm:$0xff] }
  0xea   : > { %v1131_v63 = vpack.c.b16 %v1104_v53, %v1103_v51  ;;  %v879_v58 = vsub.f32 %v783_v20, %v847_v21  ;;  %v880_v2 = vsub.f32 %v784_v57, %v848_v59  ;;  %v5758_v20 = vpop.permute.xlu2 %681  ;;  %v786_v57 = vmul.f32 0.70710677, %v754_v23  ;;  %v8093_v53 = vld [vmem:[#allocation47_spill] sm:$0xff] }
  0xeb   : > { %2311 = vrot.lane.b32.xlu1 %v5690_v14, %s5053_s8  ;;  %v1609_v47 = vsub.f32 %v1513_v39, %v1577_v17  ;;  %v1854_v55 = vpack.c.b16 %v1827_v40, %v1826_v54  ;;  %v2216_v51 = vsub.f32 %v8092_v42, %v8091_v12  ;;  %v2212_v21 = vsub.f32 %v8094_v4, %v8093_v53  ;;  %v8101_v4 = vld [vmem:[#allocation38_spill] sm:$0xff] }
  0xec   : > { %v1516_v25 = vmul.f32 0.70710677, %v1484_v36  ;;  %v818_v37 = vpack.c.bf16 %v786_v57, %v786_v57  ;;  %v8100_v36 = vld [vmem:[#allocation49_spill] sm:$0xff] }
  0xed   : > { %v1637_v17 = vpack.c.bf16 %v1610_v52, %v1609_v47  ;;  %v5776_v60 = vmul.f32 0.5, %v2216_v51 }
  0xee   : > { %v1548_v40 = vpack.c.bf16 %v1516_v25, %v1516_v25  ;;  %v1106_v7 = vunpack.c.l.b16 %v818_v37 }
  0xef   : > { %2317 = vrot.lane.b32.xlu2 %v5701_v49, %s5053_s8 }
  0xf0   : > { %v1829_v12 = vunpack.c.l.b16 %v1548_v40  ;;  %v1580_v51 = vunpack.c.l.bf16 %v1548_v40 }
  0xf1   : > { %2303 = vrot.lane.b32.xlu0 %v5703_v50, %s5053_s8 }
  0xf3   : > { %2315 = vrot.lane.b32.xlu1 %v5714_v13, %s5053_s8 }
  0xf4   : > { %4410 = vmatmul.msk.bf16.gmra.mxu1 %vm925_vm0, %v1130_v19  ;;  %4442 = vmatmul.msk.bf16.gmra.mxu3 %vm925_vm0, %v1853_v24  ;;  %v2209_v19 = vsub.f32 %v8086_v1, %v8085_v0  ;;  %v8088_v24 = vld [vmem:[#allocation35_spill] sm:$0xff]  ;;  %v5778_v0 = vmul.f32 0.5, %v2212_v21  ;;  %v8095_v1 = vld [vmem:[#allocation62_spill] sm:$0xff] }
  0xf5   : > { %v753_v30 = vadd.f32 %v668_v16, %v8088_v24  ;;  %v1483_v61 = vsub.f32 %v8088_v24, %v668_v16  ;;  %v907_v16 = vpack.c.bf16 %v880_v2, %v879_v58  ;;  %v850_v24 = vunpack.c.l.bf16 %v818_v37  ;;  %v674_v58 = vpop.permute.xlu1 %673  ;;  %v672_v2 = vpop.permute.xlu0 %671 }
  0xf6   : > { %4394 = vmatmul.msk.bf16.gmra.mxu0 %vm925_vm0, %v906_v26  ;;  %4426 = vmatmul.msk.bf16.gmra.mxu2 %vm925_vm0, %v1636_v33  ;;  %v5751_v45 = vmul.f32 0.5, %v2209_v19  ;;  %v8090_v26 = vld [vmem:[#allocation51_spill] sm:$0xff]  ;;  %v8096_v19 = vld [vmem:[#allocation61_spill] sm:$0xff]  ;;  %v756_v21 = vadd.f32 %v674_v58, %v8101_v4 }
  0xf7   : > { %2323 = vrot.lane.b32.xlu2 %v5726_v3, %s5053_s8  ;;  %v2215_v33 = vsub.f32 %v8090_v26, %v8089_v44  ;;  %v785_v39 = vmul.f32 0.70710677, %v753_v30  ;;  %v1515_v59 = vmul.f32 0.70710677, %v1483_v61  ;;  %v2218_v54 = vsub.f32 %v8096_v19, %v8095_v1  ;;  %v5782_v30 = vpop.permute.xlu2 %687  ;;  %v8097_v44 = vld [vmem:[#allocation67_spill] sm:$0xff]  ;;  %v8098_v26 = vld [vmem:[#allocation66_spill] sm:$0xff] }
  0xf9   : > { %2309 = vrot.lane.b32.xlu0 %v5728_v5, %s5053_s8  ;;  %v5764_v15 = vmul.f32 0.5, %v2215_v33  ;;  %v817_v38 = vpack.c.bf16 %v785_v39, %v785_v39  ;;  %v1547_v27 = vpack.c.bf16 %v1515_v59, %v1515_v59  ;;  %v5788_v47 = vmul.f32 0.5, %v2218_v54 }
  0xfa   : > { %v2221_v33 = vsub.f32 %v8098_v26, %v8097_v44  ;;  %v8103_v44 = vld [vmem:[#allocation65_spill] sm:$0xff]  ;;  %v8104_v26 = vld [vmem:[#allocation64_spill] sm:$0xff] }
  0xfb   : > { %2321 = vrot.lane.b32.xlu1 %v5738_v43, %s5053_s8  ;;  %v849_v23 = vunpack.c.l.bf16 %v817_v38  ;;  %v1828_v52 = vunpack.c.l.b16 %v1547_v27  ;;  %v1579_v42 = vunpack.c.l.bf16 %v1547_v27  ;;  %v2220_v27 = vsub.f32 %v8104_v26, %v8103_v44 }
  0xfc   : > { %v5799_v19 = vmul.f32 0.5, %v2221_v33  ;;  %v8107_v33 = vld [vmem:[#allocation55_spill] sm:$0xff] }
  0xfd   : > { %v881_v37 = vsub.f32 %v785_v39, %v849_v23  ;;  %v1855_v40 = vpack.c.b16 %v1829_v12, %v1828_v52  ;;  %v5810_v23 = vmul.f32 0.5, %v2220_v27  ;;  %v5820_v12 = vpop.permute.xlu1 %679 }
  0xff   : > { %2327 = vrot.lane.b32.xlu2 %v5749_v48, %s5053_s8  ;;  %8105 = vst [vmem:[#allocation33_spill] sm:$0xff] %v5810_v23  ;;  %v5818_v52 = vpop.permute.xlu2 %693 }
 0x101   : > { %2319 = vrot.lane.b32.xlu0 %v5751_v45, %s5053_s8 }
 0x103   : > { %2331 = vrot.lane.b32.xlu1 %v5764_v15, %s5053_s8 }
 0x104   : > { %4411 = vmatmul.msk.bf16.gmra.mxu1 %vm925_vm0, %v1131_v63  ;;  %4443 = vmatmul.msk.bf16.gmra.mxu3 %vm925_vm0, %v1854_v55  ;;  %v1105_v63 = vunpack.c.l.b16 %v817_v38  ;;  %v8099_v55 = vld [vmem:[#allocation50_spill] sm:$0xff]  ;;  %v882_v38 = vsub.f32 %v786_v57, %v850_v24  ;;  %v2224_v24 = vsub.f32 %v5551_v18, %v5556_v35 }
 0x105   : > { %v2214_v61 = vsub.f32 %v8100_v36, %v8099_v55  ;;  %v1612_v55 = vsub.f32 %v1516_v25, %v1580_v51  ;;  %v788_v36 = vmul.f32 0.70710677, %v756_v21  ;;  %v8110_v21 = vld [vmem:[#allocation70_spill] sm:$0xff]  ;;  %v5848_v14 = vpop.permute.xlu1 %685 }
 0x106   : > { %4395 = vmatmul.msk.bf16.gmra.mxu0 %vm925_vm0, %v907_v16  ;;  %4427 = vmatmul.msk.bf16.gmra.mxu2 %vm925_vm0, %v1637_v17  ;;  %v1132_v53 = vpack.c.b16 %v1106_v7, %v1105_v63  ;;  %v8102_v16 = vld [vmem:[#allocation37_spill] sm:$0xff]  ;;  %v1486_v63 = vsub.f32 %v8101_v4, %v674_v58  ;;  %v1611_v7 = vsub.f32 %v1515_v59, %v1579_v42  ;;  %v5826_v35 = vmul.f32 0.5, %v2224_v24  ;;  %v8109_v4 = vld [vmem:[#allocation72_spill] sm:$0xff] }
 0x107   : > { %2333 = vrot.lane.b32.xlu2 %v5776_v60, %s5053_s8  ;;  %v755_v17 = vadd.f32 %v672_v2, %v8102_v16  ;;  %v1485_v1 = vsub.f32 %v8102_v16, %v672_v2  ;;  %v5801_v54 = vmul.f32 0.5, %v2214_v61  ;;  %v8106_v2 = vld [vmem:[#allocation56_spill] sm:$0xff]  ;;  %v908_v59 = vpack.c.bf16 %v882_v38, %v881_v37 }
 0x108   : > { %v2217_v61 = vsub.f32 %v8107_v33, %v8106_v2  ;;  %v1518_v25 = vmul.f32 0.70710677, %v1486_v63  ;;  %v1638_v58 = vpack.c.bf16 %v1612_v55, %v1611_v7  ;;  %v820_v42 = vpack.c.bf16 %v788_v36, %v788_v36  ;;  %v8113_v63 = vld [vmem:[#allocation78_spill] sm:$0xff]  ;;  %v8114_v55 = vld [vmem:[#allocation77_spill] sm:$0xff]  ;;  %v8115_v24 = vld [vmem:[#allocation76_spill] sm:$0xff] }
 0x109   : > { %2325 = vrot.lane.b32.xlu0 %v5778_v0, %s5053_s8  ;;  %v787_v39 = vmul.f32 0.70710677, %v755_v17  ;;  %v1517_v57 = vmul.f32 0.70710677, %v1485_v1  ;;  %v2223_v16 = vsub.f32 %v8110_v21, %v8109_v4  ;;  %v2219_v2 = vsub.f32 %v8115_v24, %v8114_v55 }
 0x10a   : > { %v1550_v17 = vpack.c.bf16 %v1518_v25, %v1518_v25  ;;  %v1108_v38 = vunpack.c.l.b16 %v820_v42  ;;  %v852_v44 = vunpack.c.l.bf16 %v820_v42  ;;  %v8116_v42 = vld [vmem:[#allocation44_spill] sm:$0xff] }
 0x10b   : > { %2337 = vrot.lane.b32.xlu1 %v5788_v47, %s5053_s8  ;;  %v819_v51 = vpack.c.bf16 %v787_v39, %v787_v39  ;;  %v1549_v18 = vpack.c.bf16 %v1517_v57, %v1517_v57  ;;  %v5836_v27 = vmul.f32 0.5, %v2223_v16  ;;  %v1487_v4 = vsub.f32 %v8116_v42, %v5732_v32 }
 0x10c   : > { %v884_v16 = vsub.f32 %v788_v36, %v852_v44  ;;  %v2225_v36 = vsub.f32 %v5615_v9, %v5618_v31  ;;  %v8121_v9 = vld [vmem:[#allocation80_spill] sm:$0xff] }
 0x10d   : > { %v1107_v37 = vunpack.c.l.b16 %v819_v51  ;;  %v851_v1 = vunpack.c.l.bf16 %v819_v51  ;;  %v1581_v26 = vunpack.c.l.bf16 %v1549_v18  ;;  %8111 = vst [vmem:[#allocation39_spill] sm:$0xff] %v5836_v27  ;;  %v1830_v33 = vunpack.c.l.b16 %v1549_v18 }
 0x10e   : > { %v757_v51 = vadd.f32 %v5732_v32, %v8116_v42 }
 0x10f   : > { %2343 = vrot.lane.b32.xlu2 %v5799_v19, %s5053_s8  ;;  %v1133_v21 = vpack.c.b16 %v1108_v38, %v1107_v37  ;;  %v883_v13 = vsub.f32 %v787_v39, %v851_v1  ;;  %v1613_v55 = vsub.f32 %v1517_v57, %v1581_v26  ;;  %v1519_v38 = vmul.f32 0.70710677, %v1487_v4 }
 0x110   : > { %v789_v39 = vmul.f32 0.70710677, %v757_v51  ;;  %v5864_v57 = vmul.f32 0.5, %v2225_v36 }
 0x111   : > { %2329 = vrot.lane.b32.xlu0 %v5801_v54, %s5053_s8 }
 0x112   : > { %8119 = vst [vmem:[#allocation53_spill] sm:$0xff] %v5864_v57 }
 0x113   : > { %2341 = vrot.lane.b32.xlu1 %v5810_v23, %s5053_s8 }
 0x114   : > { %4412 = vmatmul.msk.bf16.gmra.mxu1 %vm925_vm0, %v1132_v53  ;;  %4444 = vmatmul.msk.bf16.gmra.mxu3 %vm925_vm0, %v1855_v40  ;;  %v5828_v53 = vmul.f32 0.5, %v2217_v61  ;;  %v8112_v40 = vld [vmem:[#allocation79_spill] sm:$0xff]  ;;  %v1831_v61 = vunpack.c.l.b16 %v1550_v17 }
 0x115   : > { %v2226_v7 = vsub.f32 %v8113_v63, %v8112_v40  ;;  %v8117_v40 = vld [vmem:[#allocation41_spill] sm:$0xff] }
 0x116   : > { %4396 = vmatmul.msk.bf16.gmra.mxu0 %vm925_vm0, %v908_v59  ;;  %4428 = vmatmul.msk.bf16.gmra.mxu2 %vm925_vm0, %v1638_v58  ;;  %8108 = vst [vmem:[#allocation40_spill] sm:$0xff] %v5828_v53  ;;  %v678_v59 = vpop.permute.xlu0 %677  ;;  %v1582_v58 = vunpack.c.l.bf16 %v1550_v17  ;;  %v5855_v17 = vmul.f32 0.5, %v2219_v2  ;;  %v1856_v24 = vpack.c.b16 %v1831_v61, %v1830_v33  ;;  %v821_v2 = vpack.c.bf16 %v789_v39, %v789_v39 }
 0x117   : > { %2349 = vrot.lane.b32.xlu2 %v5826_v35, %s5053_s8  ;;  %v758_v63 = vadd.f32 %v678_v59, %v8117_v40  ;;  %v5853_v18 = vmul.f32 0.5, %v2226_v7  ;;  %v1488_v32 = vsub.f32 %v8117_v40, %v678_v59  ;;  %v8120_v7 = vld [vmem:[#allocation81_spill] sm:$0xff]  ;;  %v1551_v59 = vpack.c.bf16 %v1519_v38, %v1519_v38 }
 0x118   : > { %v5846_v49 = vpop.permute.xlu2 %699  ;;  %8118 = vst [vmem:[#allocation54_spill] sm:$0xff] %v5855_v17  ;;  %v1614_v37 = vsub.f32 %v1518_v25, %v1582_v58  ;;  %v909_v25 = vpack.c.bf16 %v884_v16, %v883_v13  ;;  %v2222_v31 = vsub.f32 %v8121_v9, %v8120_v7  ;;  %v5878_v13 = vpop.permute.xlu1 %691  ;;  %v1109_v51 = vunpack.c.l.b16 %v821_v2  ;;  %v8124_v7 = vld [vmem:[#allocation45_spill] sm:$0xff] }
 0x119   : > { %2335 = vrot.lane.b32.xlu0 %v5828_v53, %s5053_s8  ;;  %v790_v1 = vmul.f32 0.70710677, %v758_v63  ;;  %v1520_v44 = vmul.f32 0.70710677, %v1488_v32  ;;  %v1832_v40 = vunpack.c.l.b16 %v1551_v59  ;;  %v759_v9 = vadd.f32 %v5820_v12, %v8124_v7 }
 0x11a   : > { %v1639_v26 = vpack.c.bf16 %v1614_v37, %v1613_v55  ;;  %v5874_v61 = vmul.f32 0.5, %v2222_v31  ;;  %v1583_v55 = vunpack.c.l.bf16 %v1551_v59  ;;  %v8123_v37 = vld [vmem:[#allocation48_spill] sm:$0xff]  ;;  %v1489_v31 = vsub.f32 %v8124_v7, %v5820_v12 }
 0x11b   : > { %2347 = vrot.lane.b32.xlu1 %v5836_v27, %s5053_s8  ;;  %v822_v33 = vpack.c.bf16 %v790_v1, %v790_v1  ;;  %v1552_v58 = vpack.c.bf16 %v1520_v44, %v1520_v44  ;;  %v760_v36 = vadd.f32 %v5758_v20, %v8123_v37  ;;  %v791_v8 = vmul.f32 0.70710677, %v759_v9 }
 0x11c   : > { %8122 = vst [vmem:[#allocation43_spill] sm:$0xff] %v5874_v61  ;;  %v1615_v5 = vsub.f32 %v1519_v38, %v1583_v55 }
 0x11d   : > { %v1110_v4 = vunpack.c.l.b16 %v822_v33  ;;  %v854_v16 = vunpack.c.l.bf16 %v822_v33  ;;  %v1833_v63 = vunpack.c.l.b16 %v1552_v58 }
 0x11e   : > { %v684_v32 = vpop.permute.xlu0 %683 }
 0x11f   : > { %2353 = vrot.lane.b32.xlu2 %v5853_v18, %s5053_s8  ;;  %v1857_v33 = vpack.c.b16 %v1833_v63, %v1832_v40  ;;  %v886_v41 = vsub.f32 %v790_v1, %v854_v16  ;;  %v823_v1 = vpack.c.bf16 %v791_v8, %v791_v8 }
 0x121   : > { %2339 = vrot.lane.b32.xlu0 %v5855_v17, %s5053_s8  ;;  %v5876_v42 = vpop.permute.xlu2 %705  ;;  %v1111_v55 = vunpack.c.l.b16 %v823_v1 }
 0x123   : > { %2351 = vrot.lane.b32.xlu1 %v5864_v57, %s5053_s8 }
 0x124   : > { %4413 = vmatmul.msk.bf16.gmra.mxu1 %vm925_vm0, %v1133_v21  ;;  %4445 = vmatmul.msk.bf16.gmra.mxu3 %vm925_vm0, %v1856_v24  ;;  %v853_v21 = vunpack.c.l.bf16 %v821_v2  ;;  %v1584_v24 = vunpack.c.l.bf16 %v1552_v58  ;;  %v792_v58 = vmul.f32 0.70710677, %v760_v36 }
 0x126   : > { %4397 = vmatmul.msk.bf16.gmra.mxu0 %vm925_vm0, %v909_v25  ;;  %4429 = vmatmul.msk.bf16.gmra.mxu2 %vm925_vm0, %v1639_v26  ;;  %v1490_v25 = vsub.f32 %v8123_v37, %v5758_v20  ;;  %v1134_v26 = vpack.c.b16 %v1110_v4, %v1109_v51  ;;  %v885_v2 = vsub.f32 %v789_v39, %v853_v21  ;;  %v1521_v20 = vmul.f32 0.70710677, %v1489_v31  ;;  %v5896_v12 = vpop.permute.xlu0 %689  ;;  %v8127_v31 = vld [vmem:[#allocation59_spill] sm:$0xff] }
 0x127   : > { %v1616_v59 = vsub.f32 %v1520_v44, %v1584_v24  ;;  %v824_v39 = vpack.c.bf16 %v792_v58, %v792_v58  ;;  %v855_v21 = vunpack.c.l.bf16 %v823_v1 }
 0x128   : > { %v1522_v34 = vmul.f32 0.70710677, %v1490_v25  ;;  %v910_v51 = vpack.c.bf16 %v886_v41, %v885_v2  ;;  %v1553_v44 = vpack.c.bf16 %v1521_v20, %v1521_v20  ;;  %v8126_v25 = vld [vmem:[#allocation57_spill] sm:$0xff]  ;;  %v761_v2 = vadd.f32 %v684_v32, %v8127_v31 }
 0x129   : > { %2345 = vrot.lane.b32.xlu0 %v5874_v61, %s5053_s8  ;;  %v5890_v29 = vpop.permute.xlu2 %2291  ;;  %v5892_v50 = vpop.permute.xlu1 %697  ;;  %v1640_v4 = vpack.c.bf16 %v1616_v59, %v1615_v5  ;;  %v856_v16 = vunpack.c.l.bf16 %v824_v39  ;;  %v1112_v24 = vunpack.c.l.b16 %v824_v39  ;;  %v1492_v7 = vsub.f32 %v8126_v25, %v5848_v14 }
 0x12a   : > { %v1554_v38 = vpack.c.bf16 %v1522_v34, %v1522_v34  ;;  %v1585_v40 = vunpack.c.l.bf16 %v1553_v44  ;;  %v1834_v37 = vunpack.c.l.b16 %v1553_v44  ;;  %v887_v59 = vsub.f32 %v791_v8, %v855_v21 }
 0x12c   : > { %v1586_v63 = vunpack.c.l.bf16 %v1554_v38  ;;  %v1835_v41 = vunpack.c.l.b16 %v1554_v38  ;;  %v1617_v38 = vsub.f32 %v1521_v20, %v1585_v40 }
 0x12e   : > { %v1858_v39 = vpack.c.b16 %v1835_v41, %v1834_v37  ;;  %v1618_v1 = vsub.f32 %v1522_v34, %v1586_v63 }
 0x131   : > { %v5900_v5 = vpop.permute.xlu2 %2297 }
 0x132   : > { %8125 = vst [vmem:[#allocation42_spill] sm:$0xff] %v5900_v5  ;;  %v1524_v5 = vmul.f32 0.70710677, %v1492_v7 }
 0x134   : > { %4414 = vmatmul.msk.bf16.gmra.mxu1 %vm925_vm0, %v1134_v26  ;;  %4446 = vmatmul.msk.bf16.gmra.mxu3 %vm925_vm0, %v1857_v33  ;;  %v762_v26 = vadd.f32 %v5848_v14, %v8126_v25  ;;  %v1491_v33 = vsub.f32 %v8127_v31, %v684_v32  ;;  %v793_v14 = vmul.f32 0.70710677, %v761_v2  ;;  %v1641_v32 = vpack.c.bf16 %v1618_v1, %v1617_v38 }
 0x135   : > { %v5902_v36 = vpop.permute.xlu1 %703  ;;  %v1556_v40 = vpack.c.bf16 %v1524_v5, %v1524_v5 }
 0x136   : > { %4398 = vmatmul.msk.bf16.gmra.mxu0 %vm925_vm0, %v910_v51  ;;  %4430 = vmatmul.msk.bf16.gmra.mxu2 %vm925_vm0, %v1640_v4  ;;  %v888_v51 = vsub.f32 %v792_v58, %v856_v16  ;;  %v1135_v4 = vpack.c.b16 %v1112_v24, %v1111_v55  ;;  %v794_v56 = vmul.f32 0.70710677, %v762_v26  ;;  %v1523_v25 = vmul.f32 0.70710677, %v1491_v33 }
 0x137   : > { %v825_v20 = vpack.c.bf16 %v793_v14, %v793_v14  ;;  %v1837_v33 = vunpack.c.l.b16 %v1556_v40 }
 0x138   : > { %v911_v8 = vpack.c.bf16 %v888_v51, %v887_v59  ;;  %v1555_v21 = vpack.c.bf16 %v1523_v25, %v1523_v25  ;;  %v1588_v59 = vunpack.c.l.bf16 %v1556_v40 }
 0x139   : > { %v5924_v34 = vpop.permute.xlu2 %2307  ;;  %v857_v26 = vunpack.c.l.bf16 %v825_v20  ;;  %v1113_v51 = vunpack.c.l.b16 %v825_v20 }
 0x13a   : > { %8128 = vst [vmem:[#allocation36_spill] sm:$0xff] %v5924_v34  ;;  %v1587_v31 = vunpack.c.l.bf16 %v1555_v21 }
 0x13b   : > { %v5908_v9 = vpop.permute.xlu0 %695 }
 0x13c   : > { %v1619_v40 = vsub.f32 %v1523_v25, %v1587_v31 }
 0x13d   : > { %v5926_v58 = vpop.permute.xlu1 %709 }
 0x141   : > { %v1200_v44 = vpop.f32.mrf.mxu1 }
 0x143   : > { %v983_v22 = vpop.f32.mrf.mxu0  ;;  %v5929_v63 = vpop.permute.xlu0 %701 }
 0x144   : > { %v1201_v10 = vadd.f32 %v1200_v44, %v983_v22  ;;  %4415 = vmatmul.msk.bf16.gmra.mxu1 %vm925_vm0, %v1135_v4  ;;  %4447 = vmatmul.msk.bf16.gmra.mxu3 %vm925_vm0, %v1858_v39  ;;  %v826_v22 = vpack.c.bf16 %v794_v56, %v794_v56  ;;  %v8129_v39 = vld [vmem:[#allocation58_spill] sm:$0xff] }
 0x145   : > { %v763_v38 = vadd.f32 %v5782_v30, %v8129_v39  ;;  %v1493_v1 = vsub.f32 %v8129_v39, %v5782_v30 }
 0x146   : > { %1281 = vst.msk [vmem:[%s5918_s30] sm:$0xff] %vm1280_vm1, %v1201_v10  ;;  %4399 = vmatmul.msk.bf16.gmra.mxu0 %vm925_vm0, %v911_v8  ;;  %4431 = vmatmul.msk.bf16.gmra.mxu2 %vm925_vm0, %v1641_v32  ;;  %v858_v7 = vunpack.c.l.bf16 %v826_v22  ;;  %v1114_v4 = vunpack.c.l.b16 %v826_v22  ;;  %v8130_v8 = vld [vmem:[#allocation74_spill] sm:$0xff] }
 0x147   : > { %1345 = vrot.lane.b32.xlu2 %v1201_v10, %s7988_s14  ;;  %v1923_v16 = vpop.f32.mrf.mxu3  ;;  %v1836_v10 = vunpack.c.l.b16 %v1555_v21  ;;  %v764_v32 = vadd.f32 %v5896_v12, %v8130_v8  ;;  %v1494_v20 = vsub.f32 %v8130_v8, %v5896_v12  ;;  %v1525_v12 = vmul.f32 0.70710677, %v1493_v1 }
 0x148   : > { %v890_v21 = vsub.f32 %v794_v56, %v858_v7  ;;  %v1136_v30 = vpack.c.b16 %v1114_v4, %v1113_v51 }
 0x149   : > { %v1202_v55 = vpop.f32.mrf.mxu1  ;;  %v1706_v24 = vpop.f32.mrf.mxu2  ;;  %v1859_v22 = vpack.c.b16 %v1837_v33, %v1836_v10  ;;  %v796_v56 = vmul.f32 0.70710677, %v764_v32  ;;  %v1526_v10 = vmul.f32 0.70710677, %v1494_v20  ;;  %v1557_v51 = vpack.c.bf16 %v1525_v12, %v1525_v12 }
 0x14a   : > { %v1924_v37 = vadd.f32 %v1923_v16, %v1706_v24  ;;  %v889_v16 = vsub.f32 %v793_v14, %v857_v26  ;;  %v5948_v24 = vpop.permute.xlu2 %2313  ;;  %v795_v14 = vmul.f32 0.70710677, %v763_v38  ;;  %v8133_v38 = vld [vmem:[#allocation73_spill] sm:$0xff] }
 0x14b   : > { %v985_v41 = vpop.f32.mrf.mxu0  ;;  %8131 = vst [vmem:[#allocation35_spill] sm:$0xff] %v5948_v24  ;;  %v5952_v34 = vpop.permute.xlu0 %707  ;;  %v828_v33 = vpack.c.bf16 %v796_v56, %v796_v56  ;;  %v1558_v4 = vpack.c.bf16 %v1526_v10, %v1526_v10  ;;  %v769_v1 = vadd.f32 %v5846_v49, %v8133_v38  ;;  %v1499_v32 = vsub.f32 %v8133_v38, %v5846_v49  ;;  %v8136_v38 = vld [vmem:[#allocation63_spill] sm:$0xff] }
 0x14c   : > { %2003 = vst.msk [vmem:[%s5932_s17] sm:$0xff] %vm1280_vm1, %v1924_v37  ;;  %v1203_v2 = vadd.f32 %v1202_v55, %v985_v41  ;;  %2067 = vrot.lane.b32.xlu1 %v1924_v37, %s7988_s14  ;;  %v1620_v55 = vsub.f32 %v1524_v5, %v1588_v59  ;;  %v5950_v37 = vpop.permute.xlu1 %2295  ;;  %v912_v7 = vpack.c.bf16 %v890_v21, %v889_v16 }
 0x14d   : > { %8132 = vst [vmem:[#allocation52_spill] sm:$0xff] %v5950_v37  ;;  %v827_v31 = vpack.c.bf16 %v795_v14, %v795_v14  ;;  %v1590_v49 = vunpack.c.l.bf16 %v1558_v4 }
 0x14e   : > { %1282 = vst.msk [vmem:[%s5918_s30 + $0x8] sm:$0xff] %vm1280_vm1, %v1203_v2  ;;  %1347 = vrot.lane.b32.xlu0 %v1203_v2, %s7988_s14  ;;  %v1642_v25 = vpack.c.bf16 %v1620_v55, %v1619_v40  ;;  %v1838_v40 = vunpack.c.l.b16 %v1557_v51 }
 0x14f   : > { %v1925_v44 = vpop.f32.mrf.mxu3  ;;  %v859_v55 = vunpack.c.l.bf16 %v827_v31  ;;  %v1622_v24 = vsub.f32 %v1526_v10, %v1590_v49 }
 0x151   : > { %v1205_v41 = vpop.f32.mrf.mxu1  ;;  %v1708_v2 = vpop.f32.mrf.mxu2 }
 0x152   : > { %v1926_v39 = vadd.f32 %v1925_v44, %v1708_v2  ;;  %v5967_v21 = vpop.permute.xlu2 %2317 }
 0x153   : > { %v988_v26 = vpop.f32.mrf.mxu0  ;;  %8134 = vst [vmem:[#allocation51_spill] sm:$0xff] %v5967_v21  ;;  %v1531_v21 = vmul.f32 0.70710677, %v1499_v32  ;;  %v8138_v32 = vld [vmem:[#allocation82_spill] sm:$0xff] }
 0x154   : > { %2004 = vst.msk [vmem:[%s5932_s17 + $0x8] sm:$0xff] %vm1280_vm1, %v1926_v39  ;;  %v1206_v5 = vadd.f32 %v1205_v41, %v988_v26  ;;  %4448 = vmatmul.msk.bf16.gmra.mxu3 %vm925_vm0, %v1859_v22  ;;  %2069 = vrot.lane.b32.xlu1 %v1926_v39, %s7988_s14  ;;  %v5969_v20 = vpop.permute.xlu1 %2301  ;;  %v860_v41 = vunpack.c.l.bf16 %v828_v33  ;;  %v1589_v39 = vunpack.c.l.bf16 %v1557_v51  ;;  %v5975_v26 = vpop.permute.xlu0 %2293  ;;  %v772_v37 = vadd.f32 %v5876_v42, %v8138_v32 }
 0x155   : > { %4416 = vmatmul.msk.bf16.gmra.mxu1 %vm925_vm0, %v1136_v30  ;;  %8135 = vst [vmem:[#allocation69_spill] sm:$0xff] %v5969_v20  ;;  %v1839_v30 = vunpack.c.l.b16 %v1558_v4  ;;  %v5993_v17 = vpack.c.bf16 %v1531_v21, %v1531_v21 }
 0x156   : > { %1283 = vst.msk [vmem:[%s5918_s30 + $0x10] sm:$0xff] %vm1280_vm1, %v1206_v5  ;;  %4400 = vmatmul.msk.bf16.gmra.mxu0 %vm925_vm0, %v912_v7  ;;  %4432 = vmatmul.msk.bf16.gmra.mxu2 %vm925_vm0, %v1642_v25  ;;  %v801_v7 = vmul.f32 0.70710677, %v769_v1  ;;  %v1115_v25 = vunpack.c.l.b16 %v827_v31  ;;  %v892_v31 = vsub.f32 %v796_v56, %v860_v41  ;;  %v6012_v49 = vmul.f32 0.70710677, %v772_v37 }
 0x157   : > { %v1928_v59 = vpop.f32.mrf.mxu3  ;;  %v1860_v1 = vpack.c.b16 %v1839_v30, %v1838_v40 }
 0x158   : > { %v5987_v20 = vpack.c.bf16 %v801_v7, %v801_v7 }
 0x159   : > { %v1207_v44 = vpop.f32.mrf.mxu1  ;;  %v1711_v8 = vpop.f32.mrf.mxu2 }
 0x15a   : > { %v1929_v16 = vadd.f32 %v1928_v59, %v1711_v8  ;;  %v1116_v59 = vunpack.c.l.b16 %v828_v33  ;;  %v766_v8 = vadd.f32 %v5818_v52, %v8136_v38  ;;  %v1621_v33 = vsub.f32 %v1525_v12, %v1589_v39  ;;  %v6007_v30 = vpop.permute.xlu2 %2323 }
 0x15b   : > { %v990_v22 = vpop.f32.mrf.mxu0 }
 0x15c   : > { %2005 = vst.msk [vmem:[%s5932_s17 + $0x10] sm:$0xff] %vm1280_vm1, %v1929_v16  ;;  %v1208_v2 = vadd.f32 %v1207_v44, %v990_v22  ;;  %2071 = vrot.lane.b32.xlu2 %v1929_v16, %s7988_s14  ;;  %1349 = vrot.lane.b32.xlu1 %v1206_v5, %s7988_s14  ;;  %v1496_v44 = vsub.f32 %v8136_v38, %v5818_v52  ;;  %v8137_v16 = vld [vmem:[#allocation60_spill] sm:$0xff]  ;;  %v5991_v57 = vmul.f32 0.70710677, %v766_v8  ;;  %v6009_v39 = vpop.permute.xlu1 %2305 }
 0x15d   : > { %v765_v5 = vadd.f32 %v5878_v13, %v8137_v16  ;;  %v1495_v51 = vsub.f32 %v8137_v16, %v5878_v13  ;;  %v891_v22 = vsub.f32 %v795_v14, %v859_v55  ;;  %v1137_v38 = vpack.c.b16 %v1116_v59, %v1115_v25  ;;  %8139 = vst [vmem:[#allocation68_spill] sm:$0xff] %v6009_v39 }
 0x15e   : > { %1284 = vst.msk [vmem:[%s5918_s30 + $0x18] sm:$0xff] %vm1280_vm1, %v1208_v2  ;;  %v5995_v16 = vmul.f32 0.70710677, %v1496_v44  ;;  %v1502_v14 = vsub.f32 %v8138_v32, %v5876_v42  ;;  %v1643_v41 = vpack.c.bf16 %v1622_v24, %v1621_v33  ;;  %v865_v42 = vunpack.c.l.bf16 %v5987_v20  ;;  %v6023_v24 = vpop.permute.xlu0 %2299 }
 0x15f   : > { %v1930_v4 = vpop.f32.mrf.mxu3  ;;  %v5999_v56 = vmul.f32 0.70710677, %v765_v5  ;;  %v6001_v12 = vmul.f32 0.70710677, %v1495_v51  ;;  %v913_v55 = vpack.c.bf16 %v892_v31, %v891_v22  ;;  %v2387_v25 = vadd.f32 %v5890_v29, %v5608_v46  ;;  %8140 = vst [vmem:[#allocation47_spill] sm:$0xff] %v6023_v24 }
 0x160   : > { %v6025_v59 = vmul.f32 0.70710677, %v1502_v14  ;;  %v1560_v8 = vpack.c.bf16 %v5995_v16, %v5995_v16  ;;  %v6036_v51 = vsub.f32 %v801_v7, %v865_v42  ;;  %v8141_v14 = vld [vmem:[#allocation71_spill] sm:$0xff] }
 0x161   : > { %v1210_v61 = vpop.f32.mrf.mxu1  ;;  %v1713_v52 = vpop.f32.mrf.mxu2  ;;  %v829_v44 = vpack.c.bf16 %v5999_v56, %v5999_v56  ;;  %v1559_v5 = vpack.c.bf16 %v6001_v12, %v6001_v12 }
 0x162   : > { %v1931_v13 = vadd.f32 %v1930_v4, %v1713_v52  ;;  %v6046_v52 = vmul.f32 0.70710677, %v2387_v25  ;;  %v6052_v7 = vpack.c.bf16 %v6025_v59, %v6025_v59  ;;  %v1498_v25 = vsub.f32 %v8141_v14, %v5892_v50 }
 0x163   : > { %v993_v10 = vpop.f32.mrf.mxu0  ;;  %v861_v42 = vunpack.c.l.bf16 %v829_v44 }
 0x164   : > { %2006 = vst.msk [vmem:[%s5932_s17 + $0x18] sm:$0xff] %vm1280_vm1, %v1931_v13  ;;  %v1211_v40 = vadd.f32 %v1210_v61, %v993_v10  ;;  %4449 = vmatmul.msk.bf16.gmra.mxu3 %vm925_vm0, %v1860_v1  ;;  %2073 = vrot.lane.b32.xlu0 %v1931_v13, %s7988_s14  ;;  %v1595_v61 = vunpack.c.l.bf16 %v5993_v17  ;;  %v6042_v1 = vpack.c.bf16 %v6012_v49, %v6012_v49 }
 0x165   : > { %4417 = vmatmul.msk.bf16.gmra.mxu1 %vm925_vm0, %v1137_v38  ;;  %1351 = vrot.lane.b32.xlu1 %v1208_v2, %s7988_s14  ;;  %v830_v2 = vpack.c.bf16 %v5991_v57, %v5991_v57  ;;  %v3109_v38 = vsub.f32 %v5608_v46, %v5890_v29  ;;  %v768_v10 = vadd.f32 %v5892_v50, %v8141_v14  ;;  %v1591_v46 = vunpack.c.l.bf16 %v1559_v5  ;;  %v8145_v50 = vld [vmem:[#allocation83_spill] sm:$0xff] }
 0x166   : > { %1285 = vst.msk [vmem:[%s5918_s30 + $0x20] sm:$0xff] %vm1280_vm1, %v1211_v40  ;;  %4401 = vmatmul.msk.bf16.gmra.mxu0 %vm925_vm0, %v913_v55  ;;  %4433 = vmatmul.msk.bf16.gmra.mxu2 %vm925_vm0, %v1643_v41  ;;  %v6044_v32 = vsub.f32 %v1531_v21, %v1595_v61  ;;  %v1840_v55 = vunpack.c.l.b16 %v1559_v5  ;;  %v1841_v41 = vunpack.c.l.b16 %v1560_v8  ;;  %v868_v29 = vunpack.c.l.bf16 %v6042_v1  ;;  %v6073_v5 = vpop.permute.xlu1 %2311  ;;  %v6085_v53 = vpop.permute.xlu0 %2303 }
 0x167   : > { %1353 = vrot.lane.b32.xlu2 %v1211_v40, %s7988_s14  ;;  %v1933_v37 = vpop.f32.mrf.mxu3  ;;  %v862_v61 = vunpack.c.l.bf16 %v830_v2  ;;  %v6065_v22 = vpack.c.bf16 %v6046_v52, %v6046_v52  ;;  %v6067_v39 = vmul.f32 0.70710677, %v3109_v38  ;;  %8144 = vst [vmem:[#allocation61_spill] sm:$0xff] %v6073_v5  ;;  %v893_v38 = vsub.f32 %v5999_v56, %v861_v42  ;;  %v8147_v5 = vld [vmem:[#allocation75_spill] sm:$0xff] }
 0x168   : > { %v1861_v4 = vpack.c.b16 %v1841_v41, %v1840_v55  ;;  %8146 = vst [vmem:[#allocation67_spill] sm:$0xff] %v6085_v53  ;;  %v771_v23 = vadd.f32 %v5902_v36, %v8147_v5 }
 0x169   : > { %v1212_v31 = vpop.f32.mrf.mxu1  ;;  %v1716_v33 = vpop.f32.mrf.mxu2  ;;  %8142 = vst [vmem:[#allocation46_spill] sm:$0xff] %v6065_v22  ;;  %v894_v24 = vsub.f32 %v5991_v57, %v862_v61  ;;  %v1598_v57 = vunpack.c.l.bf16 %v6052_v7  ;;  %v2483_v61 = vunpack.c.l.bf16 %v6065_v22 }
 0x16a   : > { %v1934_v13 = vadd.f32 %v1933_v37, %v1716_v33  ;;  %v1117_v37 = vunpack.c.l.b16 %v829_v44  ;;  %v1118_v33 = vunpack.c.l.b16 %v830_v2  ;;  %8143 = vst [vmem:[#allocation62_spill] sm:$0xff] %v6067_v39  ;;  %v767_v2 = vadd.f32 %v5908_v9, %v8145_v50 }
 0x16b   : > { %v995_v40 = vpop.f32.mrf.mxu0  ;;  %v1497_v44 = vsub.f32 %v8145_v50, %v5908_v9  ;;  %v1501_v9 = vsub.f32 %v8147_v5, %v5902_v36  ;;  %v6113_v50 = vsub.f32 %v6012_v49, %v868_v29  ;;  %v1504_v49 = vsub.f32 %v5603_v62, %v5926_v58 }
 0x16c   : > { %2007 = vst.msk [vmem:[%s5932_s17 + $0x20] sm:$0xff] %vm1280_vm1, %v1934_v13  ;;  %v1213_v21 = vadd.f32 %v1212_v31, %v995_v40  ;;  %2075 = vrot.lane.b32.xlu0 %v1934_v13, %s7988_s14  ;;  %v1592_v31 = vunpack.c.l.bf16 %v1560_v8  ;;  %v6071_v13 = vpop.permute.xlu2 %2327  ;;  %v6075_v40 = vmul.f32 0.70710677, %v768_v10  ;;  %v1623_v8 = vsub.f32 %v6001_v12, %v1591_v46 }
 0x16d   : > { %v6087_v10 = vmul.f32 0.70710677, %v1498_v25  ;;  %v1138_v56 = vpack.c.b16 %v1118_v33, %v1117_v37  ;;  %v6104_v25 = vmul.f32 0.70710677, %v767_v2  ;;  %v6106_v36 = vmul.f32 0.70710677, %v1497_v44 }
 0x16e   : > { %1286 = vst.msk [vmem:[%s5918_s30 + $0x28] sm:$0xff] %vm1280_vm1, %v1213_v21  ;;  %v1624_v27 = vsub.f32 %v5995_v16, %v1592_v31  ;;  %v6097_v16 = vpack.c.bf16 %v6067_v39, %v6067_v39  ;;  %v6102_v46 = vpack.c.bf16 %v6075_v40, %v6075_v40  ;;  %v914_v31 = vpack.c.bf16 %v894_v24, %v893_v38 }
 0x16f   : > { %v1935_v14 = vpop.f32.mrf.mxu3  ;;  %v6117_v2 = vpack.c.bf16 %v6087_v10, %v6087_v10  ;;  %v6119_v44 = vmul.f32 0.70710677, %v771_v23  ;;  %v6142_v38 = vsub.f32 %v6046_v52, %v2483_v61  ;;  %v6169_v23 = vpop.permute.xlu0 %2309  ;;  %v3125_v39 = vsub.f32 %v5726_v3, %v6007_v30 }
 0x170   : > { %8148 = vst [vmem:[#allocation66_spill] sm:$0xff] %v6097_v16  ;;  %v1644_v5 = vpack.c.bf16 %v1624_v27, %v1623_v8  ;;  %v774_v27 = vadd.f32 %v5926_v58, %v5603_v62  ;;  %v1120_v62 = vunpack.c.l.b16 %v6102_v46  ;;  %v831_v58 = vpack.c.bf16 %v6104_v25, %v6104_v25 }
 0x171   : > { %v1215_v55 = vpop.f32.mrf.mxu1  ;;  %v1718_v41 = vpop.f32.mrf.mxu2  ;;  %8149 = vst [vmem:[#allocation50_spill] sm:$0xff] %v6142_v38  ;;  %v1561_v8 = vpack.c.bf16 %v6106_v36, %v6106_v36  ;;  %v2388_v16 = vadd.f32 %v5975_v26, %v5659_v6 }
 0x172   : > { %v1936_v42 = vadd.f32 %v1935_v14, %v1718_v41  ;;  %v6121_v14 = vmul.f32 0.70710677, %v1501_v9  ;;  %v1594_v41 = vunpack.c.l.bf16 %v6117_v2  ;;  %8151 = vst [vmem:[#allocation38_spill] sm:$0xff] %v6169_v23 }
 0x173   : > { %v998_v37 = vpop.f32.mrf.mxu0 }
 0x174   : > { %2008 = vst.msk [vmem:[%s5932_s17 + $0x28] sm:$0xff] %vm1280_vm1, %v1936_v42  ;;  %v1216_v33 = vadd.f32 %v1215_v55, %v998_v37  ;;  %4450 = vmatmul.msk.bf16.gmra.mxu3 %vm925_vm0, %v1861_v4  ;;  %2077 = vrot.lane.b32.xlu1 %v1936_v42, %s7988_s14  ;;  %v6126_v4 = vsub.f32 %v6025_v59, %v1598_v57  ;;  %v6149_v9 = vpop.permute.xlu2 %2333  ;;  %v6151_v55 = vpop.permute.xlu1 %2315  ;;  %v6165_v37 = vmul.f32 0.70710677, %v774_v27  ;;  %v1593_v27 = vunpack.c.l.bf16 %v1561_v8 }
 0x175   : > { %4418 = vmatmul.msk.bf16.gmra.mxu1 %vm925_vm0, %v1138_v56  ;;  %1355 = vrot.lane.b32.xlu0 %v1213_v21, %s7988_s14  ;;  %v864_v21 = vunpack.c.l.bf16 %v6102_v46  ;;  %v770_v59 = vadd.f32 %v5929_v63, %v5610_v28  ;;  %8150 = vst [vmem:[#allocation49_spill] sm:$0xff] %v6151_v55  ;;  %v6156_v56 = vpack.c.bf16 %v6119_v44, %v6119_v44  ;;  %v1843_v46 = vunpack.c.l.b16 %v6117_v2 }
 0x176   : > { %1287 = vst.msk [vmem:[%s5918_s30 + $0x30] sm:$0xff] %vm1280_vm1, %v1216_v33  ;;  %4402 = vmatmul.msk.bf16.gmra.mxu0 %vm925_vm0, %v914_v31  ;;  %4434 = vmatmul.msk.bf16.gmra.mxu2 %vm925_vm0, %v1644_v5  ;;  %v6160_v52 = vpack.c.bf16 %v6121_v14, %v6121_v14  ;;  %v1500_v57 = vsub.f32 %v5610_v28, %v5929_v63  ;;  %v6167_v31 = vmul.f32 0.70710677, %v1504_v49  ;;  %v863_v2 = vunpack.c.l.bf16 %v831_v58 }
 0x177   : > { %v1938_v29 = vpop.f32.mrf.mxu3  ;;  %v6172_v24 = vsub.f32 %v6075_v40, %v864_v21  ;;  %v6174_v12 = vmul.f32 0.70710677, %v770_v59  ;;  %v773_v28 = vadd.f32 %v5952_v34, %v5638_v11  ;;  %v1503_v63 = vsub.f32 %v5638_v11, %v5952_v34 }
 0x178   : > { %v1842_v49 = vunpack.c.l.b16 %v1561_v8  ;;  %v867_v40 = vunpack.c.l.bf16 %v6156_v56  ;;  %v1597_v21 = vunpack.c.l.bf16 %v6160_v52  ;;  %v1119_v59 = vunpack.c.l.b16 %v831_v58 }
 0x179   : > { %v1217_v42 = vpop.f32.mrf.mxu1  ;;  %v1721_v61 = vpop.f32.mrf.mxu2  ;;  %v1626_v34 = vsub.f32 %v6087_v10, %v1594_v41  ;;  %v6190_v8 = vpack.c.bf16 %v6165_v37, %v6165_v37  ;;  %v6206_v10 = vmul.f32 0.70710677, %v1503_v63  ;;  %v1625_v11 = vsub.f32 %v6106_v36, %v1593_v27 }
 0x17a   : > { %v1939_v5 = vadd.f32 %v1938_v29, %v1721_v61  ;;  %v1532_v61 = vmul.f32 0.70710677, %v1500_v57  ;;  %v6204_v57 = vmul.f32 0.70710677, %v773_v28  ;;  %v1862_v23 = vpack.c.b16 %v1843_v46, %v1842_v49 }
 0x17b   : > { %v1000_v55 = vpop.f32.mrf.mxu0  ;;  %v6215_v58 = vsub.f32 %v6121_v14, %v1597_v21  ;;  %v1139_v38 = vpack.c.b16 %v1120_v62, %v1119_v59  ;;  %v870_v22 = vunpack.c.l.bf16 %v6190_v8  ;;  %v2403_v62 = vadd.f32 %v6007_v30, %v5726_v3 }
 0x17c   : > { %2009 = vst.msk [vmem:[%s5932_s17 + $0x30] sm:$0xff] %vm1280_vm1, %v1939_v5  ;;  %v1218_v29 = vadd.f32 %v1217_v42, %v1000_v55  ;;  %2079 = vrot.lane.b32.xlu2 %v1939_v5, %s7988_s14  ;;  %v6194_v55 = vpack.c.bf16 %v6167_v31, %v6167_v31  ;;  %v895_v5 = vsub.f32 %v6104_v25, %v863_v2  ;;  %v2322_v46 = vpop.permute.xlu1 %2321  ;;  %v6233_v49 = vpop.permute.xlu2 %2343 }
 0x17d   : > { %1357 = vrot.lane.b32.xlu0 %v1216_v33, %s7988_s14  ;;  %v6202_v33 = vpack.c.bf16 %v6174_v12, %v6174_v12  ;;  %v6217_v53 = vpack.c.bf16 %v1532_v61, %v1532_v61  ;;  %v6225_v14 = vpack.c.bf16 %v6204_v57, %v6204_v57  ;;  %v6229_v2 = vpack.c.bf16 %v6206_v10, %v6206_v10 }
 0x17e   : > { %1288 = vst.msk [vmem:[%s5918_s30 + $0x38] sm:$0xff] %vm1280_vm1, %v1218_v29  ;;  %1359 = vrot.lane.b32.xlu1 %v1218_v29, %s7988_s14  ;;  %v6212_v29 = vsub.f32 %v6119_v44, %v867_v40  ;;  %v1600_v25 = vunpack.c.l.bf16 %v6194_v55  ;;  %v915_v21 = vpack.c.bf16 %v6172_v24, %v895_v5  ;;  %v1645_v59 = vpack.c.bf16 %v1626_v34, %v1625_v11 }
 0x17f   : > { %v1940_v41 = vpop.f32.mrf.mxu3  ;;  %v866_v44 = vunpack.c.l.bf16 %v6202_v33  ;;  %v1596_v42 = vunpack.c.l.bf16 %v6217_v53  ;;  %v2408_v24 = vadd.f32 %v6149_v9, %v5776_v60  ;;  %v1122_v30 = vunpack.c.l.b16 %v6202_v33 }
 0x180   : > { %v869_v11 = vunpack.c.l.bf16 %v6225_v14  ;;  %v1599_v34 = vunpack.c.l.bf16 %v6229_v2  ;;  %v6269_v5 = vmul.f32 0.70710677, %v2403_v62  ;;  %v3124_v62 = vsub.f32 %v5738_v43, %v2322_v46 }
 0x181   : > { %v1220_v28 = vpop.f32.mrf.mxu1  ;;  %v1723_v63 = vpop.f32.mrf.mxu2  ;;  %v6260_v3 = vsub.f32 %v6174_v12, %v866_v44  ;;  %v6273_v12 = vmul.f32 0.70710677, %v3125_v39 }
 0x182   : > { %v1941_v36 = vadd.f32 %v1940_v41, %v1723_v63  ;;  %v2320_v41 = vpop.permute.xlu0 %2319 }
 0x183   : > { %v1003_v27 = vpop.f32.mrf.mxu0 }
 0x184   : > { %2010 = vst.msk [vmem:[%s5932_s17 + $0x38] sm:$0xff] %vm1280_vm1, %v1941_v36  ;;  %v1221_v40 = vadd.f32 %v1220_v28, %v1003_v27  ;;  %4451 = vmatmul.msk.bf16.gmra.mxu3 %vm925_vm0, %v1862_v23  ;;  %2081 = vrot.lane.b32.xlu2 %v1941_v36, %s7988_s14  ;;  %v6248_v23 = vsub.f32 %v6165_v37, %v870_v22  ;;  %v6275_v36 = vmul.f32 0.70710677, %v2388_v16  ;;  %v6295_v27 = vpop.permute.xlu1 %2331 }
 0x185   : > { %4419 = vmatmul.msk.bf16.gmra.mxu1 %vm925_vm0, %v1139_v38  ;;  %v6251_v28 = vsub.f32 %v6167_v31, %v1600_v25  ;;  %v3130_v22 = vsub.f32 %v5776_v60, %v6149_v9  ;;  %v2402_v37 = vadd.f32 %v2322_v46, %v5738_v43  ;;  %v1845_v31 = vunpack.c.l.b16 %v6217_v53 }
 0x186   : > { %8152 = vst [vmem:[#allocation37_spill] sm:$0xff] %v6248_v23  ;;  %4403 = vmatmul.msk.bf16.gmra.mxu0 %vm925_vm0, %v915_v21  ;;  %4435 = vmatmul.msk.bf16.gmra.mxu2 %vm925_vm0, %v1645_v59  ;;  %v6271_v25 = vsub.f32 %v1532_v61, %v1596_v42  ;;  %v2405_v53 = vadd.f32 %v6071_v13, %v5749_v48  ;;  %v2440_v21 = vmul.f32 0.70710677, %v2408_v24  ;;  %v8163_v23 = vunpack.c.l.b16 %v5987_v20 }
 0x187   : > { %8153 = vst [vmem:[#allocation65_spill] sm:$0xff] %v6251_v28  ;;  %v1943_v38 = vpop.f32.mrf.mxu3  ;;  %v2434_v60 = vmul.f32 0.70710677, %v2402_v37  ;;  %v3127_v61 = vsub.f32 %v5749_v48, %v6071_v13  ;;  %v6283_v42 = vmul.f32 0.70710677, %v3130_v22  ;;  %v6287_v59 = vsub.f32 %v6204_v57, %v869_v11 }
 0x188   : > { %1289 = vst.msk [vmem:[%s5918_s30 + $0x40] sm:$0xff] %vm1280_vm1, %v1221_v40  ;;  %v6290_v37 = vsub.f32 %v6206_v10, %v1599_v34  ;;  %v6299_v48 = vpack.c.bf16 %v6269_v5, %v6269_v5  ;;  %v6303_v43 = vpack.c.bf16 %v6273_v12, %v6273_v12  ;;  %v6307_v13 = vpack.c.bf16 %v6275_v36, %v6275_v36  ;;  %v6312_v10 = vpop.permute.xlu2 %2349 }
 0x189   : > { %8154 = vst [vmem:[#allocation64_spill] sm:$0xff] %v6275_v36  ;;  %v1222_v33 = vpop.f32.mrf.mxu1  ;;  %v1726_v44 = vpop.f32.mrf.mxu2  ;;  %v6293_v24 = vpack.c.bf16 %v2434_v60, %v2434_v60  ;;  %v3156_v57 = vmul.f32 0.70710677, %v3124_v62  ;;  %v2401_v22 = vadd.f32 %v2320_v41, %v5751_v45  ;;  %v6324_v34 = vmul.f32 0.70710677, %v2405_v53 }
 0x18a   : > { %v1944_v39 = vadd.f32 %v1943_v38, %v1726_v44  ;;  %8155 = vst [vmem:[#allocation56_spill] sm:$0xff] %v6287_v59  ;;  %v3123_v38 = vsub.f32 %v5751_v45, %v2320_v41  ;;  %v6322_v11 = vpop.permute.xlu0 %2325  ;;  %v6330_v44 = vpack.c.bf16 %v6283_v42, %v6283_v42  ;;  %v8162_v36 = vunpack.c.l.b16 %v5993_v17 }
 0x18b   : > { %v1005_v16 = vpop.f32.mrf.mxu0  ;;  %8156 = vst [vmem:[#allocation55_spill] sm:$0xff] %v6290_v37  ;;  %v2498_v62 = vunpack.c.l.bf16 %v6293_v24  ;;  %v2433_v9 = vmul.f32 0.70710677, %v2401_v22  ;;  %v1140_v59 = vpack.c.b16 %v1122_v30, %v8163_v23  ;;  %v2407_v28 = vadd.f32 %v6295_v27, %v5764_v15 }
 0x18c   : > { %v1223_v63 = vadd.f32 %v1222_v33, %v1005_v16  ;;  %1361 = vrot.lane.b32.xlu2 %v1221_v40, %s7988_s14  ;;  %8157 = vst [vmem:[#allocation72_spill] sm:$0xff] %v6293_v24  ;;  %2083 = vrot.lane.b32.xlu0 %v1944_v39, %s7988_s14  ;;  %v6316_v40 = vpack.c.bf16 %v2440_v21, %v2440_v21  ;;  %v6326_v33 = vmul.f32 0.70710677, %v3127_v61  ;;  %v3155_v46 = vmul.f32 0.70710677, %v3123_v38 }
 0x18d   : > { %8158 = vst [vmem:[#allocation70_spill] sm:$0xff] %v6307_v13  ;;  %v1863_v45 = vpack.c.b16 %v1845_v31, %v8162_v36  ;;  %v6344_v22 = vpack.c.bf16 %v2433_v9, %v2433_v9  ;;  %v6351_v36 = vpack.c.bf16 %v6324_v34, %v6324_v34  ;;  %v2416_v20 = vadd.f32 %v6312_v10, %v5826_v35 }
 0x18e   : > { %2011 = vst.msk [vmem:[%s5932_s17 + $0x40] sm:$0xff] %vm1280_vm1, %v1944_v39  ;;  %v6332_v39 = vpack.c.bf16 %v3156_v57, %v3156_v57  ;;  %v2504_v24 = vunpack.c.l.bf16 %v6316_v40  ;;  %v6346_v38 = vpack.c.bf16 %v3155_v46, %v3155_v46  ;;  %v2439_v30 = vmul.f32 0.70710677, %v2407_v28 }
 0x18f   : > { %8159 = vst [vmem:[#allocation79_spill] sm:$0xff] %v6316_v40  ;;  %v1945_v16 = vpop.f32.mrf.mxu3  ;;  %v6357_v41 = vpack.c.bf16 %v6326_v33, %v6326_v33  ;;  %v3226_v40 = vunpack.c.l.bf16 %v6330_v44  ;;  %v3138_v28 = vsub.f32 %v5826_v35, %v6312_v10 }
 0x190   : > { %1290 = vst.msk [vmem:[%s5918_s30 + $0x48] sm:$0xff] %vm1280_vm1, %v1223_v63  ;;  %v3220_v53 = vunpack.c.l.bf16 %v6332_v39  ;;  %v3219_v31 = vunpack.c.l.bf16 %v6346_v38 }
 0x191   : > { %8160 = vst [vmem:[#allocation78_spill] sm:$0xff] %v6330_v44  ;;  %v1225_v61 = vpop.f32.mrf.mxu1  ;;  %v1728_v13 = vpop.f32.mrf.mxu2  ;;  %v6378_v44 = vpack.c.bf16 %v2439_v30, %v2439_v30 }
 0x192   : > { %8161 = vst [vmem:[#allocation77_spill] sm:$0xff] %v6332_v39  ;;  %v1946_v17 = vadd.f32 %v1945_v16, %v1728_v13  ;;  %v6360_v39 = vsub.f32 %v2434_v60, %v2498_v62  ;;  %v2497_v13 = vunpack.c.l.bf16 %v6344_v22  ;;  %v6367_v16 = vsub.f32 %v3156_v57, %v3220_v53 }
 0x193   : > { %v1008_v23 = vpop.f32.mrf.mxu0  ;;  %v6374_v60 = vsub.f32 %v2440_v21, %v2504_v24  ;;  %v3129_v57 = vsub.f32 %v5764_v15, %v6295_v27  ;;  %v6384_v53 = vmul.f32 0.70710677, %v2416_v20  ;;  %v6386_v35 = vsub.f32 %v3155_v46, %v3219_v31  ;;  %v6402_v46 = vpop.permute.xlu0 %2329 }
 0x194   : > { %8164 = vst [vmem:[#allocation76_spill] sm:$0xff] %v6360_v39  ;;  %4452 = vmatmul.msk.bf16.gmra.mxu3 %vm925_vm0, %v1863_v45  ;;  %2085 = vrot.lane.b32.xlu1 %v1946_v17, %s7988_s14  ;;  %v1226_v37 = vadd.f32 %v1225_v61, %v1008_v23  ;;  %v6376_v62 = vsub.f32 %v2433_v9, %v2497_v13  ;;  %v6382_v45 = vpop.permute.xlu1 %2337  ;;  %v2503_v24 = vunpack.c.l.bf16 %v6378_v44 }
 0x195   : > { %2012 = vst.msk [vmem:[%s5932_s17 + $0x48] sm:$0xff] %vm1280_vm1, %v1946_v17  ;;  %4420 = vmatmul.msk.bf16.gmra.mxu1 %vm925_vm0, %v1140_v59  ;;  %1363 = vrot.lane.b32.xlu2 %v1223_v63, %s7988_s14  ;;  %v916_v63 = vpack.c.bf16 %v6260_v3, %v6036_v51  ;;  %v1646_v9 = vpack.c.bf16 %v6271_v25, %v6044_v32  ;;  %v6395_v59 = vpop.permute.xlu2 %2353  ;;  %v3161_v10 = vmul.f32 0.70710677, %v3129_v57  ;;  %v2501_v51 = vunpack.c.l.bf16 %v6351_v36 }
 0x196   : > { %8165 = vst [vmem:[#allocation44_spill] sm:$0xff] %v6374_v60  ;;  %1365 = vrot.lane.b32.xlu0 %v1226_v37, %s7988_s14  ;;  %v2413_v15 = vadd.f32 %v6233_v49, %v5799_v19  ;;  %v3135_v32 = vsub.f32 %v5799_v19, %v6233_v49  ;;  %v6407_v3 = vmul.f32 0.70710677, %v3138_v28  ;;  %v6413_v17 = vsub.f32 %v2439_v30, %v2503_v24 }
 0x197   : > { %8166 = vst [vmem:[#allocation41_spill] sm:$0xff] %v6376_v62  ;;  %v1948_v21 = vpop.f32.mrf.mxu3  ;;  %4404 = vmatmul.msk.bf16.gmra.mxu0 %vm925_vm0, %v916_v63  ;;  %4436 = vmatmul.msk.bf16.gmra.mxu2 %vm925_vm0, %v1646_v9  ;;  %v6415_v31 = vpack.c.bf16 %v3161_v10, %v3161_v10  ;;  %v2404_v20 = vadd.f32 %v6322_v11, %v5778_v0  ;;  %v3223_v49 = vunpack.c.l.bf16 %v6357_v41 }
 0x198   : > { %1291 = vst.msk [vmem:[%s5918_s30 + $0x50] sm:$0xff] %vm1280_vm1, %v1226_v37  ;;  %v3126_v19 = vsub.f32 %v5778_v0, %v6322_v11  ;;  %v6423_v23 = vsub.f32 %v6283_v42, %v3226_v40  ;;  %v6427_v13 = vpack.c.bf16 %v6384_v53, %v6384_v53  ;;  %v6429_v57 = vmul.f32 0.70710677, %v2413_v15 }
 0x199   : > { %v1227_v37 = vpop.f32.mrf.mxu1  ;;  %v1731_v61 = vpop.f32.mrf.mxu2  ;;  %8167 = vst [vmem:[#allocation81_spill] sm:$0xff] %v6413_v17  ;;  %v3225_v9 = vunpack.c.l.bf16 %v6415_v31  ;;  %v2436_v0 = vmul.f32 0.70710677, %v2404_v20  ;;  %v6436_v11 = vpack.c.bf16 %v6407_v3, %v6407_v3  ;;  %v8171_v15 = vunpack.c.l.bf16 %v6299_v48 }
 0x19a   : > { %8168 = vst [vmem:[#allocation80_spill] sm:$0xff] %v6423_v23  ;;  %v1949_v28 = vadd.f32 %v1948_v21, %v1731_v61  ;;  %v3158_v42 = vmul.f32 0.70710677, %v3126_v19  ;;  %v2410_v21 = vadd.f32 %v6382_v45, %v5788_v47  ;;  %v6448_v61 = vmul.f32 0.70710677, %v3135_v32 }
 0x19b   : > { %8169 = vst [vmem:[#allocation48_spill] sm:$0xff] %v6427_v13  ;;  %v1010_v30 = vpop.f32.mrf.mxu0  ;;  %v6446_v24 = vsub.f32 %v6269_v5, %v8171_v15  ;;  %v6450_v20 = vsub.f32 %v3161_v10, %v3225_v9  ;;  %v6452_v63 = vpack.c.bf16 %v2436_v0, %v2436_v0  ;;  %v8174_v19 = vunpack.c.l.bf16 %v6303_v43  ;;  %v2336_v17 = vpop.permute.xlu0 %2335 }
 0x19c   : > { %8170 = vst [vmem:[#allocation45_spill] sm:$0xff] %v6436_v11  ;;  %v1228_v40 = vadd.f32 %v1227_v37, %v1010_v30  ;;  %v2512_v30 = vunpack.c.l.bf16 %v6427_v13  ;;  %v3132_v5 = vsub.f32 %v5788_v47, %v6382_v45  ;;  %v6469_v32 = vsub.f32 %v6326_v33, %v3223_v49  ;;  %v2342_v9 = vpop.permute.xlu1 %2341 }
 0x19d   : > { %2013 = vst.msk [vmem:[%s5932_s17 + $0x50] sm:$0xff] %vm1280_vm1, %v1949_v28  ;;  %2087 = vrot.lane.b32.xlu2 %v1949_v28, %s7988_s14  ;;  %v6457_v37 = vsub.f32 %v6273_v12, %v8174_v19  ;;  %v6460_v28 = vsub.f32 %v6324_v34, %v2501_v51  ;;  %v2500_v34 = vunpack.c.l.bf16 %v6452_v63  ;;  %v6474_v51 = vpack.c.bf16 %v3158_v42, %v3158_v42 }
 0x19e   : > { %8172 = vst [vmem:[#allocation57_spill] sm:$0xff] %v6446_v24  ;;  %1367 = vrot.lane.b32.xlu1 %v1228_v40, %s7988_s14  ;;  %v6478_v15 = vpack.c.bf16 %v6429_v57, %v6429_v57  ;;  %v3234_v47 = vunpack.c.l.bf16 %v6436_v11  ;;  %v2418_v45 = vadd.f32 %v6395_v59, %v5853_v18  ;;  %v6487_v19 = vpack.c.bf16 %v6448_v61, %v6448_v61 }
 0x19f   : > { %8173 = vst [vmem:[#allocation59_spill] sm:$0xff] %v6450_v20  ;;  %v1950_v10 = vpop.f32.mrf.mxu3  ;;  %v6489_v12 = vsub.f32 %v2436_v0, %v2500_v34  ;;  %v3222_v27 = vunpack.c.l.bf16 %v6474_v51  ;;  %v2406_v25 = vadd.f32 %v6402_v46, %v5801_v54  ;;  %v6500_v60 = vsub.f32 %v6384_v53, %v2512_v30 }
 0x1a0   : > { %8175 = vst [vmem:[#allocation58_spill] sm:$0xff] %v6457_v37  ;;  %v3140_v0 = vsub.f32 %v5853_v18, %v6395_v59  ;;  %v6504_v34 = vmul.f32 0.70710677, %v3132_v5  ;;  %v3128_v20 = vsub.f32 %v5801_v54, %v6402_v46  ;;  %v6513_v39 = vsub.f32 %v6407_v3, %v3234_v47 }
 0x1a1   : > { %8176 = vst [vmem:[#allocation74_spill] sm:$0xff] %v6460_v28  ;;  %v1346_v33 = vpop.permute.xlu2 %1345  ;;  %v1230_v49 = vpop.f32.mrf.mxu1  ;;  %v6510_v13 = vsub.f32 %v3158_v42, %v3222_v27  ;;  %v6515_v53 = vmul.f32 0.70710677, %v2418_v45  ;;  %v8183_v3 = vunpack.c.l.b16 %v6042_v1  ;;  %v8186_v45 = vld [vmem:[#allocation33_spill] sm:$0xff] }
 0x1a2   : > { %1292 = vst.msk [vmem:[%s5918_s30 + $0x58] sm:$0xff] %vm1280_vm1, %v1228_v40  ;;  %v6483_v40 = vmul.f32 0.70710677, %v2410_v21  ;;  %v1733_v21 = vpop.f32.mrf.mxu2  ;;  %v3160_v59 = vmul.f32 0.70710677, %v3128_v20  ;;  %v8185_v20 = vunpack.c.l.b16 %v6052_v7  ;;  %v917_v7 = vpack.c.bf16 %v6113_v50, %v6212_v29 }
 0x1a3   : > { %8177 = vst [vmem:[#allocation73_spill] sm:$0xff] %v6469_v32  ;;  %v1013_v23 = vpop.f32.mrf.mxu0  ;;  %v1951_v62 = vadd.f32 %v1950_v10, %v1733_v21  ;;  %v6531_v30 = vmul.f32 0.70710677, %v3140_v0  ;;  %v8184_v10 = vunpack.c.l.b16 %v6160_v52  ;;  %v2412_v21 = vadd.f32 %v2342_v9, %v8186_v45 }
 0x1a4   : > { %8178 = vst [vmem:[#allocation63_spill] sm:$0xff] %v6489_v12  ;;  %v6519_v18 = vpack.c.bf16 %v6483_v40, %v6483_v40  ;;  %v1231_v27 = vadd.f32 %v1230_v49, %v1013_v23  ;;  %v6533_v5 = vpack.c.bf16 %v3160_v59, %v3160_v59  ;;  %v3134_v52 = vsub.f32 %v8186_v45, %v2342_v9  ;;  %v8188_v9 = vld [vmem:[#allocation40_spill] sm:$0xff] }
 0x1a5   : > { %1441 = vst.msk [vmem:[%s6495_s22] sm:$0xff] %vm1280_vm1, %v1346_v33  ;;  %v2438_v33 = vmul.f32 0.70710677, %v2406_v25  ;;  %v8182_v25 = vunpack.c.l.b16 %v6156_v56  ;;  %v1864_v47 = vpack.c.b16 %v8185_v20, %v8184_v10  ;;  %2089 = vrot.lane.b32.xlu2 %v1951_v62, %s7988_s14  ;;  %v6543_v56 = vpack.c.bf16 %v6504_v34, %v6504_v34  ;;  %v2348_v20 = vpop.permute.xlu1 %2347 }
 0x1a6   : > { %8179 = vst [vmem:[#allocation60_spill] sm:$0xff] %v6500_v60  ;;  %v3224_v23 = vunpack.c.l.bf16 %v6533_v5  ;;  %v2444_v49 = vmul.f32 0.70710677, %v2412_v21  ;;  %v1647_v0 = vpack.c.bf16 %v6126_v4, %v6215_v58  ;;  %v3166_v10 = vmul.f32 0.70710677, %v3134_v52  ;;  %v8219_v60 = vld [vmem:[#allocation70_spill] sm:$0xff] }
 0x1a7   : > { %8180 = vst [vmem:[#allocation82_spill] sm:$0xff] %v6510_v13  ;;  %v6523_v46 = vpack.c.bf16 %v2438_v33, %v2438_v33  ;;  %v1141_v42 = vpack.c.b16 %v8183_v3, %v8182_v25  ;;  %v1953_v11 = vpop.f32.mrf.mxu3  ;;  %4453 = vmatmul.msk.bf16.gmra.mxu3 %vm925_vm0, %v1864_v47  ;;  %4405 = vmatmul.msk.bf16.gmra.mxu0 %vm925_vm0, %v917_v7 }
 0x1a8   : > { %8181 = vst [vmem:[#allocation71_spill] sm:$0xff] %v6513_v39  ;;  %v3131_v50 = vsub.f32 %v8188_v9, %v2336_v17  ;;  %v6562_v45 = vsub.f32 %v3160_v59, %v3224_v23  ;;  %v6564_v47 = vpack.c.bf16 %v2444_v49, %v2444_v49  ;;  %4437 = vmatmul.msk.bf16.gmra.mxu2 %vm925_vm0, %v1647_v0  ;;  %v8218_v39 = vld [vmem:[#allocation62_spill] sm:$0xff] }
 0x1a9   : > { %2014 = vst.msk [vmem:[%s5932_s17 + $0x58] sm:$0xff] %vm1280_vm1, %v1951_v62  ;;  %v2502_v1 = vunpack.c.l.bf16 %v6523_v46  ;;  %4421 = vmatmul.msk.bf16.gmra.mxu1 %vm925_vm0, %v1141_v42  ;;  %v2506_v62 = vunpack.c.l.bf16 %v6519_v18  ;;  %v1232_v25 = vpop.f32.mrf.mxu1  ;;  %v2409_v42 = vadd.f32 %v2336_v17, %v8188_v9  ;;  %v2340_v9 = vpop.permute.xlu0 %2339  ;;  %v8191_v59 = vsub.f32 %v5659_v6, %v5975_v26 }
 0x1aa   : > { %1293 = vst.msk [vmem:[%s5918_s30 + $0x60] sm:$0xff] %vm1280_vm1, %v1231_v27  ;;  %v1736_v29 = vpop.f32.mrf.mxu2  ;;  %v3163_v7 = vmul.f32 0.70710677, %v3131_v50  ;;  %v6578_v0 = vpack.c.bf16 %v3166_v10, %v3166_v10  ;;  %v2508_v50 = vunpack.c.l.bf16 %v6564_v47  ;;  %v6594_v26 = vpack.c.bf16 %v6531_v30, %v6531_v30 }
 0x1ab   : > { %v6557_v3 = vsub.f32 %v2438_v33, %v2502_v1  ;;  %8189 = vst [vmem:[#allocation75_spill] sm:$0xff] %v6562_v45  ;;  %v1954_v4 = vadd.f32 %v1953_v11, %v1736_v29  ;;  %v1015_v58 = vpop.f32.mrf.mxu0  ;;  %v8190_v33 = vld [vmem:[#allocation39_spill] sm:$0xff]  ;;  %v3228_v1 = vunpack.c.l.bf16 %v6543_v56  ;;  %v2441_v17 = vmul.f32 0.70710677, %v2409_v42 }
 0x1ac   : > { %v2415_v21 = vadd.f32 %v2348_v20, %v8190_v33  ;;  %v6574_v23 = vmul.f32 0.70710677, %v8191_v59  ;;  %8192 = vst [vmem:[#allocation33_spill] sm:$0xff] %v6578_v0  ;;  %v1233_v29 = vadd.f32 %v1232_v25, %v1015_v58  ;;  %v6585_v42 = vpack.c.bf16 %v6515_v53, %v6515_v53  ;;  %v8193_v59 = vld [vmem:[#allocation54_spill] sm:$0xff] }
 0x1ad   : > { %8187 = vst [vmem:[#allocation83_spill] sm:$0xff] %v6557_v3  ;;  %2091 = vrot.lane.b32.xlu0 %v1954_v4, %s7988_s14  ;;  %v6588_v52 = vpack.c.bf16 %v2441_v17, %v2441_v17  ;;  %v6590_v6 = vpack.c.bf16 %v3163_v7, %v3163_v7  ;;  %1369 = vrot.lane.b32.xlu2 %v1231_v27, %s7988_s14  ;;  %v3230_v45 = vunpack.c.l.bf16 %v6578_v0 }
 0x1ae   : > { %2015 = vst.msk [vmem:[%s5932_s17 + $0x60] sm:$0xff] %vm1280_vm1, %v1954_v4  ;;  %v2447_v25 = vmul.f32 0.70710677, %v2415_v21  ;;  %v3137_v4 = vsub.f32 %v8190_v33, %v2348_v20  ;;  %v2411_v11 = vadd.f32 %v2340_v9, %v8193_v59  ;;  %v6602_v54 = vsub.f32 %v6483_v40, %v2506_v62 }
 0x1af   : > { %1294 = vst.msk [vmem:[%s5918_s30 + $0x68] sm:$0xff] %vm1280_vm1, %v1233_v29  ;;  %v1955_v58 = vpop.f32.mrf.mxu3  ;;  %v6605_v28 = vsub.f32 %v6504_v34, %v3228_v1  ;;  %v2505_v3 = vunpack.c.l.bf16 %v6588_v52  ;;  %v3227_v32 = vunpack.c.l.bf16 %v6590_v6  ;;  %v6612_v33 = vsub.f32 %v2444_v49, %v2508_v50 }
 0x1b0   : > { %8194 = vst [vmem:[#allocation40_spill] sm:$0xff] %v6602_v54  ;;  %v6610_v24 = vpack.c.bf16 %v2447_v25, %v2447_v25  ;;  %v3169_v27 = vmul.f32 0.70710677, %v3137_v4  ;;  %v2443_v21 = vmul.f32 0.70710677, %v2411_v11  ;;  %v3133_v34 = vsub.f32 %v8193_v59, %v2340_v9  ;;  %v2352_v9 = vpop.permute.xlu1 %2351 }
 0x1b1   : > { %v1235_v20 = vpop.f32.mrf.mxu1  ;;  %8196 = vst [vmem:[#allocation54_spill] sm:$0xff] %v6612_v33  ;;  %v6614_v12 = vsub.f32 %v2441_v17, %v2505_v3  ;;  %v6616_v40 = vsub.f32 %v3163_v7, %v3227_v32  ;;  %v8199_v11 = vunpack.c.l.b16 %v6225_v14  ;;  %v8200_v49 = vunpack.c.l.b16 %v6190_v8 }
 0x1b2   : > { %8195 = vst [vmem:[#allocation39_spill] sm:$0xff] %v6610_v24  ;;  %v1738_v62 = vpop.f32.mrf.mxu2  ;;  %v2511_v1 = vunpack.c.l.bf16 %v6610_v24  ;;  %v6620_v37 = vpack.c.bf16 %v3169_v27, %v3169_v27  ;;  %v6622_v13 = vpack.c.bf16 %v2443_v21, %v2443_v21  ;;  %v3165_v17 = vmul.f32 0.70710677, %v3133_v34 }
 0x1b3   : > { %8197 = vst [vmem:[#allocation95_spill] sm:$0xff] %v6614_v12  ;;  %v1018_v0 = vpop.f32.mrf.mxu0  ;;  %v1142_v50 = vpack.c.b16 %v8200_v49, %v8199_v11  ;;  %v1956_v7 = vadd.f32 %v1955_v58, %v1738_v62  ;;  %v6632_v4 = vsub.f32 %v3166_v10, %v3230_v45  ;;  %v2514_v8 = vunpack.c.l.bf16 %v6585_v42  ;;  %v8213_v62 = vld [vmem:[#allocation43_spill] sm:$0xff] }
 0x1b4   : > { %8198 = vst [vmem:[#allocation96_spill] sm:$0xff] %v6616_v40  ;;  %v6634_v59 = vsub.f32 %v2447_v25, %v2511_v1  ;;  %v3233_v24 = vunpack.c.l.bf16 %v6620_v37  ;;  %v2507_v14 = vunpack.c.l.bf16 %v6622_v13  ;;  %v6639_v11 = vpack.c.bf16 %v3165_v17, %v3165_v17  ;;  %v2346_v25 = vpop.permute.xlu0 %2345 }
 0x1b5   : > { %8201 = vst [vmem:[#allocation97_spill] sm:$0xff] %v6632_v4  ;;  %v1236_v49 = vadd.f32 %v1235_v20, %v1018_v0  ;;  %v8203_v34 = vunpack.c.l.b16 %v6229_v2  ;;  %v8204_v58 = vunpack.c.l.b16 %v6194_v55  ;;  %2093 = vrot.lane.b32.xlu1 %v1956_v7, %s7988_s14  ;;  %1371 = vrot.lane.b32.xlu2 %v1233_v29, %s7988_s14  ;;  %v8207_v0 = vld [vmem:[#allocation53_spill] sm:$0xff]  ;;  %v3236_v55 = vunpack.c.l.bf16 %v6594_v26 }
 0x1b6   : > { %8202 = vst [vmem:[#allocation98_spill] sm:$0xff] %v6634_v59  ;;  %v2072_v45 = vpop.permute.xlu2 %2071  ;;  %v6650_v1 = vsub.f32 %v3169_v27, %v3233_v24  ;;  %v6652_v32 = vsub.f32 %v2443_v21, %v2507_v14  ;;  %v2417_v20 = vadd.f32 %v2352_v9, %v8207_v0  ;;  %v8208_v24 = vld [vmem:[#allocation55_spill] sm:$0xff]  ;;  %v8209_v27 = vld [vmem:[#allocation65_spill] sm:$0xff]  ;;  %v2414_v29 = vadd.f32 %v2346_v25, %v8213_v62 }
 0x1b7   : > { %2016 = vst.msk [vmem:[%s5932_s17 + $0x68] sm:$0xff] %vm1280_vm1, %v1956_v7  ;;  %v1865_v10 = vpack.c.b16 %v8204_v58, %v8203_v34  ;;  %v1958_v2 = vpop.f32.mrf.mxu3  ;;  %v3229_v34 = vunpack.c.l.bf16 %v6639_v11  ;;  %v3139_v7 = vsub.f32 %v8207_v0, %v2352_v9  ;;  %v1648_v58 = vpack.c.bf16 %v8209_v27, %v8208_v24  ;;  %1373 = vrot.lane.b32.xlu0 %v1236_v49, %s7988_s14  ;;  %v8211_v9 = vld [vmem:[#allocation37_spill] sm:$0xff] }
 0x1b8   : > { %8205 = vst [vmem:[#allocation99_spill] sm:$0xff] %v6650_v1  ;;  %v2449_v14 = vmul.f32 0.70710677, %v2417_v20  ;;  %v3136_v3 = vsub.f32 %v8213_v62, %v2346_v25  ;;  %v3231_v20 = vunpack.c.l.bf16 %v6487_v19  ;;  %v2446_v25 = vmul.f32 0.70710677, %v2414_v29 }
 0x1b9   : > { %8206 = vst [vmem:[#allocation100_spill] sm:$0xff] %v6652_v32  ;;  %4422 = vmatmul.msk.bf16.gmra.mxu1 %vm925_vm0, %v1142_v50  ;;  %4454 = vmatmul.msk.bf16.gmra.mxu3 %vm925_vm0, %v1865_v10  ;;  %v8210_v50 = vld [vmem:[#allocation56_spill] sm:$0xff]  ;;  %v1237_v24 = vpop.f32.mrf.mxu1  ;;  %v6677_v27 = vsub.f32 %v3165_v17, %v3229_v34  ;;  %v2509_v10 = vunpack.c.l.bf16 %v6478_v15 }
 0x1ba   : > { %1295 = vst.msk [vmem:[%s5918_s30 + $0x70] sm:$0xff] %vm1280_vm1, %v1236_v49  ;;  %v918_v0 = vpack.c.bf16 %v8211_v9, %v8210_v50  ;;  %v3171_v49 = vmul.f32 0.70710677, %v3139_v7  ;;  %v1741_v21 = vpop.f32.mrf.mxu2  ;;  %v6683_v1 = vpack.c.bf16 %v2449_v14, %v2449_v14  ;;  %4438 = vmatmul.msk.bf16.gmra.mxu2 %vm925_vm0, %v1648_v58  ;;  %v3168_v62 = vmul.f32 0.70710677, %v3136_v3 }
 0x1bb   : > { %2165 = vst.msk [vmem:[%s6671_s27 + $0x10] sm:$0xff] %vm1280_vm1, %v2072_v45  ;;  %v1959_v45 = vadd.f32 %v1958_v2, %v1741_v21  ;;  %v1020_v17 = vpop.f32.mrf.mxu0  ;;  %v3174_v50 = vpack.c.bf16 %v6574_v23, %v6574_v23  ;;  %v6694_v9 = vsub.f32 %v6515_v53, %v2514_v8  ;;  %v6700_v21 = vsub.f32 %v6531_v30, %v3236_v55  ;;  %v8216_v53 = vld [vmem:[#allocation66_spill] sm:$0xff] }
 0x1bc   : > { %8212 = vst [vmem:[#allocation53_spill] sm:$0xff] %v6677_v27  ;;  %4406 = vmatmul.msk.bf16.gmra.mxu0 %vm925_vm0, %v918_v0  ;;  %v6689_v7 = vpack.c.bf16 %v3171_v49, %v3171_v49  ;;  %v2513_v58 = vunpack.c.l.bf16 %v6683_v1  ;;  %v1238_v2 = vadd.f32 %v1237_v24, %v1020_v17  ;;  %v6703_v29 = vpack.c.bf16 %v2446_v25, %v2446_v25 }
 0x1bd   : > { %8214 = vst [vmem:[#allocation55_spill] sm:$0xff] %v6694_v9  ;;  %v6705_v3 = vpack.c.bf16 %v3168_v62, %v3168_v62  ;;  %2095 = vrot.lane.b32.xlu1 %v1959_v45, %s7988_s14  ;;  %v8217_v8 = vunpack.c.l.bf16 %v8216_v53  ;;  %v2733_v24 = vunpack.c.l.b16 %v8219_v60  ;;  %v6713_v30 = vsub.f32 %v6429_v57, %v2509_v10 }
 0x1be   : > { %2017 = vst.msk [vmem:[%s5932_s17 + $0x70] sm:$0xff] %vm1280_vm1, %v1959_v45  ;;  %v3235_v0 = vunpack.c.l.bf16 %v6689_v7  ;;  %v2068_v34 = vpop.permute.xlu1 %2067  ;;  %v6715_v55 = vsub.f32 %v2449_v14, %v2513_v58  ;;  %v6720_v32 = vsub.f32 %v6448_v61, %v3231_v20  ;;  %v2510_v33 = vunpack.c.l.bf16 %v6703_v29  ;;  %v8224_v20 = vld [vmem:[#allocation85_spill] sm:$0xff]  ;;  %v8228_v58 = vld [vmem:[#allocation52_spill] sm:$0xff] }
 0x1bf   : > { %8215 = vst [vmem:[#allocation65_spill] sm:$0xff] %v6700_v21  ;;  %v3237_v59 = vsub.f32 %v8218_v39, %v8217_v8  ;;  %v1960_v17 = vpop.f32.mrf.mxu3  ;;  %v3232_v39 = vunpack.c.l.bf16 %v6705_v3  ;;  %v2484_v57 = vunpack.c.l.bf16 %v8219_v60  ;;  %v3206_v14 = vunpack.c.l.bf16 %v3174_v50 }
 0x1c0   : > { %8220 = vst [vmem:[#allocation56_spill] sm:$0xff] %v6713_v30  ;;  %v6722_v45 = vsub.f32 %v3171_v49, %v3235_v0  ;;  %v1348_v8 = vpop.permute.xlu0 %1347  ;;  %v3455_v10 = vunpack.c.l.b16 %v3174_v50  ;;  %v8225_v0 = vld [vmem:[#allocation42_spill] sm:$0xff]  ;;  %v6737_v12 = vsub.f32 %v2446_v25, %v2510_v33  ;;  %v8232_v40 = vunpack.c.l.b16 %v8216_v53 }
 0x1c1   : > { %8221 = vst [vmem:[#allocation37_spill] sm:$0xff] %v6715_v55  ;;  %v1354_v61 = vpop.permute.xlu2 %1353  ;;  %v1240_v49 = vpop.f32.mrf.mxu1  ;;  %v2390_v27 = vadd.f32 %v8225_v0, %v8224_v20  ;;  %v3112_v50 = vsub.f32 %v8224_v20, %v8225_v0  ;;  %v8229_v25 = vld [vmem:[#allocation46_spill] sm:$0xff]  ;;  %v8231_v20 = vld [vmem:[#allocation64_spill] sm:$0xff]  ;;  %v3238_v21 = vsub.f32 %v6574_v23, %v3206_v14 }
 0x1c2   : > { %1296 = vst.msk [vmem:[%s5918_s30 + $0x78] sm:$0xff] %vm1280_vm1, %v1238_v2  ;;  %v1743_v60 = vpop.f32.mrf.mxu2  ;;  %v8230_v4 = vunpack.c.l.b16 %v8229_v25  ;;  %v2516_v0 = vsub.f32 %v8231_v20, %v2484_v57  ;;  %v8233_v23 = vld [vmem:[#allocation50_spill] sm:$0xff] }
 0x1c3   : > { %8222 = vst [vmem:[#allocation43_spill] sm:$0xff] %v6720_v32  ;;  %v1961_v54 = vadd.f32 %v1960_v17, %v1743_v60  ;;  %v1023_v33 = vpop.f32.mrf.mxu0  ;;  %v3144_v17 = vmul.f32 0.70710677, %v3112_v50  ;;  %v3269_v53 = vpack.c.bf16 %v3238_v21, %v3237_v59 }
 0x1c4   : > { %8223 = vst [vmem:[#allocation66_spill] sm:$0xff] %v6722_v45  ;;  %v1241_v45 = vadd.f32 %v1240_v49, %v1023_v33 }
 0x1c5   : > { %2163 = vst.msk [vmem:[%s6671_s27] sm:$0xff] %vm1280_vm1, %v2068_v34  ;;  %v6739_v34 = vsub.f32 %v3168_v62, %v3232_v39  ;;  %v2764_v62 = vpack.c.b16 %v2733_v24, %v8230_v4  ;;  %2097 = vrot.lane.b32.xlu2 %v1961_v54, %s7988_s14  ;;  %1375 = vrot.lane.b32.xlu1 %v1238_v2, %s7988_s14  ;;  %v2422_v24 = vmul.f32 0.70710677, %v2390_v27 }
 0x1c6   : > { %1442 = vst.msk [vmem:[%s6495_s22 + $0x8] sm:$0xff] %vm1280_vm1, %v1348_v8  ;;  %v8227_v8 = vld [vmem:[#allocation84_spill] sm:$0xff]  ;;  %v2070_v4 = vpop.permute.xlu1 %2069 }
 0x1c7   : > { %8226 = vst [vmem:[#allocation62_spill] sm:$0xff] %v6737_v12  ;;  %v2389_v55 = vadd.f32 %v8228_v58, %v8227_v8  ;;  %v3111_v9 = vsub.f32 %v8227_v8, %v8228_v58  ;;  %v3486_v58 = vpack.c.b16 %v3455_v10, %v8232_v40  ;;  %v1963_v49 = vpop.f32.mrf.mxu3  ;;  %v2547_v40 = vpack.c.bf16 %v2516_v0, %v8233_v23  ;;  %v8234_v23 = vld [vmem:[#allocation86_spill] sm:$0xff] }
 0x1c8   : > { %1445 = vst.msk [vmem:[%s6495_s22 + $0x20] sm:$0xff] %vm1280_vm1, %v1354_v61  ;;  %v2454_v2 = vpack.c.bf16 %v2422_v24, %v2422_v24  ;;  %v3176_v10 = vpack.c.bf16 %v3144_v17, %v3144_v17  ;;  %v8237_v61 = vld [vmem:[#allocation47_spill] sm:$0xff] }
 0x1c9   : > { %2018 = vst.msk [vmem:[%s5932_s17 + $0x78] sm:$0xff] %vm1280_vm1, %v1961_v54  ;;  %v2421_v57 = vmul.f32 0.70710677, %v2389_v55  ;;  %v3143_v60 = vmul.f32 0.70710677, %v3111_v9  ;;  %4471 = vmatmul.msk.bf16.vlgmr.msrb.gmra.mxu1 %vm925_vm0, %v2764_v62  ;;  %4503 = vmatmul.msk.bf16.vlgmr.msrb.gmra.mxu3 %vm925_vm0, %v3486_v58  ;;  %v1242_v54 = vpop.f32.mrf.mxu1 }
 0x1ca   : > { %1297 = vst.msk [vmem:[%s5918_s30 + $0x80] sm:$0xff] %vm1280_vm1, %v1241_v45  ;;  %v1746_v14 = vpop.f32.mrf.mxu2  ;;  %4487 = vmatmul.msk.bf16.vlgmr.msrb.gmra.mxu2 %vm925_vm0, %v3269_v53  ;;  %v2486_v21 = vunpack.c.l.bf16 %v2454_v2  ;;  %v3208_v33 = vunpack.c.l.bf16 %v3176_v10  ;;  %v2735_v62 = vunpack.c.l.b16 %v2454_v2 }
 0x1cb   : > { %2164 = vst.msk [vmem:[%s6671_s27 + $0x8] sm:$0xff] %vm1280_vm1, %v2070_v4  ;;  %v1964_v27 = vadd.f32 %v1963_v49, %v1746_v14  ;;  %v1025_v9 = vpop.f32.mrf.mxu0  ;;  %v2453_v55 = vpack.c.bf16 %v2421_v57, %v2421_v57  ;;  %v3175_v50 = vpack.c.bf16 %v3143_v60, %v3143_v60  ;;  %v3457_v4 = vunpack.c.l.b16 %v3176_v10 }
 0x1cc   : > { %4455 = vmatmul.msk.bf16.vlgmr.msrb.gmra.mxu0 %vm925_vm0, %v2547_v40  ;;  %v1243_v8 = vadd.f32 %v1242_v54, %v1025_v9  ;;  %v8235_v40 = vld [vmem:[#allocation69_spill] sm:$0xff]  ;;  %v2518_v14 = vsub.f32 %v2422_v24, %v2486_v21 }
 0x1cd   : > { %2019 = vst.msk [vmem:[%s5932_s17 + $0x80] sm:$0xff] %vm1280_vm1, %v1964_v27  ;;  %2099 = vrot.lane.b32.xlu0 %v1964_v27, %s7988_s14  ;;  %1377 = vrot.lane.b32.xlu1 %v1241_v45, %s7988_s14  ;;  %v2485_v20 = vunpack.c.l.bf16 %v2453_v55  ;;  %v2734_v0 = vunpack.c.l.b16 %v2453_v55  ;;  %v3207_v58 = vunpack.c.l.bf16 %v3175_v50  ;;  %v3456_v49 = vunpack.c.l.b16 %v3175_v50  ;;  %v8236_v50 = vld [vmem:[#allocation90_spill] sm:$0xff] }
 0x1ce   : > { %1298 = vst.msk [vmem:[%s5918_s30 + $0x88] sm:$0xff] %vm1280_vm1, %v1243_v8  ;;  %v1350_v59 = vpop.permute.xlu1 %1349  ;;  %1379 = vrot.lane.b32.xlu2 %v1243_v8, %s7988_s14  ;;  %v2392_v53 = vadd.f32 %v8235_v40, %v8234_v23  ;;  %v3240_v27 = vsub.f32 %v3144_v17, %v3208_v33  ;;  %v3114_v9 = vsub.f32 %v8234_v23, %v8235_v40 }
 0x1cf   : > { %1443 = vst.msk [vmem:[%s6495_s22 + $0x10] sm:$0xff] %vm1280_vm1, %v1350_v59  ;;  %v1965_v25 = vpop.f32.mrf.mxu3  ;;  %v2517_v59 = vsub.f32 %v2421_v57, %v2485_v20  ;;  %v3239_v55 = vsub.f32 %v3143_v60, %v3207_v58  ;;  %v2765_v10 = vpack.c.b16 %v2735_v62, %v2734_v0  ;;  %v2391_v30 = vadd.f32 %v8237_v61, %v8236_v50 }
 0x1d0   : > { %v3113_v12 = vsub.f32 %v8236_v50, %v8237_v61  ;;  %v3487_v24 = vpack.c.b16 %v3457_v4, %v3456_v49  ;;  %v2424_v17 = vmul.f32 0.70710677, %v2392_v53  ;;  %v3146_v21 = vmul.f32 0.70710677, %v3114_v9 }
 0x1d1   : > { %v2423_v61 = vmul.f32 0.70710677, %v2391_v30  ;;  %v3270_v20 = vpack.c.bf16 %v3240_v27, %v3239_v55  ;;  %v2548_v0 = vpack.c.bf16 %v2518_v14, %v2517_v59 }
 0x1d2   : > { %v1245_v54 = vpop.f32.mrf.mxu1  ;;  %v1748_v45 = vpop.f32.mrf.mxu2  ;;  %v3145_v62 = vmul.f32 0.70710677, %v3113_v12  ;;  %v2456_v58 = vpack.c.bf16 %v2424_v17, %v2424_v17  ;;  %v3178_v23 = vpack.c.bf16 %v3146_v21, %v3146_v21 }
 0x1d3   : > { %v1966_v8 = vadd.f32 %v1965_v25, %v1748_v45  ;;  %v1028_v2 = vpop.f32.mrf.mxu0  ;;  %v2455_v53 = vpack.c.bf16 %v2423_v61, %v2423_v61 }
 0x1d4   : > { %v1246_v39 = vadd.f32 %v1245_v54, %v1028_v2  ;;  %v3177_v54 = vpack.c.bf16 %v3145_v62, %v3145_v62  ;;  %v2488_v45 = vunpack.c.l.bf16 %v2456_v58  ;;  %v3210_v9 = vunpack.c.l.bf16 %v3178_v23 }
 0x1d5   : > { %2020 = vst.msk [vmem:[%s5932_s17 + $0x88] sm:$0xff] %vm1280_vm1, %v1966_v8  ;;  %2101 = vrot.lane.b32.xlu0 %v1966_v8, %s7988_s14  ;;  %v2737_v2 = vunpack.c.l.b16 %v2456_v58  ;;  %v2736_v59 = vunpack.c.l.b16 %v2455_v53  ;;  %v3459_v55 = vunpack.c.l.b16 %v3178_v23 }
 0x1d6   : > { %1299 = vst.msk [vmem:[%s5918_s30 + $0x90] sm:$0xff] %vm1280_vm1, %v1246_v39  ;;  %v2074_v57 = vpop.permute.xlu0 %2073  ;;  %v2080_v60 = vpop.permute.xlu2 %2079  ;;  %v3209_v50 = vunpack.c.l.bf16 %v3177_v54 }
 0x1d7   : > { %2166 = vst.msk [vmem:[%s6671_s27 + $0x18] sm:$0xff] %vm1280_vm1, %v2074_v57  ;;  %v1352_v33 = vpop.permute.xlu1 %1351  ;;  %v1968_v25 = vpop.f32.mrf.mxu3  ;;  %v2520_v57 = vsub.f32 %v2424_v17, %v2488_v45 }
 0x1d8   : > { %1444 = vst.msk [vmem:[%s6495_s22 + $0x18] sm:$0xff] %vm1280_vm1, %v1352_v33  ;;  %v3242_v33 = vsub.f32 %v3146_v21, %v3210_v9 }
 0x1d9   : > { %4472 = vmatmul.msk.bf16.gmra.mxu1 %vm925_vm0, %v2765_v10  ;;  %4504 = vmatmul.msk.bf16.gmra.mxu3 %vm925_vm0, %v3487_v24  ;;  %2169 = vst.msk [vmem:[%s6671_s27 + $0x30] sm:$0xff] %vm1280_vm1, %v2080_v60  ;;  %v2487_v10 = vunpack.c.l.bf16 %v2455_v53  ;;  %v3458_v24 = vunpack.c.l.b16 %v3177_v54  ;;  %v2766_v54 = vpack.c.b16 %v2737_v2, %v2736_v59 }
 0x1da   : > { %v1247_v4 = vpop.f32.mrf.mxu1  ;;  %v1751_v49 = vpop.f32.mrf.mxu2  ;;  %4488 = vmatmul.msk.bf16.gmra.mxu2 %vm925_vm0, %v3270_v20  ;;  %v8239_v20 = vld [vmem:[#allocation68_spill] sm:$0xff] }
 0x1db   : > { %v1969_v40 = vadd.f32 %v1968_v25, %v1751_v49  ;;  %v1030_v30 = vpop.f32.mrf.mxu0  ;;  %v8238_v25 = vld [vmem:[#allocation88_spill] sm:$0xff]  ;;  %v2519_v45 = vsub.f32 %v2423_v61, %v2487_v10  ;;  %v3488_v21 = vpack.c.b16 %v3459_v55, %v3458_v24 }
 0x1dc   : > { %4456 = vmatmul.msk.bf16.gmra.mxu0 %vm925_vm0, %v2548_v0  ;;  %v1248_v12 = vadd.f32 %v1247_v4, %v1030_v30  ;;  %v2394_v0 = vadd.f32 %v8239_v20, %v8238_v25  ;;  %v3116_v4 = vsub.f32 %v8238_v25, %v8239_v20  ;;  %v8241_v30 = vld [vmem:[#allocation67_spill] sm:$0xff] }
 0x1dd   : > { %2021 = vst.msk [vmem:[%s5932_s17 + $0x90] sm:$0xff] %vm1280_vm1, %v1969_v40  ;;  %2103 = vrot.lane.b32.xlu1 %v1969_v40, %s7988_s14  ;;  %1381 = vrot.lane.b32.xlu0 %v1246_v39, %s7988_s14  ;;  %v8240_v40 = vld [vmem:[#allocation93_spill] sm:$0xff]  ;;  %v2549_v55 = vpack.c.bf16 %v2520_v57, %v2519_v45 }
 0x1de   : > { %1300 = vst.msk [vmem:[%s5918_s30 + $0x98] sm:$0xff] %vm1280_vm1, %v1248_v12  ;;  %v2076_v14 = vpop.permute.xlu0 %2075  ;;  %v2082_v27 = vpop.permute.xlu2 %2081  ;;  %v2393_v23 = vadd.f32 %v8241_v30, %v8240_v40  ;;  %v3115_v53 = vsub.f32 %v8240_v40, %v8241_v30 }
 0x1df   : > { %2167 = vst.msk [vmem:[%s6671_s27 + $0x20] sm:$0xff] %vm1280_vm1, %v2076_v14  ;;  %v1970_v8 = vpop.f32.mrf.mxu3  ;;  %v3241_v14 = vsub.f32 %v3145_v62, %v3209_v50 }
 0x1e0   : > { %2170 = vst.msk [vmem:[%s6671_s27 + $0x38] sm:$0xff] %vm1280_vm1, %v2082_v27  ;;  %v2425_v2 = vmul.f32 0.70710677, %v2393_v23  ;;  %v3147_v59 = vmul.f32 0.70710677, %v3115_v53 }
 0x1e2   : > { %v1250_v39 = vpop.f32.mrf.mxu1  ;;  %v1753_v60 = vpop.f32.mrf.mxu2 }
 0x1e3   : > { %v1971_v58 = vadd.f32 %v1970_v8, %v1753_v60  ;;  %v1033_v49 = vpop.f32.mrf.mxu0  ;;  %v2426_v8 = vmul.f32 0.70710677, %v2394_v0  ;;  %v2457_v0 = vpack.c.bf16 %v2425_v2, %v2425_v2 }
 0x1e4   : > { %v1251_v17 = vadd.f32 %v1250_v39, %v1033_v49  ;;  %v3148_v39 = vmul.f32 0.70710677, %v3116_v4  ;;  %v3179_v4 = vpack.c.bf16 %v3147_v59, %v3147_v59 }
 0x1e5   : > { %2022 = vst.msk [vmem:[%s5932_s17 + $0x98] sm:$0xff] %vm1280_vm1, %v1971_v58  ;;  %2105 = vrot.lane.b32.xlu2 %v1971_v58, %s7988_s14  ;;  %1383 = vrot.lane.b32.xlu0 %v1248_v12, %s7988_s14  ;;  %v3271_v12 = vpack.c.bf16 %v3242_v33, %v3241_v14  ;;  %v2458_v24 = vpack.c.bf16 %v2426_v8, %v2426_v8  ;;  %v2489_v23 = vunpack.c.l.bf16 %v2457_v0  ;;  %v2738_v53 = vunpack.c.l.b16 %v2457_v0 }
 0x1e6   : > { %1301 = vst.msk [vmem:[%s5918_s30 + $0xa0] sm:$0xff] %vm1280_vm1, %v1251_v17  ;;  %v2078_v27 = vpop.permute.xlu1 %2077  ;;  %v1362_v9 = vpop.permute.xlu2 %1361  ;;  %1385 = vrot.lane.b32.xlu1 %v1251_v17, %s7988_s14  ;;  %v3180_v60 = vpack.c.bf16 %v3148_v39, %v3148_v39  ;;  %v3211_v17 = vunpack.c.l.bf16 %v3179_v4 }
 0x1e7   : > { %2168 = vst.msk [vmem:[%s6671_s27 + $0x28] sm:$0xff] %vm1280_vm1, %v2078_v27  ;;  %v1356_v61 = vpop.permute.xlu0 %1355  ;;  %v1973_v62 = vpop.f32.mrf.mxu3  ;;  %v2490_v57 = vunpack.c.l.bf16 %v2458_v24  ;;  %v2739_v30 = vunpack.c.l.b16 %v2458_v24  ;;  %v8242_v27 = vld [vmem:[#allocation87_spill] sm:$0xff] }
 0x1e8   : > { %1446 = vst.msk [vmem:[%s6495_s22 + $0x28] sm:$0xff] %vm1280_vm1, %v1356_v61  ;;  %v3212_v33 = vunpack.c.l.bf16 %v3180_v60  ;;  %v3461_v14 = vunpack.c.l.b16 %v3180_v60 }
 0x1e9   : > { %4473 = vmatmul.msk.bf16.gmra.mxu1 %vm925_vm0, %v2766_v54  ;;  %4505 = vmatmul.msk.bf16.gmra.mxu3 %vm925_vm0, %v3488_v21  ;;  %1449 = vst.msk [vmem:[%s6495_s22 + $0x40] sm:$0xff] %vm1280_vm1, %v1362_v9  ;;  %v3460_v21 = vunpack.c.l.b16 %v3179_v4  ;;  %v8243_v9 = vld [vmem:[#allocation36_spill] sm:$0xff]  ;;  %v2767_v4 = vpack.c.b16 %v2739_v30, %v2738_v53 }
 0x1ea   : > { %v1252_v10 = vpop.f32.mrf.mxu1  ;;  %v1756_v50 = vpop.f32.mrf.mxu2  ;;  %4489 = vmatmul.msk.bf16.gmra.mxu2 %vm925_vm0, %v3271_v12  ;;  %v2395_v61 = vadd.f32 %v8243_v9, %v8242_v27 }
 0x1eb   : > { %v1974_v25 = vadd.f32 %v1973_v62, %v1756_v50  ;;  %v1035_v20 = vpop.f32.mrf.mxu0  ;;  %v3244_v50 = vsub.f32 %v3148_v39, %v3212_v33  ;;  %v3489_v32 = vpack.c.b16 %v3461_v14, %v3460_v21 }
 0x1ec   : > { %4457 = vmatmul.msk.bf16.gmra.mxu0 %vm925_vm0, %v2549_v55  ;;  %v1253_v58 = vadd.f32 %v1252_v10, %v1035_v20  ;;  %v3117_v55 = vsub.f32 %v8242_v27, %v8243_v9  ;;  %v2522_v10 = vsub.f32 %v2426_v8, %v2490_v57  ;;  %v3243_v20 = vsub.f32 %v3147_v59, %v3211_v17 }
 0x1ed   : > { %2023 = vst.msk [vmem:[%s5932_s17 + $0xa0] sm:$0xff] %vm1280_vm1, %v1974_v25  ;;  %2107 = vrot.lane.b32.xlu0 %v1974_v25, %s7988_s14  ;;  %v2521_v25 = vsub.f32 %v2425_v2, %v2489_v23  ;;  %v2427_v8 = vmul.f32 0.70710677, %v2395_v61 }
 0x1ee   : > { %1302 = vst.msk [vmem:[%s5918_s30 + $0xa8] sm:$0xff] %vm1280_vm1, %v1253_v58  ;;  %1387 = vrot.lane.b32.xlu2 %v1253_v58, %s7988_s14  ;;  %v8244_v58 = vld [vmem:[#allocation34_spill] sm:$0xff]  ;;  %v3149_v39 = vmul.f32 0.70710677, %v3117_v55  ;;  %v3272_v30 = vpack.c.bf16 %v3244_v50, %v3243_v20 }
 0x1ef   : > { %v1358_v49 = vpop.permute.xlu0 %1357  ;;  %v1364_v40 = vpop.permute.xlu2 %1363  ;;  %v2550_v23 = vpack.c.bf16 %v2522_v10, %v2521_v25  ;;  %v2459_v53 = vpack.c.bf16 %v2427_v8, %v2427_v8 }
 0x1f0   : > { %1447 = vst.msk [vmem:[%s6495_s22 + $0x30] sm:$0xff] %vm1280_vm1, %v1358_v49  ;;  %v1975_v54 = vpop.f32.mrf.mxu3  ;;  %v1360_v45 = vpop.permute.xlu1 %1359  ;;  %v8245_v49 = vld [vmem:[#allocation38_spill] sm:$0xff]  ;;  %v3181_v14 = vpack.c.bf16 %v3149_v39, %v3149_v39 }
 0x1f1   : > { %1450 = vst.msk [vmem:[%s6495_s22 + $0x48] sm:$0xff] %vm1280_vm1, %v1364_v40  ;;  %v2396_v40 = vadd.f32 %v8245_v49, %v8244_v58  ;;  %v2740_v10 = vunpack.c.l.b16 %v2459_v53 }
 0x1f2   : > { %1448 = vst.msk [vmem:[%s6495_s22 + $0x38] sm:$0xff] %vm1280_vm1, %v1360_v45  ;;  %v1255_v62 = vpop.f32.mrf.mxu1  ;;  %v1758_v12 = vpop.f32.mrf.mxu2  ;;  %v3118_v45 = vsub.f32 %v8244_v58, %v8245_v49 }
 0x1f3   : > { %v1976_v24 = vadd.f32 %v1975_v54, %v1758_v12  ;;  %v1038_v60 = vpop.f32.mrf.mxu0  ;;  %v2428_v59 = vmul.f32 0.70710677, %v2396_v40  ;;  %v3213_v12 = vunpack.c.l.bf16 %v3181_v14 }
 0x1f4   : > { %v1256_v0 = vadd.f32 %v1255_v62, %v1038_v60  ;;  %v3150_v33 = vmul.f32 0.70710677, %v3118_v45  ;;  %v3462_v60 = vunpack.c.l.b16 %v3181_v14  ;;  %v8249_v14 = vld [vmem:[#allocation61_spill] sm:$0xff] }
 0x1f5   : > { %2024 = vst.msk [vmem:[%s5932_s17 + $0xa8] sm:$0xff] %vm1280_vm1, %v1976_v24  ;;  %2109 = vrot.lane.b32.xlu0 %v1976_v24, %s7988_s14  ;;  %v2460_v61 = vpack.c.bf16 %v2428_v59, %v2428_v59  ;;  %v3245_v45 = vsub.f32 %v3149_v39, %v3213_v12 }
 0x1f6   : > { %1303 = vst.msk [vmem:[%s5918_s30 + $0xb0] sm:$0xff] %vm1280_vm1, %v1256_v0  ;;  %v3182_v62 = vpack.c.bf16 %v3150_v33, %v3150_v33 }
 0x1f7   : > { %v2088_v57 = vpop.permute.xlu2 %2087  ;;  %v2741_v50 = vunpack.c.l.b16 %v2460_v61  ;;  %v2492_v25 = vunpack.c.l.bf16 %v2460_v61 }
 0x1f8   : > { %2173 = vst.msk [vmem:[%s6671_s27 + $0x50] sm:$0xff] %vm1280_vm1, %v2088_v57  ;;  %v1978_v2 = vpop.f32.mrf.mxu3  ;;  %v3214_v20 = vunpack.c.l.bf16 %v3182_v62  ;;  %v8246_v57 = vld [vmem:[#allocation89_spill] sm:$0xff] }
 0x1f9   : > { %4474 = vmatmul.msk.bf16.gmra.mxu1 %vm925_vm0, %v2767_v4  ;;  %4506 = vmatmul.msk.bf16.gmra.mxu3 %vm925_vm0, %v3489_v32  ;;  %v2491_v32 = vunpack.c.l.bf16 %v2459_v53  ;;  %v3463_v4 = vunpack.c.l.b16 %v3182_v62  ;;  %v2768_v61 = vpack.c.b16 %v2741_v50, %v2740_v10  ;;  %v2524_v62 = vsub.f32 %v2428_v59, %v2492_v25 }
 0x1fa   : > { %v1257_v17 = vpop.f32.mrf.mxu1  ;;  %v1761_v54 = vpop.f32.mrf.mxu2  ;;  %4490 = vmatmul.msk.bf16.gmra.mxu2 %vm925_vm0, %v3272_v30 }
 0x1fb   : > { %v1979_v21 = vadd.f32 %v1978_v2, %v1761_v54  ;;  %v1040_v27 = vpop.f32.mrf.mxu0  ;;  %v2523_v49 = vsub.f32 %v2427_v8, %v2491_v32  ;;  %v8247_v2 = vld [vmem:[#allocation35_spill] sm:$0xff]  ;;  %v3246_v32 = vsub.f32 %v3150_v33, %v3214_v20  ;;  %v3490_v39 = vpack.c.b16 %v3463_v4, %v3462_v60 }
 0x1fc   : > { %4458 = vmatmul.msk.bf16.gmra.mxu0 %vm925_vm0, %v2550_v23  ;;  %v1258_v9 = vadd.f32 %v1257_v17, %v1040_v27  ;;  %v2398_v30 = vadd.f32 %v8247_v2, %v8246_v57  ;;  %v3120_v23 = vsub.f32 %v8246_v57, %v8247_v2  ;;  %v8248_v54 = vld [vmem:[#allocation91_spill] sm:$0xff] }
 0x1fd   : > { %2025 = vst.msk [vmem:[%s5932_s17 + $0xb0] sm:$0xff] %vm1280_vm1, %v1979_v21  ;;  %2111 = vrot.lane.b32.xlu1 %v1979_v21, %s7988_s14  ;;  %1389 = vrot.lane.b32.xlu0 %v1256_v0, %s7988_s14  ;;  %v2397_v21 = vadd.f32 %v8249_v14, %v8248_v54  ;;  %v3119_v8 = vsub.f32 %v8248_v54, %v8249_v14 }
 0x1fe   : > { %1304 = vst.msk [vmem:[%s5918_s30 + $0xb8] sm:$0xff] %vm1280_vm1, %v1258_v9  ;;  %v2084_v55 = vpop.permute.xlu0 %2083  ;;  %v3273_v50 = vpack.c.bf16 %v3246_v32, %v3245_v45  ;;  %v2551_v60 = vpack.c.bf16 %v2524_v62, %v2523_v49 }
 0x1ff   : > { %2171 = vst.msk [vmem:[%s6671_s27 + $0x40] sm:$0xff] %vm1280_vm1, %v2084_v55  ;;  %v2090_v58 = vpop.permute.xlu2 %2089  ;;  %v2430_v55 = vmul.f32 0.70710677, %v2398_v30  ;;  %v2429_v10 = vmul.f32 0.70710677, %v2397_v21 }
 0x200   : > { %v1980_v24 = vpop.f32.mrf.mxu3  ;;  %2174 = vst.msk [vmem:[%s6671_s27 + $0x58] sm:$0xff] %vm1280_vm1, %v2090_v58  ;;  %v3151_v59 = vmul.f32 0.70710677, %v3119_v8 }
 0x201   : > { %v2462_v58 = vpack.c.bf16 %v2430_v55, %v2430_v55  ;;  %v2461_v45 = vpack.c.bf16 %v2429_v10, %v2429_v10 }
 0x202   : > { %v1260_v0 = vpop.f32.mrf.mxu1  ;;  %v1763_v40 = vpop.f32.mrf.mxu2  ;;  %v3183_v2 = vpack.c.bf16 %v3151_v59, %v3151_v59 }
 0x203   : > { %v1981_v53 = vadd.f32 %v1980_v24, %v1763_v40  ;;  %v1043_v17 = vpop.f32.mrf.mxu0  ;;  %v3152_v24 = vmul.f32 0.70710677, %v3120_v23  ;;  %v2494_v49 = vunpack.c.l.bf16 %v2462_v58  ;;  %v2742_v54 = vunpack.c.l.b16 %v2461_v45 }
 0x204   : > { %v1261_v27 = vadd.f32 %v1260_v0, %v1043_v17  ;;  %v2493_v17 = vunpack.c.l.bf16 %v2461_v45  ;;  %v3215_v14 = vunpack.c.l.bf16 %v3183_v2 }
 0x205   : > { %2026 = vst.msk [vmem:[%s5932_s17 + $0xb8] sm:$0xff] %vm1280_vm1, %v1981_v53  ;;  %2113 = vrot.lane.b32.xlu2 %v1981_v53, %s7988_s14  ;;  %1391 = vrot.lane.b32.xlu0 %v1258_v9, %s7988_s14  ;;  %v3184_v0 = vpack.c.bf16 %v3152_v24, %v3152_v24  ;;  %v2743_v53 = vunpack.c.l.b16 %v2462_v58 }
 0x206   : > { %1305 = vst.msk [vmem:[%s5918_s30 + $0xc0] sm:$0xff] %vm1280_vm1, %v1261_v27  ;;  %v2086_v12 = vpop.permute.xlu1 %2085  ;;  %1393 = vrot.lane.b32.xlu1 %v1261_v27, %s7988_s14  ;;  %v3464_v27 = vunpack.c.l.b16 %v3183_v2  ;;  %v3247_v58 = vsub.f32 %v3151_v59, %v3215_v14  ;;  %v3468_v59 = vunpack.c.l.b16 %v6346_v38 }
 0x207   : > { %2172 = vst.msk [vmem:[%s6671_s27 + $0x48] sm:$0xff] %vm1280_vm1, %v2086_v12  ;;  %v1370_v9 = vpop.permute.xlu2 %1369  ;;  %v3216_v23 = vunpack.c.l.bf16 %v3184_v0  ;;  %v3465_v8 = vunpack.c.l.b16 %v3184_v0  ;;  %v2526_v12 = vsub.f32 %v2430_v55, %v2494_v49  ;;  %v2769_v0 = vpack.c.b16 %v2743_v53, %v2742_v54 }
 0x208   : > { %v1983_v33 = vpop.f32.mrf.mxu3  ;;  %v1366_v25 = vpop.permute.xlu0 %1365  ;;  %1453 = vst.msk [vmem:[%s6495_s22 + $0x60] sm:$0xff] %vm1280_vm1, %v1370_v9  ;;  %v8251_v9 = vld [vmem:[#allocation51_spill] sm:$0xff] }
 0x209   : > { %4475 = vmatmul.msk.bf16.gmra.mxu1 %vm925_vm0, %v2768_v61  ;;  %4507 = vmatmul.msk.bf16.gmra.mxu3 %vm925_vm0, %v3490_v39  ;;  %1451 = vst.msk [vmem:[%s6495_s22 + $0x50] sm:$0xff] %vm1280_vm1, %v1366_v25  ;;  %v3491_v55 = vpack.c.b16 %v3465_v8, %v3464_v27 }
 0x20a   : > { %v1262_v20 = vpop.f32.mrf.mxu1  ;;  %v1766_v4 = vpop.f32.mrf.mxu2  ;;  %4491 = vmatmul.msk.bf16.gmra.mxu2 %vm925_vm0, %v3273_v50  ;;  %v8250_v50 = vld [vmem:[#allocation92_spill] sm:$0xff] }
 0x20b   : > { %v1984_v40 = vadd.f32 %v1983_v33, %v1766_v4  ;;  %v1045_v57 = vpop.f32.mrf.mxu0  ;;  %v3248_v33 = vsub.f32 %v3152_v24, %v3216_v23  ;;  %v2525_v4 = vsub.f32 %v2429_v10, %v2493_v17  ;;  %v8254_v24 = vld [vmem:[#allocation72_spill] sm:$0xff]  ;;  %v8255_v23 = vld [vmem:[#allocation77_spill] sm:$0xff]  ;;  %v2746_v10 = vunpack.c.l.b16 %v6344_v22 }
 0x20c   : > { %4459 = vmatmul.msk.bf16.gmra.mxu0 %vm925_vm0, %v2551_v60  ;;  %v1263_v30 = vadd.f32 %v1262_v20, %v1045_v57  ;;  %v2400_v60 = vadd.f32 %v8251_v9, %v8250_v50  ;;  %v3122_v20 = vsub.f32 %v8250_v50, %v8251_v9  ;;  %v8253_v57 = vld [vmem:[#allocation49_spill] sm:$0xff] }
 0x20d   : > { %2027 = vst.msk [vmem:[%s5932_s17 + $0xc0] sm:$0xff] %vm1280_vm1, %v1984_v40  ;;  %2115 = vrot.lane.b32.xlu0 %v1984_v40, %s7988_s14  ;;  %v8252_v40 = vld [vmem:[#allocation94_spill] sm:$0xff]  ;;  %v2552_v8 = vpack.c.bf16 %v2526_v12, %v2525_v4  ;;  %v3274_v27 = vpack.c.bf16 %v3248_v33, %v3247_v58 }
 0x20e   : > { %1306 = vst.msk [vmem:[%s5918_s30 + $0xc8] sm:$0xff] %vm1280_vm1, %v1263_v30  ;;  %1395 = vrot.lane.b32.xlu2 %v1263_v30, %s7988_s14  ;;  %v2399_v45 = vadd.f32 %v8253_v57, %v8252_v40  ;;  %v3121_v2 = vsub.f32 %v8252_v40, %v8253_v57  ;;  %v2747_v30 = vunpack.c.l.b16 %v8254_v24  ;;  %v2432_v17 = vmul.f32 0.70710677, %v2400_v60 }
 0x20f   : > { %v1372_v61 = vpop.permute.xlu2 %1371  ;;  %v3154_v54 = vmul.f32 0.70710677, %v3122_v20 }
 0x210   : > { %v1985_v21 = vpop.f32.mrf.mxu3  ;;  %v1368_v62 = vpop.permute.xlu1 %1367  ;;  %1454 = vst.msk [vmem:[%s6495_s22 + $0x68] sm:$0xff] %vm1280_vm1, %v1372_v61  ;;  %v2431_v61 = vmul.f32 0.70710677, %v2399_v45  ;;  %v6937_v38 = vpack.c.b16 %v2747_v30, %v2746_v10 }
 0x211   : > { %1452 = vst.msk [vmem:[%s6495_s22 + $0x58] sm:$0xff] %vm1280_vm1, %v1368_v62  ;;  %v3153_v62 = vmul.f32 0.70710677, %v3121_v2  ;;  %v3186_v50 = vpack.c.bf16 %v3154_v54, %v3154_v54 }
 0x212   : > { %v1265_v32 = vpop.f32.mrf.mxu1  ;;  %v1768_v39 = vpop.f32.mrf.mxu2  ;;  %v2463_v60 = vpack.c.bf16 %v2431_v61, %v2431_v61 }
 0x213   : > { %v1986_v25 = vadd.f32 %v1985_v21, %v1768_v39  ;;  %v3469_v21 = vunpack.c.l.b16 %v8255_v23  ;;  %v2464_v39 = vpack.c.bf16 %v2432_v17, %v2432_v17  ;;  %v3218_v57 = vunpack.c.l.bf16 %v3186_v50 }
 0x214   : > { %v1048_v49 = vpop.f32.mrf.mxu0  ;;  %v2744_v45 = vunpack.c.l.b16 %v2463_v60  ;;  %v3467_v2 = vunpack.c.l.b16 %v3186_v50  ;;  %v3470_v50 = vunpack.c.l.b16 %v6303_v43 }
 0x215   : > { %2028 = vst.msk [vmem:[%s5932_s17 + $0xc8] sm:$0xff] %vm1280_vm1, %v1986_v25  ;;  %2117 = vrot.lane.b32.xlu1 %v1986_v25, %s7988_s14  ;;  %v1266_v53 = vadd.f32 %v1265_v32, %v1048_v49  ;;  %v6939_v32 = vpack.c.b16 %v3469_v21, %v3468_v59  ;;  %v3185_v25 = vpack.c.bf16 %v3153_v62, %v3153_v62  ;;  %v2745_v40 = vunpack.c.l.b16 %v2464_v39 }
 0x216   : > { %v3250_v21 = vsub.f32 %v3154_v54, %v3218_v57 }
 0x217   : > { %1307 = vst.msk [vmem:[%s5918_s30 + $0xd0] sm:$0xff] %vm1280_vm1, %v1266_v53  ;;  %1397 = vrot.lane.b32.xlu2 %v1266_v53, %s7988_s14  ;;  %v3217_v24 = vunpack.c.l.bf16 %v3185_v25  ;;  %v3466_v30 = vunpack.c.l.b16 %v3185_v25  ;;  %v2770_v59 = vpack.c.b16 %v2745_v40, %v2744_v45 }
 0x218   : > { %v1988_v14 = vpop.f32.mrf.mxu3 }
 0x219   : > { %4476 = vmatmul.msk.bf16.gmra.mxu1 %vm925_vm0, %v2769_v0  ;;  %4508 = vmatmul.msk.bf16.gmra.mxu3 %vm925_vm0, %v3491_v55  ;;  %v2496_v0 = vunpack.c.l.bf16 %v2464_v39  ;;  %v2495_v55 = vunpack.c.l.bf16 %v2463_v60  ;;  %v2748_v39 = vunpack.c.l.b16 %v6299_v48  ;;  %v3471_v60 = vunpack.c.l.b16 %v6474_v51 }
 0x21a   : > { %4492 = vmatmul.msk.bf16.gmra.mxu2 %vm925_vm0, %v3274_v27  ;;  %v1267_v22 = vpop.f32.mrf.mxu1  ;;  %v1771_v9 = vpop.f32.mrf.mxu2 }
 0x21b   : > { %v1989_v12 = vadd.f32 %v1988_v14, %v1771_v9  ;;  %v2528_v23 = vsub.f32 %v2432_v17, %v2496_v0  ;;  %v2527_v53 = vsub.f32 %v2431_v61, %v2495_v55  ;;  %v3249_v14 = vsub.f32 %v3153_v62, %v3217_v24 }
 0x21c   : > { %4460 = vmatmul.msk.bf16.gmra.mxu0 %vm925_vm0, %v2552_v8  ;;  %v1050_v33 = vpop.f32.mrf.mxu0  ;;  %v2749_v9 = vunpack.c.l.b16 %v6452_v63  ;;  %v6967_v51 = vpack.c.b16 %v3471_v60, %v3470_v50  ;;  %v3473_v0 = vunpack.c.l.b16 %v6533_v5  ;;  %v8256_v5 = vld [vmem:[#allocation79_spill] sm:$0xff]  ;;  %v3480_v60 = vunpack.c.l.b16 %v6487_v19 }
 0x21d   : > { %2029 = vst.msk [vmem:[%s5932_s17 + $0xd0] sm:$0xff] %vm1280_vm1, %v1989_v12  ;;  %v1268_v20 = vadd.f32 %v1267_v22, %v1050_v33  ;;  %v3492_v22 = vpack.c.b16 %v3467_v2, %v3466_v30  ;;  %v2553_v62 = vpack.c.bf16 %v2528_v23, %v2527_v53  ;;  %v3275_v25 = vpack.c.bf16 %v3250_v21, %v3249_v14 }
 0x21e   : > { %v6965_v63 = vpack.c.b16 %v2749_v9, %v2748_v39  ;;  %v2753_v30 = vunpack.c.l.b16 %v8256_v5  ;;  %v2752_v21 = vunpack.c.l.b16 %v6378_v44  ;;  %v8260_v39 = vld [vmem:[#allocation41_spill] sm:$0xff]  ;;  %v2758_v9 = vunpack.c.l.b16 %v6478_v15 }
 0x21f   : > { %v2092_v4 = vpop.permute.xlu0 %2091  ;;  %v2098_v58 = vpop.permute.xlu2 %2097  ;;  %1308 = vst.msk [vmem:[%s5918_s30 + $0xd8] sm:$0xff] %vm1280_vm1, %v1268_v20  ;;  %2119 = vrot.lane.b32.xlu2 %v1989_v12, %s7988_s14  ;;  %1399 = vrot.lane.b32.xlu0 %v1268_v20, %s7988_s14  ;;  %v2750_v20 = vunpack.c.l.b16 %v6351_v36  ;;  %v8265_v5 = vld [vmem:[#allocation45_spill] sm:$0xff] }
 0x220   : > { %2175 = vst.msk [vmem:[%s6671_s27 + $0x60] sm:$0xff] %vm1280_vm1, %v2092_v4  ;;  %v1990_v49 = vpop.f32.mrf.mxu3  ;;  %v3472_v4 = vunpack.c.l.b16 %v6357_v41  ;;  %v7004_v44 = vpack.c.b16 %v2753_v30, %v2752_v21  ;;  %v3483_v30 = vunpack.c.l.b16 %v8265_v5 }
 0x221   : > { %2178 = vst.msk [vmem:[%s6671_s27 + $0x78] sm:$0xff] %vm1280_vm1, %v2098_v58  ;;  %v2751_v58 = vunpack.c.l.b16 %v6523_v46 }
 0x222   : > { %v1773_v10 = vpop.f32.mrf.mxu2  ;;  %v6986_v36 = vpack.c.b16 %v3473_v0, %v3472_v4 }
 0x223   : > { %v1991_v27 = vadd.f32 %v1990_v49, %v1773_v10  ;;  %v6984_v24 = vpack.c.b16 %v2751_v58, %v2750_v20  ;;  %v8257_v49 = vld [vmem:[#allocation78_spill] sm:$0xff]  ;;  %v3474_v10 = vunpack.c.l.b16 %v6415_v31  ;;  %v8262_v20 = vld [vmem:[#allocation48_spill] sm:$0xff]  ;;  %v2757_v58 = vunpack.c.l.b16 %v6564_v47 }
 0x224   : > { %v1053_v17 = vpop.f32.mrf.mxu0  ;;  %v3475_v23 = vunpack.c.l.b16 %v8257_v49  ;;  %v2761_v4 = vunpack.c.l.b16 %v8262_v20  ;;  %v3482_v49 = vunpack.c.l.b16 %v6620_v37  ;;  %v8276_v20 = vld [vmem:[#allocation74_spill] sm:$0xff] }
 0x225   : > { %2030 = vst.msk [vmem:[%s5932_s17 + $0xd8] sm:$0xff] %vm1280_vm1, %v1991_v27 }
 0x226   : > { %v1270_v8 = vpop.f32.mrf.mxu1  ;;  %v7006_v31 = vpack.c.b16 %v3475_v23, %v3474_v10 }
 0x227   : > { %v1271_v54 = vadd.f32 %v1270_v8, %v1053_v17  ;;  %v2094_v61 = vpop.permute.xlu1 %2093  ;;  %2121 = vrot.lane.b32.xlu0 %v1991_v27, %s7988_s14  ;;  %v2755_v17 = vunpack.c.l.b16 %v6519_v18 }
 0x228   : > { %2176 = vst.msk [vmem:[%s6671_s27 + $0x68] sm:$0xff] %vm1280_vm1, %v2094_v61  ;;  %v1380_v48 = vpop.permute.xlu2 %1379 }
 0x229   : > { %4477 = vmatmul.msk.bf16.gmra.mxu1 %vm925_vm0, %v2770_v59  ;;  %4509 = vmatmul.msk.bf16.gmra.mxu3 %vm925_vm0, %v3492_v22  ;;  %1309 = vst.msk [vmem:[%s5918_s30 + $0xe0] sm:$0xff] %vm1280_vm1, %v1271_v54  ;;  %v1374_v43 = vpop.permute.xlu0 %1373  ;;  %v8259_v22 = vld [vmem:[#allocation76_spill] sm:$0xff] }
 0x22a   : > { %1401 = vrot.lane.b32.xlu1 %v1271_v54, %s7988_s14  ;;  %4493 = vmatmul.msk.bf16.gmra.mxu2 %vm925_vm0, %v3275_v25  ;;  %1455 = vst.msk [vmem:[%s6495_s22 + $0x70] sm:$0xff] %vm1280_vm1, %v1374_v43  ;;  %v1993_v12 = vpop.f32.mrf.mxu3  ;;  %v3477_v54 = vunpack.c.l.b16 %v6543_v56  ;;  %v3481_v25 = vunpack.c.l.b16 %v6705_v3 }
 0x22b   : > { %1458 = vst.msk [vmem:[%s6495_s22 + $0x88] sm:$0xff] %vm1280_vm1, %v1380_v48  ;;  %v1776_v40 = vpop.f32.mrf.mxu2 }
 0x22c   : > { %4461 = vmatmul.msk.bf16.gmra.mxu0 %vm925_vm0, %v2553_v62  ;;  %v1994_v57 = vadd.f32 %v1993_v12, %v1776_v40  ;;  %v1055_v45 = vpop.f32.mrf.mxu0  ;;  %v2759_v62 = vunpack.c.l.b16 %v6703_v29  ;;  %v7040_v3 = vpack.c.b16 %v3481_v25, %v3480_v60  ;;  %v8263_v40 = vld [vmem:[#allocation33_spill] sm:$0xff]  ;;  %v3484_v60 = vunpack.c.l.b16 %v6689_v7 }
 0x22e   : > { %v1272_v33 = vpop.f32.mrf.mxu1  ;;  %2031 = vst.msk [vmem:[%s5932_s17 + $0xe0] sm:$0xff] %vm1280_vm1, %v1994_v57  ;;  %v7038_v29 = vpack.c.b16 %v2759_v62, %v2758_v9  ;;  %v2762_v9 = vunpack.c.l.b16 %v6683_v1 }
 0x22f   : > { %v1273_v2 = vadd.f32 %v1272_v33, %v1055_v45  ;;  %v2096_v55 = vpop.permute.xlu1 %2095  ;;  %v8264_v45 = vld [vmem:[#allocation39_spill] sm:$0xff] }
 0x230   : > { %2177 = vst.msk [vmem:[%s6671_s27 + $0x70] sm:$0xff] %vm1280_vm1, %v2096_v55  ;;  %v2756_v55 = vunpack.c.l.b16 %v6622_v13 }
 0x231   : > { %1310 = vst.msk [vmem:[%s5918_s30 + $0xe8] sm:$0xff] %vm1280_vm1, %v1273_v2 }
 0x232   : > { %2123 = vrot.lane.b32.xlu1 %v1994_v57, %s7988_s14  ;;  %v1995_v41 = vpop.f32.mrf.mxu3  ;;  %v3479_v57 = vunpack.c.l.b16 %v8263_v40  ;;  %v7066_v37 = vpack.c.b16 %v2757_v58, %v2756_v55 }
 0x233   : > { %v1778_v59 = vpop.f32.mrf.mxu2 }
 0x234   : > { %v1996_v53 = vadd.f32 %v1995_v41, %v1778_v59  ;;  %v3478_v41 = vunpack.c.l.b16 %v6639_v11  ;;  %v8266_v59 = vld [vmem:[#allocation82_spill] sm:$0xff] }
 0x236   : > { %v1275_v46 = vpop.f32.mrf.mxu1  ;;  %2032 = vst.msk [vmem:[%s5932_s17 + $0xe8] sm:$0xff] %vm1280_vm1, %v1996_v53  ;;  %2125 = vrot.lane.b32.xlu2 %v1996_v53, %s7988_s14  ;;  %v7068_v11 = vpack.c.b16 %v3479_v57, %v3478_v41  ;;  %v8267_v53 = vld [vmem:[#allocation58_spill] sm:$0xff] }
 0x237   : > { %v1376_v8 = vpop.permute.xlu1 %1375 }
 0x238   : > { %1456 = vst.msk [vmem:[%s6495_s22 + $0x78] sm:$0xff] %vm1280_vm1, %v1376_v8  ;;  %v8270_v8 = vld [vmem:[#allocation57_spill] sm:$0xff] }
 0x239   : > { %v1058_v14 = vpop.f32.mrf.mxu0  ;;  %4478 = vmatmul.msk.bf16.gmra.mxu1 %vm925_vm0, %v6937_v38  ;;  %4510 = vmatmul.msk.bf16.gmra.mxu3 %vm925_vm0, %v6939_v32  ;;  %v8258_v38 = vpack.c.bf16 %v6367_v16, %v6386_v35  ;;  %v8261_v32 = vpack.c.bf16 %v8259_v22, %v8260_v39  ;;  %v2754_v16 = vunpack.c.l.b16 %v6588_v52  ;;  %v3476_v35 = vunpack.c.l.b16 %v6590_v6 }
 0x23a   : > { %v1276_v27 = vadd.f32 %v1275_v46, %v1058_v14  ;;  %1403 = vrot.lane.b32.xlu1 %v1273_v2, %s7988_s14  ;;  %v2760_v2 = vunpack.c.l.b16 %v8264_v45  ;;  %v8269_v14 = vld [vmem:[#allocation63_spill] sm:$0xff] }
 0x23b   : > { %4494 = vmatmul.msk.bf16.gmra.mxu2 %vm925_vm0, %v8258_v38  ;;  %v7034_v52 = vpack.c.b16 %v2755_v17, %v2754_v16  ;;  %v7036_v6 = vpack.c.b16 %v3477_v54, %v3476_v35  ;;  %v7085_v38 = vpack.c.b16 %v3483_v30, %v3482_v49 }
 0x23c   : > { %1311 = vst.msk [vmem:[%s5918_s30 + $0xf0] sm:$0xff] %vm1280_vm1, %v1276_v27  ;;  %4462 = vmatmul.msk.bf16.gmra.mxu0 %vm925_vm0, %v8261_v32  ;;  %v1998_v50 = vpop.f32.mrf.mxu3  ;;  %v2763_v32 = vunpack.c.l.b16 %v6585_v42 }
 0x23d   : > { %v1781_v48 = vpop.f32.mrf.mxu2 }
 0x23e   : > { %v1277_v61 = vpop.f32.mrf.mxu1  ;;  %v1999_v15 = vadd.f32 %v1998_v50, %v1781_v48  ;;  %1405 = vrot.lane.b32.xlu2 %v1276_v27, %s7988_s14  ;;  %v8271_v27 = vpack.c.bf16 %v8269_v14, %v8270_v8  ;;  %v3485_v50 = vunpack.c.l.b16 %v6594_v26  ;;  %v7102_v26 = vpack.c.b16 %v2763_v32, %v2762_v9 }
 0x23f   : > { %v2100_v43 = vpop.permute.xlu0 %2099  ;;  %v2106_v19 = vpop.permute.xlu2 %2105 }
 0x240   : > { %2179 = vst.msk [vmem:[%s6671_s27 + $0x80] sm:$0xff] %vm1280_vm1, %v2100_v43  ;;  %v1378_v18 = vpop.permute.xlu1 %1377  ;;  %2127 = vrot.lane.b32.xlu0 %v1999_v15, %s7988_s14  ;;  %v7104_v1 = vpack.c.b16 %v3485_v50, %v3484_v60 }
 0x241   : > { %v1060_v12 = vpop.f32.mrf.mxu0  ;;  %2033 = vst.msk [vmem:[%s5932_s17 + $0xf0] sm:$0xff] %vm1280_vm1, %v1999_v15 }
 0x242   : > { %v1278_v56 = vadd.f32 %v1277_v61, %v1060_v12  ;;  %1457 = vst.msk [vmem:[%s6495_s22 + $0x80] sm:$0xff] %vm1280_vm1, %v1378_v18  ;;  %v8272_v18 = vld [vmem:[#allocation75_spill] sm:$0xff] }
 0x243   : > { %2182 = vst.msk [vmem:[%s6671_s27 + $0x98] sm:$0xff] %vm1280_vm1, %v2106_v19 }
 0x244   : > { %1312 = vst.msk [vmem:[%s5918_s30 + $0xf8] sm:$0xff] %vm1280_vm1, %v1278_v56  ;;  %v2000_v33 = vpop.f32.mrf.mxu3 }
 0x245   : > { %v1783_v46 = vpop.f32.mrf.mxu2 }
 0x246   : > { %v2837_v0 = vpop.f32.mrf.mxu1  ;;  %v2001_v23 = vadd.f32 %v2000_v33, %v1783_v46  ;;  %v8275_v33 = vld [vmem:[#allocation83_spill] sm:$0xff] }
 0x247   : > { %v2102_v21 = vpop.permute.xlu0 %2101 }
 0x248   : > { %2180 = vst.msk [vmem:[%s6671_s27 + $0x88] sm:$0xff] %vm1280_vm1, %v2102_v21  ;;  %v1388_v47 = vpop.permute.xlu2 %1387  ;;  %2129 = vrot.lane.b32.xlu1 %v2001_v23, %s7988_s14  ;;  %1407 = vrot.lane.b32.xlu0 %v1278_v56, %s7988_s14 }
 0x249   : > { %v2620_v10 = vpop.f32.mrf.mxu0  ;;  %4479 = vmatmul.msk.bf16.gmra.mxu1 %vm925_vm0, %v6965_v63  ;;  %2034 = vst.msk [vmem:[%s5932_s17 + $0xf8] sm:$0xff] %vm1280_vm1, %v2001_v23  ;;  %4511 = vmatmul.msk.bf16.gmra.mxu3 %vm925_vm0, %v6967_v51  ;;  %v7070_v63 = vpack.c.b16 %v2761_v4, %v2760_v2  ;;  %v8268_v51 = vpack.c.bf16 %v8266_v59, %v8267_v53  ;;  %v8281_v59 = vld [vmem:[#allocation44_spill] sm:$0xff]  ;;  %v8282_v53 = vld [vmem:[#allocation81_spill] sm:$0xff] }
 0x24a   : > { %v2838_v13 = vadd.f32 %v2837_v0, %v2620_v10  ;;  %1462 = vst.msk [vmem:[%s6495_s22 + $0xa8] sm:$0xff] %vm1280_vm1, %v1388_v47  ;;  %v8277_v4 = vpack.c.bf16 %v8275_v33, %v8276_v20  ;;  %v8278_v47 = vld [vmem:[#allocation80_spill] sm:$0xff] }
 0x24b   : > { %4495 = vmatmul.msk.bf16.gmra.mxu2 %vm925_vm0, %v8268_v51  ;;  %v8283_v51 = vpack.c.bf16 %v8281_v59, %v8282_v53 }
 0x24c   : > { %2917 = vst.msk [vmem:[%s7073_s29] sm:$0xff] %vm1280_vm1, %v2838_v13  ;;  %4463 = vmatmul.msk.bf16.gmra.mxu0 %vm925_vm0, %v8271_v27  ;;  %2981 = vrot.lane.b32.xlu2 %v2838_v13, %s7988_s14  ;;  %v3559_v22 = vpop.f32.mrf.mxu3 }
 0x24d   : > { %v3342_v17 = vpop.f32.mrf.mxu2 }
 0x24e   : > { %v2839_v39 = vpop.f32.mrf.mxu1  ;;  %v3560_v54 = vadd.f32 %v3559_v22, %v3342_v17 }
 0x24f   : > { %v2104_v61 = vpop.permute.xlu1 %2103  ;;  %v1382_v16 = vpop.permute.xlu0 %1381 }
 0x250   : > { %2181 = vst.msk [vmem:[%s6671_s27 + $0x90] sm:$0xff] %vm1280_vm1, %v2104_v61  ;;  %3703 = vrot.lane.b32.xlu1 %v3560_v54, %s7988_s14 }
 0x251   : > { %v2622_v35 = vpop.f32.mrf.mxu0  ;;  %3639 = vst.msk [vmem:[%s7095_s20] sm:$0xff] %vm1280_vm1, %v3560_v54 }
 0x252   : > { %v2840_v42 = vadd.f32 %v2839_v39, %v2622_v35  ;;  %1459 = vst.msk [vmem:[%s6495_s22 + $0x90] sm:$0xff] %vm1280_vm1, %v1382_v16 }
 0x254   : > { %2918 = vst.msk [vmem:[%s7073_s29 + $0x8] sm:$0xff] %vm1280_vm1, %v2840_v42  ;;  %2983 = vrot.lane.b32.xlu0 %v2840_v42, %s7988_s14  ;;  %v3561_v7 = vpop.f32.mrf.mxu3 }
 0x255   : > { %v3344_v25 = vpop.f32.mrf.mxu2 }
 0x256   : > { %v2842_v62 = vpop.f32.mrf.mxu1  ;;  %v3562_v48 = vadd.f32 %v3561_v7, %v3344_v25  ;;  %v8286_v25 = vld [vmem:[#allocation40_spill] sm:$0xff] }
 0x257   : > { %v1384_v15 = vpop.permute.xlu0 %1383 }
 0x258   : > { %1460 = vst.msk [vmem:[%s6495_s22 + $0x98] sm:$0xff] %vm1280_vm1, %v1384_v15  ;;  %v1386_v19 = vpop.permute.xlu1 %1385  ;;  %3705 = vrot.lane.b32.xlu2 %v3562_v48, %s7988_s14 }
 0x259   : > { %v2625_v43 = vpop.f32.mrf.mxu0  ;;  %4480 = vmatmul.msk.bf16.gmra.mxu1 %vm925_vm0, %v6984_v24  ;;  %3640 = vst.msk [vmem:[%s7095_s20 + $0x8] sm:$0xff] %vm1280_vm1, %v3562_v48  ;;  %4512 = vmatmul.msk.bf16.gmra.mxu3 %vm925_vm0, %v6986_v36  ;;  %v8273_v24 = vld [vmem:[#allocation73_spill] sm:$0xff]  ;;  %v8287_v48 = vld [vmem:[#allocation95_spill] sm:$0xff] }
 0x25a   : > { %v2843_v12 = vadd.f32 %v2842_v62, %v2625_v43  ;;  %1461 = vst.msk [vmem:[%s6495_s22 + $0xa0] sm:$0xff] %vm1280_vm1, %v1386_v19  ;;  %v8274_v56 = vpack.c.bf16 %v8272_v18, %v8273_v24  ;;  %v8284_v62 = vld [vmem:[#allocation96_spill] sm:$0xff]  ;;  %v8288_v15 = vpack.c.bf16 %v8286_v25, %v8287_v48  ;;  %v8301_v48 = vld [vmem:[#allocation98_spill] sm:$0xff] }
 0x25b   : > { %v8300_v25 = vld [vmem:[#allocation60_spill] sm:$0xff] }
 0x25c   : > { %2919 = vst.msk [vmem:[%s7073_s29 + $0x10] sm:$0xff] %vm1280_vm1, %v2843_v12  ;;  %4496 = vmatmul.msk.bf16.gmra.mxu2 %vm925_vm0, %v8274_v56  ;;  %4464 = vmatmul.msk.bf16.gmra.mxu0 %vm925_vm0, %v8277_v4  ;;  %v3564_v36 = vpop.f32.mrf.mxu3 }
 0x25d   : > { %2985 = vrot.lane.b32.xlu1 %v2843_v12, %s7988_s14  ;;  %v3347_v0 = vpop.f32.mrf.mxu2 }
 0x25e   : > { %v2844_v58 = vpop.f32.mrf.mxu1  ;;  %v3565_v40 = vadd.f32 %v3564_v36, %v3347_v0 }
 0x25f   : > { %v2108_v57 = vpop.permute.xlu0 %2107  ;;  %v2114_v45 = vpop.permute.xlu2 %2113 }
 0x260   : > { %2183 = vst.msk [vmem:[%s6671_s27 + $0xa0] sm:$0xff] %vm1280_vm1, %v2108_v57  ;;  %3707 = vrot.lane.b32.xlu0 %v3565_v40, %s7988_s14  ;;  %v8289_v57 = vld [vmem:[#allocation97_spill] sm:$0xff] }
 0x261   : > { %v2627_v2 = vpop.f32.mrf.mxu0  ;;  %3641 = vst.msk [vmem:[%s7095_s20 + $0x10] sm:$0xff] %vm1280_vm1, %v3565_v40 }
 0x262   : > { %v2845_v55 = vadd.f32 %v2844_v58, %v2627_v2  ;;  %2186 = vst.msk [vmem:[%s6671_s27 + $0xb8] sm:$0xff] %vm1280_vm1, %v2114_v45  ;;  %v8290_v45 = vld [vmem:[#allocation53_spill] sm:$0xff] }
 0x263   : > { %v8291_v2 = vpack.c.bf16 %v8289_v57, %v8290_v45  ;;  %v8306_v45 = vld [vmem:[#allocation65_spill] sm:$0xff] }
 0x264   : > { %2920 = vst.msk [vmem:[%s7073_s29 + $0x18] sm:$0xff] %vm1280_vm1, %v2845_v55  ;;  %2987 = vrot.lane.b32.xlu2 %v2845_v55, %s7988_s14  ;;  %v3566_v41 = vpop.f32.mrf.mxu3  ;;  %v8293_v55 = vld [vmem:[#allocation100_spill] sm:$0xff] }
 0x265   : > { %v3349_v5 = vpop.f32.mrf.mxu2 }
 0x266   : > { %v2847_v46 = vpop.f32.mrf.mxu1  ;;  %v3567_v30 = vadd.f32 %v3566_v41, %v3349_v5 }
 0x267   : > { %v2110_v49 = vpop.permute.xlu0 %2109 }
 0x268   : > { %2184 = vst.msk [vmem:[%s6671_s27 + $0xa8] sm:$0xff] %vm1280_vm1, %v2110_v49  ;;  %v1396_v21 = vpop.permute.xlu2 %1395  ;;  %3709 = vrot.lane.b32.xlu1 %v3567_v30, %s7988_s14 }
 0x269   : > { %v2630_v23 = vpop.f32.mrf.mxu0  ;;  %4481 = vmatmul.msk.bf16.gmra.mxu1 %vm925_vm0, %v7004_v44  ;;  %3642 = vst.msk [vmem:[%s7095_s20 + $0x18] sm:$0xff] %vm1280_vm1, %v3567_v30  ;;  %4513 = vmatmul.msk.bf16.gmra.mxu3 %vm925_vm0, %v7006_v31  ;;  %v8279_v44 = vld [vmem:[#allocation59_spill] sm:$0xff] }
 0x26a   : > { %v2848_v10 = vadd.f32 %v2847_v46, %v2630_v23  ;;  %1466 = vst.msk [vmem:[%s6495_s22 + $0xc8] sm:$0xff] %vm1280_vm1, %v1396_v21  ;;  %v8280_v13 = vpack.c.bf16 %v8278_v47, %v8279_v44 }
 0x26c   : > { %2921 = vst.msk [vmem:[%s7073_s29 + $0x20] sm:$0xff] %vm1280_vm1, %v2848_v10  ;;  %4497 = vmatmul.msk.bf16.gmra.mxu2 %vm925_vm0, %v8280_v13  ;;  %4465 = vmatmul.msk.bf16.gmra.mxu0 %vm925_vm0, %v8283_v51  ;;  %v3569_v31 = vpop.f32.mrf.mxu3 }
 0x26d   : > { %2989 = vrot.lane.b32.xlu0 %v2848_v10, %s7988_s14  ;;  %v3352_v8 = vpop.f32.mrf.mxu2 }
 0x26e   : > { %v2849_v14 = vpop.f32.mrf.mxu1  ;;  %v3570_v27 = vadd.f32 %v3569_v31, %v3352_v8  ;;  %v8295_v31 = vld [vmem:[#allocation43_spill] sm:$0xff] }
 0x26f   : > { %v2112_v22 = vpop.permute.xlu1 %2111  ;;  %v1390_v39 = vpop.permute.xlu0 %1389 }
 0x270   : > { %2185 = vst.msk [vmem:[%s6671_s27 + $0xb0] sm:$0xff] %vm1280_vm1, %v2112_v22  ;;  %3711 = vrot.lane.b32.xlu2 %v3570_v27, %s7988_s14 }
 0x271   : > { %v2632_v32 = vpop.f32.mrf.mxu0  ;;  %3643 = vst.msk [vmem:[%s7095_s20 + $0x20] sm:$0xff] %vm1280_vm1, %v3570_v27  ;;  %v1398_v9 = vpop.permute.xlu2 %1397  ;;  %v8297_v27 = vld [vmem:[#allocation62_spill] sm:$0xff] }
 0x272   : > { %v2850_v50 = vadd.f32 %v2849_v14, %v2632_v32  ;;  %1463 = vst.msk [vmem:[%s6495_s22 + $0xb0] sm:$0xff] %vm1280_vm1, %v1390_v39  ;;  %v8296_v14 = vpack.c.bf16 %v6739_v34, %v8295_v31 }
 0x273   : > { %1467 = vst.msk [vmem:[%s6495_s22 + $0xd0] sm:$0xff] %vm1280_vm1, %v1398_v9 }
 0x274   : > { %2922 = vst.msk [vmem:[%s7073_s29 + $0x28] sm:$0xff] %vm1280_vm1, %v2850_v50  ;;  %2991 = vrot.lane.b32.xlu1 %v2850_v50, %s7988_s14  ;;  %v3571_v60 = vpop.f32.mrf.mxu3 }
 0x275   : > { %v3354_v54 = vpop.f32.mrf.mxu2 }
 0x276   : > { %v2852_v17 = vpop.f32.mrf.mxu1  ;;  %v3572_v61 = vadd.f32 %v3571_v60, %v3354_v54 }
 0x277   : > { %v1392_v16 = vpop.permute.xlu0 %1391 }
 0x278   : > { %1464 = vst.msk [vmem:[%s6495_s22 + $0xb8] sm:$0xff] %vm1280_vm1, %v1392_v16  ;;  %v1394_v42 = vpop.permute.xlu1 %1393  ;;  %3713 = vrot.lane.b32.xlu0 %v3572_v61, %s7988_s14 }
 0x279   : > { %v2635_v35 = vpop.f32.mrf.mxu0  ;;  %4482 = vmatmul.msk.bf16.gmra.mxu1 %vm925_vm0, %v7034_v52  ;;  %3644 = vst.msk [vmem:[%s7095_s20 + $0x28] sm:$0xff] %vm1280_vm1, %v3572_v61  ;;  %4514 = vmatmul.msk.bf16.gmra.mxu3 %vm925_vm0, %v7036_v6  ;;  %v8285_v52 = vpack.c.bf16 %v6605_v28, %v8284_v62  ;;  %v2120_v43 = vpop.permute.xlu2 %2119 }
 0x27a   : > { %v2853_v7 = vadd.f32 %v2852_v17, %v2635_v35  ;;  %1465 = vst.msk [vmem:[%s6495_s22 + $0xc0] sm:$0xff] %vm1280_vm1, %v1394_v42 }
 0x27b   : > { %2189 = vst.msk [vmem:[%s6671_s27 + $0xd0] sm:$0xff] %vm1280_vm1, %v2120_v43  ;;  %v8303_v43 = vld [vmem:[#allocation71_spill] sm:$0xff] }
 0x27c   : > { %2923 = vst.msk [vmem:[%s7073_s29 + $0x30] sm:$0xff] %vm1280_vm1, %v2853_v7  ;;  %4498 = vmatmul.msk.bf16.gmra.mxu2 %vm925_vm0, %v8285_v52  ;;  %4466 = vmatmul.msk.bf16.gmra.mxu0 %vm925_vm0, %v8288_v15  ;;  %v3574_v6 = vpop.f32.mrf.mxu3  ;;  %v8302_v15 = vpack.c.bf16 %v8300_v25, %v8301_v48 }
 0x27d   : > { %2993 = vrot.lane.b32.xlu2 %v2853_v7, %s7988_s14  ;;  %v3357_v12 = vpop.f32.mrf.mxu2 }
 0x27e   : > { %v2854_v19 = vpop.f32.mrf.mxu1  ;;  %v3575_v18 = vadd.f32 %v3574_v6, %v3357_v12  ;;  %v8304_v6 = vld [vmem:[#allocation99_spill] sm:$0xff] }
 0x27f   : > { %v2116_v24 = vpop.permute.xlu0 %2115 }
 0x280   : > { %2187 = vst.msk [vmem:[%s6671_s27 + $0xc0] sm:$0xff] %vm1280_vm1, %v2116_v24  ;;  %3715 = vrot.lane.b32.xlu1 %v3575_v18, %s7988_s14 }
 0x281   : > { %v2637_v28 = vpop.f32.mrf.mxu0  ;;  %3645 = vst.msk [vmem:[%s7095_s20 + $0x30] sm:$0xff] %vm1280_vm1, %v3575_v18 }
 0x282   : > { %v2855_v56 = vadd.f32 %v2854_v19, %v2637_v28 }
 0x284   : > { %2924 = vst.msk [vmem:[%s7073_s29 + $0x38] sm:$0xff] %vm1280_vm1, %v2855_v56  ;;  %2995 = vrot.lane.b32.xlu0 %v2855_v56, %s7988_s14  ;;  %v3576_v33 = vpop.f32.mrf.mxu3 }
 0x285   : > { %v3359_v4 = vpop.f32.mrf.mxu2 }
 0x286   : > { %v2857_v20 = vpop.f32.mrf.mxu1  ;;  %v3577_v36 = vadd.f32 %v3576_v33, %v3359_v4 }
 0x287   : > { %v2118_v58 = vpop.permute.xlu1 %2117 }
 0x288   : > { %2188 = vst.msk [vmem:[%s6671_s27 + $0xc8] sm:$0xff] %vm1280_vm1, %v2118_v58  ;;  %3717 = vrot.lane.b32.xlu2 %v3577_v36, %s7988_s14 }
 0x289   : > { %v2640_v0 = vpop.f32.mrf.mxu0  ;;  %4483 = vmatmul.msk.bf16.gmra.mxu1 %vm925_vm0, %v7066_v37  ;;  %3646 = vst.msk [vmem:[%s7095_s20 + $0x38] sm:$0xff] %vm1280_vm1, %v3577_v36  ;;  %4515 = vmatmul.msk.bf16.gmra.mxu3 %vm925_vm0, %v7068_v11  ;;  %v8292_v37 = vld [vmem:[#allocation54_spill] sm:$0xff] }
 0x28a   : > { %v2858_v40 = vadd.f32 %v2857_v20, %v2640_v0  ;;  %v8294_v41 = vpack.c.bf16 %v8292_v37, %v8293_v55 }
 0x28c   : > { %2925 = vst.msk [vmem:[%s7073_s29 + $0x40] sm:$0xff] %vm1280_vm1, %v2858_v40  ;;  %4499 = vmatmul.msk.bf16.gmra.mxu2 %vm925_vm0, %v8291_v2  ;;  %4467 = vmatmul.msk.bf16.gmra.mxu0 %vm925_vm0, %v8294_v41  ;;  %v3579_v46 = vpop.f32.mrf.mxu3  ;;  %v8307_v2 = vld [vmem:[#allocation66_spill] sm:$0xff]  ;;  %v8309_v41 = vld [vmem:[#allocation55_spill] sm:$0xff] }
 0x28d   : > { %2997 = vrot.lane.b32.xlu1 %v2858_v40, %s7988_s14  ;;  %v3362_v5 = vpop.f32.mrf.mxu2  ;;  %v8308_v37 = vpack.c.bf16 %v8306_v45, %v8307_v2 }
 0x28e   : > { %v2859_v11 = vpop.f32.mrf.mxu1  ;;  %v3580_v30 = vadd.f32 %v3579_v46, %v3362_v5 }
 0x290   : > { %3647 = vst.msk [vmem:[%s7095_s20 + $0x40] sm:$0xff] %vm1280_vm1, %v3580_v30  ;;  %3719 = vrot.lane.b32.xlu0 %v3580_v30, %s7988_s14  ;;  %v2126_v21 = vpop.permute.xlu2 %2125 }
 0x291   : > { %v2642_v49 = vpop.f32.mrf.mxu0  ;;  %v1400_v10 = vpop.permute.xlu0 %1399  ;;  %2192 = vst.msk [vmem:[%s6671_s27 + $0xe8] sm:$0xff] %vm1280_vm1, %v2126_v21 }
 0x292   : > { %v2860_v23 = vadd.f32 %v2859_v11, %v2642_v49  ;;  %1468 = vst.msk [vmem:[%s6495_s22 + $0xd8] sm:$0xff] %vm1280_vm1, %v1400_v10 }
 0x294   : > { %2926 = vst.msk [vmem:[%s7073_s29 + $0x48] sm:$0xff] %vm1280_vm1, %v2860_v23  ;;  %2999 = vrot.lane.b32.xlu2 %v2860_v23, %s7988_s14  ;;  %v3581_v47 = vpop.f32.mrf.mxu3 }
 0x295   : > { %v3364_v13 = vpop.f32.mrf.mxu2 }
 0x296   : > { %v2862_v44 = vpop.f32.mrf.mxu1  ;;  %v3582_v59 = vadd.f32 %v3581_v47, %v3364_v13 }
 0x298   : > { %3648 = vst.msk [vmem:[%s7095_s20 + $0x48] sm:$0xff] %vm1280_vm1, %v3582_v59  ;;  %3721 = vrot.lane.b32.xlu1 %v3582_v59, %s7988_s14  ;;  %v1406_v8 = vpop.permute.xlu2 %1405 }
 0x299   : > { %v2645_v53 = vpop.f32.mrf.mxu0  ;;  %4484 = vmatmul.msk.bf16.gmra.mxu1 %vm925_vm0, %v7038_v29  ;;  %4516 = vmatmul.msk.bf16.gmra.mxu3 %vm925_vm0, %v7040_v3  ;;  %v8298_v29 = vld [vmem:[#allocation56_spill] sm:$0xff]  ;;  %v2122_v39 = vpop.permute.xlu0 %2121  ;;  %1471 = vst.msk [vmem:[%s6495_s22 + $0xf0] sm:$0xff] %vm1280_vm1, %v1406_v8 }
 0x29a   : > { %v2863_v51 = vadd.f32 %v2862_v44, %v2645_v53  ;;  %v8299_v22 = vpack.c.bf16 %v8297_v27, %v8298_v29  ;;  %2190 = vst.msk [vmem:[%s6671_s27 + $0xd8] sm:$0xff] %vm1280_vm1, %v2122_v39 }
 0x29c   : > { %2927 = vst.msk [vmem:[%s7073_s29 + $0x50] sm:$0xff] %vm1280_vm1, %v2863_v51  ;;  %4500 = vmatmul.msk.bf16.gmra.mxu2 %vm925_vm0, %v8296_v14  ;;  %4468 = vmatmul.msk.bf16.gmra.mxu0 %vm925_vm0, %v8299_v22  ;;  %v3584_v3 = vpop.f32.mrf.mxu3  ;;  %v1402_v32 = vpop.permute.xlu1 %1401 }
 0x29d   : > { %3001 = vrot.lane.b32.xlu0 %v2863_v51, %s7988_s14  ;;  %1469 = vst.msk [vmem:[%s6495_s22 + $0xe0] sm:$0xff] %vm1280_vm1, %v1402_v32  ;;  %v3367_v50 = vpop.f32.mrf.mxu2 }
 0x29e   : > { %v2864_v34 = vpop.f32.mrf.mxu1  ;;  %v3585_v9 = vadd.f32 %v3584_v3, %v3367_v50 }
 0x2a0   : > { %3649 = vst.msk [vmem:[%s7095_s20 + $0x50] sm:$0xff] %vm1280_vm1, %v3585_v9  ;;  %3723 = vrot.lane.b32.xlu2 %v3585_v9, %s7988_s14 }
 0x2a1   : > { %v2647_v60 = vpop.f32.mrf.mxu0 }
 0x2a2   : > { %v2865_v17 = vadd.f32 %v2864_v34, %v2647_v60 }
 0x2a4   : > { %2928 = vst.msk [vmem:[%s7073_s29 + $0x58] sm:$0xff] %vm1280_vm1, %v2865_v17  ;;  %3003 = vrot.lane.b32.xlu1 %v2865_v17, %s7988_s14  ;;  %v3586_v54 = vpop.f32.mrf.mxu3  ;;  %v2124_v61 = vpop.permute.xlu1 %2123 }
 0x2a5   : > { %2191 = vst.msk [vmem:[%s6671_s27 + $0xe0] sm:$0xff] %vm1280_vm1, %v2124_v61  ;;  %v3369_v42 = vpop.f32.mrf.mxu2 }
 0x2a6   : > { %v2867_v16 = vpop.f32.mrf.mxu1  ;;  %v2982_v35 = vpop.permute.xlu2 %2981  ;;  %v3587_v7 = vadd.f32 %v3586_v54, %v3369_v42 }
 0x2a7   : > { %3077 = vst.msk [vmem:[%s7270_s21] sm:$0xff] %vm1280_vm1, %v2982_v35 }
 0x2a8   : > { %3650 = vst.msk [vmem:[%s7095_s20 + $0x58] sm:$0xff] %vm1280_vm1, %v3587_v7  ;;  %3725 = vrot.lane.b32.xlu0 %v3587_v7, %s7988_s14 }
 0x2a9   : > { %v2650_v62 = vpop.f32.mrf.mxu0  ;;  %4485 = vmatmul.msk.bf16.gmra.mxu1 %vm925_vm0, %v7070_v63  ;;  %4517 = vmatmul.msk.bf16.gmra.mxu3 %vm925_vm0, %v7085_v38  ;;  %v8305_v63 = vpack.c.bf16 %v8303_v43, %v8304_v6 }
 0x2aa   : > { %v2868_v52 = vadd.f32 %v2867_v16, %v2650_v62 }
 0x2ac   : > { %2929 = vst.msk [vmem:[%s7073_s29 + $0x60] sm:$0xff] %vm1280_vm1, %v2868_v52  ;;  %4469 = vmatmul.msk.bf16.gmra.mxu0 %vm925_vm0, %v8302_v15  ;;  %4501 = vmatmul.msk.bf16.gmra.mxu2 %vm925_vm0, %v8305_v63  ;;  %v3589_v19 = vpop.f32.mrf.mxu3  ;;  %v1404_v38 = vpop.permute.xlu1 %1403 }
 0x2ad   : > { %3005 = vrot.lane.b32.xlu2 %v2868_v52, %s7988_s14  ;;  %1470 = vst.msk [vmem:[%s6495_s22 + $0xe8] sm:$0xff] %vm1280_vm1, %v1404_v38  ;;  %v3372_v18 = vpop.f32.mrf.mxu2 }
 0x2ae   : > { %v2869_v12 = vpop.f32.mrf.mxu1  ;;  %v3590_v24 = vadd.f32 %v3589_v19, %v3372_v18 }
 0x2b0   : > { %3651 = vst.msk [vmem:[%s7095_s20 + $0x60] sm:$0xff] %vm1280_vm1, %v3590_v24  ;;  %3727 = vrot.lane.b32.xlu1 %v3590_v24, %s7988_s14 }
 0x2b1   : > { %v2652_v28 = vpop.f32.mrf.mxu0 }
 0x2b2   : > { %v2870_v56 = vadd.f32 %v2869_v12, %v2652_v28  ;;  %v2128_v33 = vpop.permute.xlu0 %2127  ;;  %v3706_v20 = vpop.permute.xlu2 %3705 }
 0x2b3   : > { %2193 = vst.msk [vmem:[%s6671_s27 + $0xf0] sm:$0xff] %vm1280_vm1, %v2128_v33 }
 0x2b4   : > { %2930 = vst.msk [vmem:[%s7073_s29 + $0x68] sm:$0xff] %vm1280_vm1, %v2870_v56  ;;  %3007 = vrot.lane.b32.xlu0 %v2870_v56, %s7988_s14  ;;  %v3591_v4 = vpop.f32.mrf.mxu3 }
 0x2b5   : > { %3800 = vst.msk [vmem:[%s7303_s23 + $0x8] sm:$0xff] %vm1280_vm1, %v3706_v20  ;;  %v3374_v58 = vpop.f32.mrf.mxu2 }
 0x2b6   : > { %v2872_v36 = vpop.f32.mrf.mxu1  ;;  %v3592_v0 = vadd.f32 %v3591_v4, %v3374_v58 }
 0x2b8   : > { %3652 = vst.msk [vmem:[%s7095_s20 + $0x68] sm:$0xff] %vm1280_vm1, %v3592_v0  ;;  %3729 = vrot.lane.b32.xlu2 %v3592_v0, %s7988_s14 }
 0x2b9   : > { %v2655_v40 = vpop.f32.mrf.mxu0  ;;  %4486 = vmatmul.msk.bf16.gmra.mxu1 %vm925_vm0, %v7102_v26  ;;  %4518 = vmatmul.msk.bf16.gmra.mxu3 %vm925_vm0, %v7104_v1  ;;  %v8310_v26 = vld [vmem:[#allocation37_spill] sm:$0xff] }
 0x2ba   : > { %v2873_v57 = vadd.f32 %v2872_v36, %v2655_v40  ;;  %v2130_v55 = vpop.permute.xlu1 %2129  ;;  %v8311_v46 = vpack.c.bf16 %v8309_v41, %v8310_v26  ;;  %v1408_v1 = vpop.permute.xlu0 %1407 }
 0x2bb   : > { %2194 = vst.msk [vmem:[%s6671_s27 + $0xf8] sm:$0xff] %vm1280_vm1, %v2130_v55 }
 0x2bc   : > { %2931 = vst.msk [vmem:[%s7073_s29 + $0x70] sm:$0xff] %vm1280_vm1, %v2873_v57  ;;  %4502 = vmatmul.msk.bf16.gmra.mxu2 %vm925_vm0, %v8308_v37  ;;  %4470 = vmatmul.msk.bf16.gmra.mxu0 %vm925_vm0, %v8311_v46  ;;  %v3594_v11 = vpop.f32.mrf.mxu3 }
 0x2bd   : > { %3009 = vrot.lane.b32.xlu1 %v2873_v57, %s7988_s14  ;;  %1472 = vst.msk [vmem:[%s6495_s22 + $0xf8] sm:$0xff] %vm1280_vm1, %v1408_v1  ;;  %s7522_s22 = sshll.u32 %s3941_s16, 4  ;;  %s3945_s22 = int_to_ptr.hbm [resolvable:$true] %s7522_s22 }
 0x2be   : > { %v2988_v5 = vpop.permute.xlu2 %2987  ;;  %v2874_v30 = vpop.f32.mrf.mxu1 }
 0x2bf   : > { %3080 = vst.msk [vmem:[%s7270_s21 + $0x18] sm:$0xff] %vm1280_vm1, %v2988_v5  ;;  %v3377_v49 = vpop.f32.mrf.mxu2 }
 0x2c0   : > { %v3595_v23 = vadd.f32 %v3594_v11, %v3377_v49 }
 0x2c1   : > { %v2657_v21 = vpop.f32.mrf.mxu0 }
 0x2c2   : > { %3653 = vst.msk [vmem:[%s7095_s20 + $0x70] sm:$0xff] %vm1280_vm1, %v3595_v23  ;;  %v2875_v10 = vadd.f32 %v2874_v30, %v2657_v21  ;;  %3731 = vrot.lane.b32.xlu0 %v3595_v23, %s7988_s14  ;;  %v3704_v47 = vpop.permute.xlu1 %3703 }
 0x2c3   : > { %3799 = vst.msk [vmem:[%s7303_s23] sm:$0xff] %vm1280_vm1, %v3704_v47 }
 0x2c4   : > { %2932 = vst.msk [vmem:[%s7073_s29 + $0x78] sm:$0xff] %vm1280_vm1, %v2875_v10  ;;  %3011 = vrot.lane.b32.xlu2 %v2875_v10, %s7988_s14  ;;  %v3596_v44 = vpop.f32.mrf.mxu3 }
 0x2c6   : > { %v2984_v13 = vpop.permute.xlu0 %2983  ;;  %v2877_v59 = vpop.f32.mrf.mxu1 }
 0x2c7   : > { %3078 = vst.msk [vmem:[%s7270_s21 + $0x8] sm:$0xff] %vm1280_vm1, %v2984_v13  ;;  %v3379_v53 = vpop.f32.mrf.mxu2 }
 0x2c8   : > { %v3597_v51 = vadd.f32 %v3596_v44, %v3379_v53 }
 0x2c9   : > { %v2660_v31 = vpop.f32.mrf.mxu0 }
 0x2ca   : > { %3654 = vst.msk [vmem:[%s7095_s20 + $0x78] sm:$0xff] %vm1280_vm1, %v3597_v51  ;;  %v2878_v14 = vadd.f32 %v2877_v59, %v2660_v31  ;;  %3733 = vrot.lane.b32.xlu1 %v3597_v51, %s7988_s14  ;;  %v3712_v8 = vpop.permute.xlu2 %3711 }
 0x2cb   : > { %3803 = vst.msk [vmem:[%s7303_s23 + $0x20] sm:$0xff] %vm1280_vm1, %v3712_v8 }
 0x2cc   : > { %2933 = vst.msk [vmem:[%s7073_s29 + $0x80] sm:$0xff] %vm1280_vm1, %v2878_v14  ;;  %3013 = vrot.lane.b32.xlu0 %v2878_v14, %s7988_s14  ;;  %v3599_v27 = vpop.f32.mrf.mxu3 }
 0x2ce   : > { %v2879_v29 = vpop.f32.mrf.mxu1 }
 0x2cf   : > { %v2986_v22 = vpop.permute.xlu1 %2985  ;;  %v3382_v39 = vpop.f32.mrf.mxu2 }
 0x2d0   : > { %3079 = vst.msk [vmem:[%s7270_s21 + $0x10] sm:$0xff] %vm1280_vm1, %v2986_v22  ;;  %v3600_v3 = vadd.f32 %v3599_v27, %v3382_v39 }
 0x2d1   : > { %v2662_v32 = vpop.f32.mrf.mxu0 }
 0x2d2   : > { %3655 = vst.msk [vmem:[%s7095_s20 + $0x80] sm:$0xff] %vm1280_vm1, %v3600_v3  ;;  %v2880_v34 = vadd.f32 %v2879_v29, %v2662_v32  ;;  %3735 = vrot.lane.b32.xlu2 %v3600_v3, %s7988_s14  ;;  %v3708_v50 = vpop.permute.xlu0 %3707 }
 0x2d3   : > { %3801 = vst.msk [vmem:[%s7303_s23 + $0x10] sm:$0xff] %vm1280_vm1, %v3708_v50 }
 0x2d4   : > { %2934 = vst.msk [vmem:[%s7073_s29 + $0x88] sm:$0xff] %vm1280_vm1, %v2880_v34  ;;  %3015 = vrot.lane.b32.xlu1 %v2880_v34, %s7988_s14  ;;  %v3601_v9 = vpop.f32.mrf.mxu3 }
 0x2d6   : > { %v2882_v60 = vpop.f32.mrf.mxu1 }
 0x2d7   : > { %v2994_v17 = vpop.permute.xlu2 %2993  ;;  %v3384_v54 = vpop.f32.mrf.mxu2 }
 0x2d8   : > { %3083 = vst.msk [vmem:[%s7270_s21 + $0x30] sm:$0xff] %vm1280_vm1, %v2994_v17  ;;  %v3602_v61 = vadd.f32 %v3601_v9, %v3384_v54 }
 0x2d9   : > { %v2665_v16 = vpop.f32.mrf.mxu0 }
 0x2da   : > { %3656 = vst.msk [vmem:[%s7095_s20 + $0x88] sm:$0xff] %vm1280_vm1, %v3602_v61  ;;  %v2883_v35 = vadd.f32 %v2882_v60, %v2665_v16  ;;  %3737 = vrot.lane.b32.xlu0 %v3602_v61, %s7988_s14  ;;  %v3710_v42 = vpop.permute.xlu1 %3709 }
 0x2db   : > { %3802 = vst.msk [vmem:[%s7303_s23 + $0x18] sm:$0xff] %vm1280_vm1, %v3710_v42 }
 0x2dc   : > { %2935 = vst.msk [vmem:[%s7073_s29 + $0x90] sm:$0xff] %vm1280_vm1, %v2883_v35  ;;  %3017 = vrot.lane.b32.xlu2 %v2883_v35, %s7988_s14  ;;  %v3604_v7 = vpop.f32.mrf.mxu3 }
 0x2de   : > { %v2884_v62 = vpop.f32.mrf.mxu1 }
 0x2df   : > { %v2990_v52 = vpop.permute.xlu0 %2989  ;;  %v3387_v25 = vpop.f32.mrf.mxu2 }
 0x2e0   : > { %3081 = vst.msk [vmem:[%s7270_s21 + $0x20] sm:$0xff] %vm1280_vm1, %v2990_v52  ;;  %v3605_v48 = vadd.f32 %v3604_v7, %v3387_v25 }
 0x2e1   : > { %v2667_v15 = vpop.f32.mrf.mxu0 }
 0x2e2   : > { %3657 = vst.msk [vmem:[%s7095_s20 + $0x90] sm:$0xff] %vm1280_vm1, %v3605_v48  ;;  %v2885_v43 = vadd.f32 %v2884_v62, %v2667_v15  ;;  %3739 = vrot.lane.b32.xlu1 %v3605_v48, %s7988_s14  ;;  %v3718_v6 = vpop.permute.xlu2 %3717 }
 0x2e3   : > { %3806 = vst.msk [vmem:[%s7303_s23 + $0x38] sm:$0xff] %vm1280_vm1, %v3718_v6 }
 0x2e4   : > { %2936 = vst.msk [vmem:[%s7073_s29 + $0x98] sm:$0xff] %vm1280_vm1, %v2885_v43  ;;  %3019 = vrot.lane.b32.xlu0 %v2885_v43, %s7988_s14  ;;  %v3606_v63 = vpop.f32.mrf.mxu3 }
 0x2e6   : > { %v2992_v19 = vpop.permute.xlu1 %2991  ;;  %v2887_v38 = vpop.f32.mrf.mxu1 }
 0x2e7   : > { %3082 = vst.msk [vmem:[%s7270_s21 + $0x28] sm:$0xff] %vm1280_vm1, %v2992_v19  ;;  %v3389_v12 = vpop.f32.mrf.mxu2 }
 0x2e8   : > { %v3607_v18 = vadd.f32 %v3606_v63, %v3389_v12 }
 0x2e9   : > { %v2670_v24 = vpop.f32.mrf.mxu0 }
 0x2ea   : > { %3658 = vst.msk [vmem:[%s7095_s20 + $0x98] sm:$0xff] %vm1280_vm1, %v3607_v18  ;;  %v2888_v28 = vadd.f32 %v2887_v38, %v2670_v24  ;;  %3741 = vrot.lane.b32.xlu2 %v3607_v18, %s7988_s14  ;;  %v3714_v56 = vpop.permute.xlu0 %3713 }
 0x2eb   : > { %3804 = vst.msk [vmem:[%s7303_s23 + $0x28] sm:$0xff] %vm1280_vm1, %v3714_v56 }
 0x2ec   : > { %2937 = vst.msk [vmem:[%s7073_s29 + $0xa0] sm:$0xff] %vm1280_vm1, %v2888_v28  ;;  %3021 = vrot.lane.b32.xlu1 %v2888_v28, %s7988_s14  ;;  %v3609_v33 = vpop.f32.mrf.mxu3 }
 0x2ee   : > { %v3000_v20 = vpop.permute.xlu2 %2999  ;;  %v2889_v4 = vpop.f32.mrf.mxu1 }
 0x2ef   : > { %3086 = vst.msk [vmem:[%s7270_s21 + $0x48] sm:$0xff] %vm1280_vm1, %v3000_v20  ;;  %v3392_v36 = vpop.f32.mrf.mxu2 }
 0x2f0   : > { %v3610_v58 = vadd.f32 %v3609_v33, %v3392_v36 }
 0x2f1   : > { %v2672_v0 = vpop.f32.mrf.mxu0 }
 0x2f2   : > { %3659 = vst.msk [vmem:[%s7095_s20 + $0xa0] sm:$0xff] %vm1280_vm1, %v3610_v58  ;;  %v2890_v40 = vadd.f32 %v2889_v4, %v2672_v0  ;;  %3743 = vrot.lane.b32.xlu0 %v3610_v58, %s7988_s14  ;;  %v3716_v57 = vpop.permute.xlu1 %3715 }
 0x2f3   : > { %3805 = vst.msk [vmem:[%s7303_s23 + $0x30] sm:$0xff] %vm1280_vm1, %v3716_v57 }
 0x2f4   : > { %2938 = vst.msk [vmem:[%s7073_s29 + $0xa8] sm:$0xff] %vm1280_vm1, %v2890_v40  ;;  %3023 = vrot.lane.b32.xlu2 %v2890_v40, %s7988_s14  ;;  %v3611_v45 = vpop.f32.mrf.mxu3 }
 0x2f6   : > { %v2996_v2 = vpop.permute.xlu0 %2995  ;;  %v2892_v37 = vpop.f32.mrf.mxu1 }
 0x2f7   : > { %3084 = vst.msk [vmem:[%s7270_s21 + $0x38] sm:$0xff] %vm1280_vm1, %v2996_v2  ;;  %v3394_v55 = vpop.f32.mrf.mxu2 }
 0x2f8   : > { %v3612_v41 = vadd.f32 %v3611_v45, %v3394_v55 }
 0x2f9   : > { %v2675_v26 = vpop.f32.mrf.mxu0 }
 0x2fa   : > { %3660 = vst.msk [vmem:[%s7095_s20 + $0xa8] sm:$0xff] %vm1280_vm1, %v3612_v41  ;;  %v2893_v46 = vadd.f32 %v2892_v37, %v2675_v26  ;;  %3745 = vrot.lane.b32.xlu1 %v3612_v41, %s7988_s14  ;;  %v3724_v1 = vpop.permute.xlu2 %3723 }
 0x2fb   : > { %3809 = vst.msk [vmem:[%s7303_s23 + $0x50] sm:$0xff] %vm1280_vm1, %v3724_v1 }
 0x2fc   : > { %2939 = vst.msk [vmem:[%s7073_s29 + $0xb0] sm:$0xff] %vm1280_vm1, %v2893_v46  ;;  %3025 = vrot.lane.b32.xlu0 %v2893_v46, %s7988_s14  ;;  %v3614_v11 = vpop.f32.mrf.mxu3 }
 0x2fe   : > { %v2894_v5 = vpop.f32.mrf.mxu1 }
 0x2ff   : > { %v2998_v30 = vpop.permute.xlu1 %2997  ;;  %v3397_v49 = vpop.f32.mrf.mxu2 }
 0x300   : > { %3085 = vst.msk [vmem:[%s7270_s21 + $0x40] sm:$0xff] %vm1280_vm1, %v2998_v30  ;;  %v3615_v23 = vadd.f32 %v3614_v11, %v3397_v49 }
 0x301   : > { %v2677_v21 = vpop.f32.mrf.mxu0 }
 0x302   : > { %3661 = vst.msk [vmem:[%s7095_s20 + $0xb0] sm:$0xff] %vm1280_vm1, %v3615_v23  ;;  %v2895_v10 = vadd.f32 %v2894_v5, %v2677_v21  ;;  %3747 = vrot.lane.b32.xlu2 %v3615_v23, %s7988_s14  ;;  %v3720_v47 = vpop.permute.xlu0 %3719 }
 0x303   : > { %3807 = vst.msk [vmem:[%s7303_s23 + $0x40] sm:$0xff] %vm1280_vm1, %v3720_v47 }
 0x304   : > { %2940 = vst.msk [vmem:[%s7073_s29 + $0xb8] sm:$0xff] %vm1280_vm1, %v2895_v10  ;;  %3027 = vrot.lane.b32.xlu1 %v2895_v10, %s7988_s14  ;;  %v3616_v44 = vpop.f32.mrf.mxu3 }
 0x306   : > { %v2897_v13 = vpop.f32.mrf.mxu1 }
 0x307   : > { %v3006_v59 = vpop.permute.xlu2 %3005  ;;  %v3399_v53 = vpop.f32.mrf.mxu2 }
 0x308   : > { %3089 = vst.msk [vmem:[%s7270_s21 + $0x60] sm:$0xff] %vm1280_vm1, %v3006_v59  ;;  %v3617_v51 = vadd.f32 %v3616_v44, %v3399_v53 }
 0x309   : > { %v2680_v31 = vpop.f32.mrf.mxu0 }
 0x30a   : > { %3662 = vst.msk [vmem:[%s7095_s20 + $0xb8] sm:$0xff] %vm1280_vm1, %v3617_v51  ;;  %v2898_v14 = vadd.f32 %v2897_v13, %v2680_v31  ;;  %3749 = vrot.lane.b32.xlu0 %v3617_v51, %s7988_s14  ;;  %v3722_v8 = vpop.permute.xlu1 %3721 }
 0x30b   : > { %3808 = vst.msk [vmem:[%s7303_s23 + $0x48] sm:$0xff] %vm1280_vm1, %v3722_v8 }
 0x30c   : > { %2941 = vst.msk [vmem:[%s7073_s29 + $0xc0] sm:$0xff] %vm1280_vm1, %v2898_v14  ;;  %3029 = vrot.lane.b32.xlu2 %v2898_v14, %s7988_s14  ;;  %v3619_v27 = vpop.f32.mrf.mxu3 }
 0x30e   : > { %v2899_v29 = vpop.f32.mrf.mxu1 }
 0x30f   : > { %v3002_v22 = vpop.permute.xlu0 %3001  ;;  %v3402_v39 = vpop.f32.mrf.mxu2 }
 0x310   : > { %3087 = vst.msk [vmem:[%s7270_s21 + $0x50] sm:$0xff] %vm1280_vm1, %v3002_v22  ;;  %v3620_v3 = vadd.f32 %v3619_v27, %v3402_v39 }
 0x311   : > { %v2682_v32 = vpop.f32.mrf.mxu0 }
 0x312   : > { %3663 = vst.msk [vmem:[%s7095_s20 + $0xc0] sm:$0xff] %vm1280_vm1, %v3620_v3  ;;  %v2900_v34 = vadd.f32 %v2899_v29, %v2682_v32  ;;  %3751 = vrot.lane.b32.xlu1 %v3620_v3, %s7988_s14  ;;  %v3730_v50 = vpop.permute.xlu2 %3729 }
 0x313   : > { %3812 = vst.msk [vmem:[%s7303_s23 + $0x68] sm:$0xff] %vm1280_vm1, %v3730_v50 }
 0x314   : > { %2942 = vst.msk [vmem:[%s7073_s29 + $0xc8] sm:$0xff] %vm1280_vm1, %v2900_v34  ;;  %3031 = vrot.lane.b32.xlu0 %v2900_v34, %s7988_s14  ;;  %v3621_v9 = vpop.f32.mrf.mxu3 }
 0x316   : > { %v3004_v60 = vpop.permute.xlu1 %3003  ;;  %v2902_v17 = vpop.f32.mrf.mxu1 }
 0x317   : > { %3088 = vst.msk [vmem:[%s7270_s21 + $0x58] sm:$0xff] %vm1280_vm1, %v3004_v60  ;;  %v3404_v54 = vpop.f32.mrf.mxu2 }
 0x318   : > { %v3622_v61 = vadd.f32 %v3621_v9, %v3404_v54 }
 0x319   : > { %v2685_v16 = vpop.f32.mrf.mxu0 }
 0x31a   : > { %3664 = vst.msk [vmem:[%s7095_s20 + $0xc8] sm:$0xff] %vm1280_vm1, %v3622_v61  ;;  %v2903_v35 = vadd.f32 %v2902_v17, %v2685_v16  ;;  %3753 = vrot.lane.b32.xlu2 %v3622_v61, %s7988_s14  ;;  %v3726_v42 = vpop.permute.xlu0 %3725 }
 0x31b   : > { %3810 = vst.msk [vmem:[%s7303_s23 + $0x58] sm:$0xff] %vm1280_vm1, %v3726_v42 }
 0x31c   : > { %2943 = vst.msk [vmem:[%s7073_s29 + $0xd0] sm:$0xff] %vm1280_vm1, %v2903_v35  ;;  %3033 = vrot.lane.b32.xlu1 %v2903_v35, %s7988_s14  ;;  %v3624_v7 = vpop.f32.mrf.mxu3 }
 0x31e   : > { %v3012_v62 = vpop.permute.xlu2 %3011  ;;  %v2904_v52 = vpop.f32.mrf.mxu1 }
 0x31f   : > { %3092 = vst.msk [vmem:[%s7270_s21 + $0x78] sm:$0xff] %vm1280_vm1, %v3012_v62  ;;  %v3407_v25 = vpop.f32.mrf.mxu2 }
 0x320   : > { %v3625_v48 = vadd.f32 %v3624_v7, %v3407_v25 }
 0x321   : > { %v2687_v15 = vpop.f32.mrf.mxu0 }
 0x322   : > { %3665 = vst.msk [vmem:[%s7095_s20 + $0xd0] sm:$0xff] %vm1280_vm1, %v3625_v48  ;;  %v2905_v43 = vadd.f32 %v2904_v52, %v2687_v15  ;;  %3755 = vrot.lane.b32.xlu0 %v3625_v48, %s7988_s14  ;;  %v3728_v6 = vpop.permute.xlu1 %3727 }
 0x323   : > { %3811 = vst.msk [vmem:[%s7303_s23 + $0x60] sm:$0xff] %vm1280_vm1, %v3728_v6 }
 0x324   : > { %2944 = vst.msk [vmem:[%s7073_s29 + $0xd8] sm:$0xff] %vm1280_vm1, %v2905_v43  ;;  %3035 = vrot.lane.b32.xlu2 %v2905_v43, %s7988_s14  ;;  %v3626_v63 = vpop.f32.mrf.mxu3 }
 0x326   : > { %v3008_v19 = vpop.permute.xlu0 %3007  ;;  %v2907_v38 = vpop.f32.mrf.mxu1 }
 0x327   : > { %3090 = vst.msk [vmem:[%s7270_s21 + $0x68] sm:$0xff] %vm1280_vm1, %v3008_v19  ;;  %v3409_v12 = vpop.f32.mrf.mxu2 }
 0x328   : > { %v3627_v18 = vadd.f32 %v3626_v63, %v3409_v12 }
 0x329   : > { %v2690_v24 = vpop.f32.mrf.mxu0 }
 0x32a   : > { %3666 = vst.msk [vmem:[%s7095_s20 + $0xd8] sm:$0xff] %vm1280_vm1, %v3627_v18  ;;  %v2908_v28 = vadd.f32 %v2907_v38, %v2690_v24  ;;  %3757 = vrot.lane.b32.xlu1 %v3627_v18, %s7988_s14 }
 0x32c   : > { %2945 = vst.msk [vmem:[%s7073_s29 + $0xe0] sm:$0xff] %vm1280_vm1, %v2908_v28  ;;  %v3736_v56 = vpop.permute.xlu2 %3735  ;;  %3037 = vrot.lane.b32.xlu0 %v2908_v28, %s7988_s14  ;;  %v3629_v33 = vpop.f32.mrf.mxu3 }
 0x32d   : > { %3815 = vst.msk [vmem:[%s7303_s23 + $0x80] sm:$0xff] %vm1280_vm1, %v3736_v56 }
 0x32e   : > { %v2909_v20 = vpop.f32.mrf.mxu1 }
 0x32f   : > { %v3010_v4 = vpop.permute.xlu1 %3009  ;;  %v3412_v36 = vpop.f32.mrf.mxu2 }
 0x330   : > { %3091 = vst.msk [vmem:[%s7270_s21 + $0x70] sm:$0xff] %vm1280_vm1, %v3010_v4  ;;  %v3630_v58 = vadd.f32 %v3629_v33, %v3412_v36 }
 0x331   : > { %v2692_v0 = vpop.f32.mrf.mxu0 }
 0x332   : > { %3667 = vst.msk [vmem:[%s7095_s20 + $0xe0] sm:$0xff] %vm1280_vm1, %v3630_v58  ;;  %v2910_v40 = vadd.f32 %v2909_v20, %v2692_v0  ;;  %3759 = vrot.lane.b32.xlu2 %v3630_v58, %s7988_s14 }
 0x334   : > { %2946 = vst.msk [vmem:[%s7073_s29 + $0xe8] sm:$0xff] %vm1280_vm1, %v2910_v40  ;;  %3039 = vrot.lane.b32.xlu1 %v2910_v40, %s7988_s14  ;;  %v3732_v57 = vpop.permute.xlu0 %3731  ;;  %v3631_v45 = vpop.f32.mrf.mxu3 }
 0x335   : > { %3813 = vst.msk [vmem:[%s7303_s23 + $0x70] sm:$0xff] %vm1280_vm1, %v3732_v57 }
 0x336   : > { %v3018_v2 = vpop.permute.xlu2 %3017  ;;  %v2912_v37 = vpop.f32.mrf.mxu1 }
 0x337   : > { %3095 = vst.msk [vmem:[%s7270_s21 + $0x90] sm:$0xff] %vm1280_vm1, %v3018_v2  ;;  %v3414_v55 = vpop.f32.mrf.mxu2 }
 0x338   : > { %v7481_v41 = vadd.f32 %v3631_v45, %v3414_v55 }
 0x339   : > { %v2695_v26 = vpop.f32.mrf.mxu0 }
 0x33a   : > { %3668 = vst.msk [vmem:[%s7095_s20 + $0xe8] sm:$0xff] %vm1280_vm1, %v7481_v41  ;;  %v2913_v46 = vadd.f32 %v2912_v37, %v2695_v26 }
 0x33c   : > { %2947 = vst.msk [vmem:[%s7073_s29 + $0xf0] sm:$0xff] %vm1280_vm1, %v2913_v46  ;;  %v3734_v1 = vpop.permute.xlu1 %3733  ;;  %3041 = vrot.lane.b32.xlu2 %v2913_v46, %s7988_s14  ;;  %v3634_v11 = vpop.f32.mrf.mxu3 }
 0x33d   : > { %3814 = vst.msk [vmem:[%s7303_s23 + $0x78] sm:$0xff] %vm1280_vm1, %v3734_v1 }
 0x33e   : > { %v3014_v5 = vpop.permute.xlu0 %3013  ;;  %v2914_v23 = vpop.f32.mrf.mxu1 }
 0x33f   : > { %3093 = vst.msk [vmem:[%s7270_s21 + $0x80] sm:$0xff] %vm1280_vm1, %v3014_v5  ;;  %v3417_v30 = vpop.f32.mrf.mxu2 }
 0x340   : > { %v3635_v49 = vadd.f32 %v3634_v11, %v3417_v30 }
 0x341   : > { %v2697_v21 = vpop.f32.mrf.mxu0 }
 0x342   : > { %3669 = vst.msk [vmem:[%s7095_s20 + $0xf0] sm:$0xff] %vm1280_vm1, %v3635_v49  ;;  %v2915_v10 = vadd.f32 %v2914_v23, %v2697_v21  ;;  %3763 = vrot.lane.b32.xlu1 %v3635_v49, %s7988_s14 }
 0x344   : > { %2948 = vst.msk [vmem:[%s7073_s29 + $0xf8] sm:$0xff] %vm1280_vm1, %v2915_v10  ;;  %v3742_v47 = vpop.permute.xlu2 %3741  ;;  %3043 = vrot.lane.b32.xlu0 %v2915_v10, %s7988_s14 }
 0x345   : > { %3818 = vst.msk [vmem:[%s7303_s23 + $0x98] sm:$0xff] %vm1280_vm1, %v3742_v47 }
 0x346   : > { %v3016_v44 = vpop.permute.xlu1 %3015 }
 0x347   : > { %4775 = shalt.err (!%p4772_p0)
}
 0x348   : > { %s7993_s27 = smov 128   ;;  %s5056_s16 = smov 8   ;;  %v3636_v13 = vpop.f32.mrf.mxu3  ;;  %3094 = vst.msk [vmem:[%s7270_s21 + $0x88] sm:$0xff] %vm1280_vm1, %v3016_v44  ;;  %v3419_v59 = vpop.f32.mrf.mxu2 }
 0x349   : > { %4579 = dma.vmem_to_hbm [thread:$0]  (%p5184_p5), %s7509_s15, 4096, %s3905_s12, %s7992_s28, %s7993_s27, %s7993_s27, %s5056_s16   ;;  %v3637_v53 = vadd.f32 %v3636_v13, %v3419_v59 }
 0x34a   : > { %s7991_s1 = scalar_lea.sflag [#allocation12], %s7494_s25  ;;  %s4790_s11 = sshra.s32 %s3945_s22, 4  ;;  %s4791_s11 = int_to_ptr.hbm [resolvable:$true] %s4790_s11 }
 0x34b   : > { %s4792_s13 = scalar_lea.hbm %s4791_s11, 256  ;;  %s4796_s8 = scalar_lea.hbm %s7810_s5, 512 }
 0x34c   : > { %p4793_p3 = scmp.ne.s32.totalorder %s4791_s11, %s4792_s13  ;;  %p4797_p2 = scmp.lt.s32.totalorder %s4791_s11, %s7810_s5 }
 0x34d   : > { %p4798_p1 = scmp.lt.s32.totalorder %s4796_s8, %s4792_s13 }
 0x34e   : > { %p4794_p7 = pnand %p4793_p3, %p5184_p5 }
 0x34f   : > { %p4799_p4 = por %p4798_p1, %p4797_p2 }
 0x350   : > { %p4795_p9 = pneg %p4794_p7 }
 0x352   : > { %p4800_p8 = pnand %p4799_p4, %p4795_p9 }
 0x354   : > { %4803 = shalt.err (!%p4800_p8)
}
 0x355   : > { %4581 = dma.vmem_to_hbm [thread:$0]  (%p5184_p5), %s3943_s18, 4096, %s3945_s22, %s7991_s1, %s7993_s27, %s7993_s27, %s5056_s16   ;;  %v3738_v51 = vpop.permute.xlu0 %3737  ;;  %v3024_v31 = vpop.permute.xlu2 %3023 }
 0x356   : > { %3670 = vst.msk [vmem:[%s7095_s20 + $0xf8] sm:$0xff] %vm1280_vm1, %v3637_v53  ;;  %s8312_s9 = smov 120   ;;  %s8313_s2 = sld [smem:[#allocation104_spill]] }
 0x357   : > { %3765 = vrot.lane.b32.xlu2 %v3637_v53, %s8312_s9  ;;  %3761 = vrot.lane.b32.xlu0 %v7481_v41, %s8312_s9  ;;  %3816 = vst.msk [vmem:[%s7303_s23 + $0x88] sm:$0xff] %vm1280_vm1, %v3738_v51  ;;  %s3882_s14 = sshll.u32 %s5918_s30, 4  ;;  %s3921_s15 = scalar_lea.hbm %s7809_s4, %s7497_s26  ;;  %s3883_s14 = int_to_ptr.vmem [resolvable:$true] %s3882_s14 }
 0x358   : > { %3098 = vst.msk [vmem:[%s7270_s21 + $0xa8] sm:$0xff] %vm1280_vm1, %v3024_v31  ;;  %s3922_s12 = sshll.u32 %s5932_s17, 4  ;;  %s3832_s9 = scalar_lea.sflag [#allocation4], %s5208_s0  ;;  %s3923_s12 = int_to_ptr.vmem [resolvable:$true] %s3922_s12 }
 0x35c   : > { %s3881_s24 = scalar_lea.hbm %s8313_s2, %s7497_s26 }
 0x35d   : > { %s3884_s8 = sshll.u32 %s3881_s24, 4  ;;  %s4824_s24 = scalar_lea.hbm %s8313_s2, 512  ;;  %s3885_s8 = int_to_ptr.hbm [resolvable:$true] %s3884_s8 }
 0x35e   : > { %s4818_s1 = sshra.s32 %s3885_s8, 4  ;;  %s4819_s1 = int_to_ptr.hbm [resolvable:$true] %s4818_s1 }
 0x35f   : > { %s4820_s11 = scalar_lea.hbm %s4819_s1, 256  ;;  %p4825_p0 = scmp.lt.s32.totalorder %s4819_s1, %s8313_s2 }
 0x360   : > { %p4821_p10 = scmp.ne.s32.totalorder %s4819_s1, %s4820_s11  ;;  %p4826_p3 = scmp.lt.s32.totalorder %s4824_s24, %s4820_s11 }
 0x362   : > { %p4822_p12 = pnand %p4821_p10, %p5184_p5  ;;  %p4827_p7 = por %p4826_p3, %p4825_p0 }
 0x364   : > { %p4823_p13 = pneg %p4822_p12 }
 0x366   : > { %p4828_p9 = pnand %p4827_p7, %p4823_p13 }
 0x368   : > { %4831 = shalt.err (!%p4828_p9)
}
 0x369   : > { %s8314_s17 = smov 128   ;;  %s3924_s18 = sshll.u32 %s3921_s15, 4  ;;  %s3925_s18 = int_to_ptr.hbm [resolvable:$true] %s3924_s18 }
 0x36a   : > { %4578 = dma.vmem_to_hbm [thread:$0]  (%p5184_p5), %s3883_s14, 4096, %s3885_s8, %s3832_s9, %s8314_s17, %s8314_s17, %s5056_s16  }
 0x36b   : > { %s3961_s28 = scalar_lea.hbm %s7811_s6, %s7497_s26  ;;  %s4846_s27 = sshra.s32 %s3925_s18, 4  ;;  %s4847_s27 = int_to_ptr.hbm [resolvable:$true] %s4846_s27 }
 0x36c   : > { %s4848_s1 = scalar_lea.hbm %s4847_s27, 256  ;;  %s4852_s24 = scalar_lea.hbm %s7809_s4, 512 }
 0x36d   : > { %p4849_p2 = scmp.ne.s32.totalorder %s4847_s27, %s4848_s1  ;;  %p4853_p8 = scmp.lt.s32.totalorder %s4847_s27, %s7809_s4 }
 0x36e   : > { %p4854_p10 = scmp.lt.s32.totalorder %s4852_s24, %s4848_s1 }
 0x36f   : > { %p4850_p1 = pnand %p4849_p2, %p5184_p5 }
 0x370   : > { %p4855_p12 = por %p4854_p10, %p4853_p8 }
 0x371   : > { %p4851_p4 = pneg %p4850_p1 }
 0x373   : > { %p4856_p13 = pnand %p4855_p12, %p4851_p4 }
 0x375   : > { %4859 = shalt.err (!%p4856_p13)
}
 0x376   : > { %s8315_s8 = scalar_lea.sflag [#allocation9], %s7494_s25  ;;  %v3740_v14 = vpop.permute.xlu1 %3739  ;;  %s3962_s15 = sshll.u32 %s7073_s29, 4  ;;  %v3020_v8 = vpop.permute.xlu0 %3019  ;;  %s3963_s15 = int_to_ptr.vmem [resolvable:$true] %s3962_s15 }
 0x377   : > { %4580 = dma.vmem_to_hbm [thread:$0]  (%p5184_p5), %s3923_s12, 4096, %s3925_s18, %s8315_s8, %s8314_s17, %s8314_s17, %s5056_s16  }
 0x378   : > { %s3964_s9 = sshll.u32 %s3961_s28, 4  ;;  %3817 = vst.msk [vmem:[%s7303_s23 + $0x90] sm:$0xff] %vm1280_vm1, %v3740_v14  ;;  %s4880_s1 = scalar_lea.hbm %s7811_s6, 512  ;;  %s3965_s9 = int_to_ptr.hbm [resolvable:$true] %s3964_s9 }
 0x379   : > { %s4874_s2 = sshra.s32 %s3965_s9, 4  ;;  %s4875_s2 = int_to_ptr.hbm [resolvable:$true] %s4874_s2 }
 0x37a   : > { %s4876_s22 = scalar_lea.hbm %s4875_s2, 256  ;;  %p4881_p9 = scmp.lt.s32.totalorder %s4875_s2, %s7811_s6 }
 0x37b   : > { %p4877_p0 = scmp.ne.s32.totalorder %s4875_s2, %s4876_s22  ;;  %p4882_p2 = scmp.lt.s32.totalorder %s4880_s1, %s4876_s22 }
 0x37d   : > { %p4878_p3 = pnand %p4877_p0, %p5184_p5  ;;  %p4883_p1 = por %p4882_p2, %p4881_p9 }
 0x37f   : > { %p4879_p7 = pneg %p4878_p3 }
 0x381   : > { %p4884_p4 = pnand %p4883_p1, %p4879_p7 }
 0x383   : > { %4887 = shalt.err (!%p4884_p4)
}
 0x384   : > { %s8316_s29 = scalar_lea.sflag [#allocation12], %s7494_s25  ;;  %3096 = vst.msk [vmem:[%s7270_s21 + $0x98] sm:$0xff] %vm1280_vm1, %v3020_v8  ;;  %v3748_v27 = vpop.permute.xlu2 %3747  ;;  %v3022_v29 = vpop.permute.xlu1 %3021  ;;  %s3981_s13 = scalar_lea.hbm %s7812_s7, %s7497_s26 }
 0x385   : > { %4582 = dma.vmem_to_hbm [thread:$0]  (%p5184_p5), %s3963_s15, 4096, %s3965_s9, %s8316_s29, %s8314_s17, %s8314_s17, %s5056_s16   ;;  %v3744_v22 = vpop.permute.xlu0 %3743 }
 0x386   : > { %3821 = vst.msk [vmem:[%s7303_s23 + $0xb0] sm:$0xff] %vm1280_vm1, %v3748_v27  ;;  %s8317_s8 = sld [smem:[#allocation105_spill]]  ;;  %s3982_s9 = sshll.u32 %s7270_s21, 4  ;;  %s3983_s9 = int_to_ptr.vmem [resolvable:$true] %s3982_s9 }
 0x387   : > { %3097 = vst.msk [vmem:[%s7270_s21 + $0xa0] sm:$0xff] %vm1280_vm1, %v3022_v29  ;;  %s7681_s2 = sshll.u32 %s3981_s13, 4  ;;  %s4002_s22 = sshll.u32 %s7095_s20, 4  ;;  %s3985_s2 = int_to_ptr.hbm [resolvable:$true] %s7681_s2  ;;  %s7689_s22 = int_to_ptr.vmem [resolvable:$true] %s4002_s22 }
 0x388   : > { %3819 = vst.msk [vmem:[%s7303_s23 + $0xa0] sm:$0xff] %vm1280_vm1, %v3744_v22  ;;  %s8319_s12 = sld [smem:[#allocation106_spill]]  ;;  %s3857_s20 = scalar_lea.sflag [#allocation15], %s7494_s25 }
 0x389   : > { %s4902_s28 = sshra.s32 %s3985_s2, 4  ;;  %s4908_s14 = scalar_lea.hbm %s7812_s7, 512  ;;  %s4903_s28 = int_to_ptr.hbm [resolvable:$true] %s4902_s28 }
 0x38a   : > { %s4904_s11 = scalar_lea.hbm %s4903_s28, 256  ;;  %p4909_p13 = scmp.lt.s32.totalorder %s4903_s28, %s7812_s7 }
 0x38b   : > { %p4905_p8 = scmp.ne.s32.totalorder %s4903_s28, %s4904_s11  ;;  %p4910_p0 = scmp.lt.s32.totalorder %s4908_s14, %s4904_s11 }
 0x38c   : > { %v3030_v39 = vpop.permute.xlu2 %3029  ;;  %v3746_v3 = vpop.permute.xlu1 %3745  ;;  %s4001_s15 = scalar_lea.hbm %s8317_s8, %s7497_s26 }
 0x38d   : > { %3101 = vst.msk [vmem:[%s7270_s21 + $0xc0] sm:$0xff] %vm1280_vm1, %v3030_v39  ;;  %v3026_v32 = vpop.permute.xlu0 %3025  ;;  %s7684_s30 = sshll.u32 %s4001_s15, 4  ;;  %p4906_p10 = pnand %p4905_p8, %p5184_p5 }
 0x38e   : > { %3820 = vst.msk [vmem:[%s7303_s23 + $0xa8] sm:$0xff] %vm1280_vm1, %v3746_v3  ;;  %8318 = sst [smem:[#allocation101_spill]] %s7684_s30  ;;  %s8320_s18 = smov %s8319_s12 }
 0x38f   : > { %3099 = vst.msk [vmem:[%s7270_s21 + $0xb0] sm:$0xff] %vm1280_vm1, %v3026_v32  ;;  %s4021_s29 = scalar_lea.hbm %s8319_s12, %s7497_s26  ;;  %p4907_p12 = pneg %p4906_p10 }
 0x390   : > { %p4911_p3 = por %p4910_p0, %p4909_p13 }
 0x392   : > { %p4912_p7 = pnand %p4911_p3, %p4907_p12 }
 0x394   : > { %v3754_v34 = vpop.permute.xlu2 %3753  ;;  %v3028_v50 = vpop.permute.xlu1 %3027 }
 0x395   : > { %3824 = vst.msk [vmem:[%s7303_s23 + $0xc8] sm:$0xff] %vm1280_vm1, %v3754_v34  ;;  %v3750_v9 = vpop.permute.xlu0 %3749 }
 0x396   : > { %3100 = vst.msk [vmem:[%s7270_s21 + $0xb8] sm:$0xff] %vm1280_vm1, %v3028_v50 }
 0x397   : > { %3822 = vst.msk [vmem:[%s7303_s23 + $0xb8] sm:$0xff] %vm1280_vm1, %v3750_v9 }
 0x39c   : > { %v3036_v60 = vpop.permute.xlu2 %3035  ;;  %v3752_v17 = vpop.permute.xlu1 %3751 }
 0x39d   : > { %3104 = vst.msk [vmem:[%s7270_s21 + $0xd8] sm:$0xff] %vm1280_vm1, %v3036_v60  ;;  %v3032_v54 = vpop.permute.xlu0 %3031 }
 0x39e   : > { %3823 = vst.msk [vmem:[%s7303_s23 + $0xc0] sm:$0xff] %vm1280_vm1, %v3752_v17 }
 0x39f   : > { %3102 = vst.msk [vmem:[%s7270_s21 + $0xc8] sm:$0xff] %vm1280_vm1, %v3032_v54 }
 0x3a4   : > { %v3760_v61 = vpop.permute.xlu2 %3759  ;;  %v3034_v16 = vpop.permute.xlu1 %3033 }
 0x3a5   : > { %3827 = vst.msk [vmem:[%s7303_s23 + $0xe0] sm:$0xff] %vm1280_vm1, %v3760_v61  ;;  %v3756_v35 = vpop.permute.xlu0 %3755 }
 0x3a6   : > { %3103 = vst.msk [vmem:[%s7270_s21 + $0xd0] sm:$0xff] %vm1280_vm1, %v3034_v16 }
 0x3a7   : > { %3825 = vst.msk [vmem:[%s7303_s23 + $0xd0] sm:$0xff] %vm1280_vm1, %v3756_v35 }
 0x3ac   : > { %v3042_v42 = vpop.permute.xlu2 %3041  ;;  %v3758_v7 = vpop.permute.xlu1 %3757 }
 0x3ad   : > { %3107 = vst.msk [vmem:[%s7270_s21 + $0xf0] sm:$0xff] %vm1280_vm1, %v3042_v42  ;;  %v3038_v62 = vpop.permute.xlu0 %3037 }
 0x3ae   : > { %3826 = vst.msk [vmem:[%s7303_s23 + $0xd8] sm:$0xff] %vm1280_vm1, %v3758_v7 }
 0x3af   : > { %3105 = vst.msk [vmem:[%s7270_s21 + $0xe0] sm:$0xff] %vm1280_vm1, %v3038_v62 }
 0x3b4   : > { %v3766_v52 = vpop.permute.xlu2 %3765  ;;  %v3040_v25 = vpop.permute.xlu1 %3039 }
 0x3b5   : > { %3830 = vst.msk [vmem:[%s7303_s23 + $0xf8] sm:$0xff] %vm1280_vm1, %v3766_v52 }
 0x3b6   : > { %3106 = vst.msk [vmem:[%s7270_s21 + $0xe8] sm:$0xff] %vm1280_vm1, %v3040_v25  ;;  %v3044_v15 = vpop.permute.xlu0 %3043 }
 0x3b7   : > { %3108 = vst.msk [vmem:[%s7270_s21 + $0xf8] sm:$0xff] %vm1280_vm1, %v3044_v15 }
 0x3bc   : > { %v3764_v48 = vpop.permute.xlu1 %3763 }
 0x3bd   : > { %3829 = vst.msk [vmem:[%s7303_s23 + $0xf0] sm:$0xff] %vm1280_vm1, %v3764_v48 }
 0x3be   : > { %4915 = shalt.err (!%p4912_p7)
}
 0x3bf   : > { %s8321_s21 = sld [smem:[#allocation101_spill]]  ;;  %s4936_s11 = scalar_lea.hbm %s8317_s8, 512 }
 0x3c0   : > { %4583 = dma.vmem_to_hbm [thread:$0]  (%p5184_p5), %s3983_s9, 4096, %s3985_s2, %s3857_s20, %s8314_s17, %s8314_s17, %s5056_s16  }
 0x3c5   : > { %s8322_s27 = int_to_ptr.hbm [resolvable:$true] %s8321_s21 }
 0x3c6   : > { %s4930_s1 = sshra.s32 %s8322_s27, 4  ;;  %s4931_s1 = int_to_ptr.hbm [resolvable:$true] %s4930_s1 }
 0x3c7   : > { %s4932_s12 = scalar_lea.hbm %s4931_s1, 256  ;;  %p4937_p4 = scmp.lt.s32.totalorder %s4931_s1, %s8317_s8 }
 0x3c8   : > { %p4933_p9 = scmp.ne.s32.totalorder %s4931_s1, %s4932_s12  ;;  %p4938_p8 = scmp.lt.s32.totalorder %s4936_s11, %s4932_s12 }
 0x3ca   : > { %p4934_p2 = pnand %p4933_p9, %p5184_p5  ;;  %p4939_p10 = por %p4938_p8, %p4937_p4 }
 0x3cc   : > { %p4935_p1 = pneg %p4934_p2 }
 0x3ce   : > { %p4940_p12 = pnand %p4939_p10, %p4935_p1 }
 0x3d0   : > { %4943 = shalt.err (!%p4940_p12)
}
 0x3d1   : > { %s8323_s9 = smov %s8322_s27  ;;  %s4022_s2 = sshll.u32 %s7303_s23, 4  ;;  %v3762_v43 = vpop.permute.xlu0 %3761  ;;  %s4023_s2 = int_to_ptr.vmem [resolvable:$true] %s4022_s2 }
 0x3d2   : > { %4584 = dma.vmem_to_hbm [thread:$0]  (%p5184_p5), %s7689_s22, 4096, %s8323_s9, %s3857_s20, %s8314_s17, %s8314_s17, %s5056_s16  }
 0x3d3   : > { %s4024_s27 = sshll.u32 %s4021_s29, 4  ;;  %3828 = vst.msk [vmem:[%s7303_s23 + $0xe8] sm:$0xff] %vm1280_vm1, %v3762_v43  ;;  %s3867_s25 = scalar_lea.sflag [#allocation18], %s5208_s0  ;;  %s4025_s27 = int_to_ptr.hbm [resolvable:$true] %s4024_s27 }
 0x3d4   : > { %s4958_s21 = sshra.s32 %s4025_s27, 4  ;;  %s4964_s12 = scalar_lea.hbm %s8320_s18, 512  ;;  %s4959_s21 = int_to_ptr.hbm [resolvable:$true] %s4958_s21 }
 0x3d5   : > { %s4960_s1 = scalar_lea.hbm %s4959_s21, 256  ;;  %p4965_p7 = scmp.lt.s32.totalorder %s4959_s21, %s8320_s18 }
 0x3d6   : > { %p4961_p13 = scmp.ne.s32.totalorder %s4959_s21, %s4960_s1  ;;  %p4966_p9 = scmp.lt.s32.totalorder %s4964_s12, %s4960_s1 }
 0x3d8   : > { %p4962_p0 = pnand %p4961_p13, %p5184_p5  ;;  %p4967_p2 = por %p4966_p9, %p4965_p7 }
 0x3da   : > { %p4963_p3 = pneg %p4962_p0 }
 0x3dc   : > { %p4968_p1 = pnand %p4967_p2, %p4963_p3 }
 0x3de   : > { %4971 = shalt.err (!%p4968_p1)
}
 0x3df   : > { %4585 = dma.vmem_to_hbm [thread:$0]  (%p5184_p5), %s4023_s2, 4096, %s4025_s27, %s3867_s25, %s8314_s17, %s8314_s17, %s5056_s16  }
 0x3e0 PF: > { %s8324_s0 = sld [smem:[#allocation26_spill]]  ;;  %p4603_p4 = pnand %p4371_p11, %p5154_p6 }
 0x3e1   : > { %s8326_s29 = sld [smem:[#allocation29_spill]] }
 0x3e2   : > { %p7761_p8 = pneg %p4603_p4 }
 0x3e6   : > { %s4039_s28 = sand.u32 1, %s8324_s0  }
 0x3e7   : > { %s4040_s13 = scalar_lea.sflag [#allocation4], %s4039_s28 }
 0x3e8   : > { %5005 = dma.done.wait (%p7761_p8), %s4040_s13, 4096  }
 0x3e9   : > { %5007 = vsyncadd (%p7761_p8), %s4040_s13, 4294963200  ;;  %s8328_s19 = sadd.s32 4294967294, %s8326_s29  }
 0x3ea   : > { %s4049_s16 = sand.u32 1, %s8328_s19  }
 0x3eb   : > { %s4050_s17 = scalar_lea.sflag [#allocation9], %s4049_s16 }
 0x3ec   : > { %5009 = dma.done.wait (%p7761_p8), %s4050_s17, 8192  }
 0x3ed   : > { %5011 = vsyncadd (%p7761_p8), %s4050_s17, 4294959104  ;;  %s4070_s24 = scalar_lea.sflag [#allocation12], %s4049_s16 }
 0x3ee   : > { %5013 = dma.done.wait (%p7761_p8), %s4070_s24, 8192  }
 0x3ef   : > { %5015 = vsyncadd (%p7761_p8), %s4070_s24, 4294959104  ;;  %s4090_s9 = scalar_lea.sflag [#allocation15], %s4049_s16 }
 0x3f0   : > { %5017 = dma.done.wait (%p7761_p8), %s4090_s9, 8192  }
 0x3f1   : > { %5019 = vsyncadd (%p7761_p8), %s4090_s9, 4294959104  ;;  %s4110_s2 = scalar_lea.sflag [#allocation18], %s4039_s28 }
 0x3f2   : > { %5021 = dma.done.wait (%p7761_p8), %s4110_s2, 4096  }
 0x3f3   : > { %5023 = vsyncadd (%p7761_p8), %s4110_s2, 4294963200  ;;  %s39_s14 = sadd.s32 1, %s8326_s29   ;;  %s8329_s15 = sld [smem:[#allocation27_spill]] }
 0x3f4   : > { %p36_p6 = scmp.ge.s32.totalorder %s39_s14, 4   ;;  %s8330_s11 = sld [smem:[#allocation32_spill]] }
 0x3f5   : > { %s8331_s12 = sld [smem:[#allocation28_spill]]  ;;  %s8333_s30 = smov %s5030_s10 }
 0x3f6   : > { %s8332_s13 = sld [smem:[#allocation31_spill]]  ;;  %38 = sbr.rel (!%p36_p6) target bundleno = 21 (0x15), region = 191 }
 0x3f9   : > { %s8334_s10 = smov %s8329_s15 }
 0x3fb   :  { %4116 = vsyncpa [#allocation3], 1 }
 0x3fc   :  { %4118 = vsyncpa [#allocation3 + $0x1], 1 }
 0x3fd   :  { %4119 = vsyncpa [#allocation6], 1 }
 0x3fe   :  { %4121 = vsyncpa [#allocation6 + $0x1], 1 }
 0x3ff   :  { %4122 = vsyncpa [#allocation4], 1 }
 0x400   :  { %4124 = vsyncpa [#allocation4 + $0x1], 1 }
 0x401   :  { %4125 = vsyncpa [#allocation9], 1 }
 0x402   :  { %4127 = vsyncpa [#allocation9 + $0x1], 1 }
 0x403   :  { %4128 = vsyncpa [#allocation12], 1 }
 0x404   :  { %4130 = vsyncpa [#allocation12 + $0x1], 1 }
 0x405   :  { %4131 = vsyncpa [#allocation15], 1 }
 0x406   :  { %4133 = vsyncpa [#allocation15 + $0x1], 1 }
 0x407   :  { %4134 = vsyncpa [#allocation18], 1 }
 0x408   :  { %4136 = vsyncpa [#allocation18 + $0x1], 1 }

</bundles_post_ra>
